<compile_context>
chip_gen: v5e
topology: v5e:2x2
jax: 0.10.0
libtpu: 0.0.40
codegen_flags: <defaults>
</compile_context>

<pallas_src>
import jax
import jax.numpy as jnp
from jax.experimental import pallas as pl
from jax.experimental.pallas import tpu as pltpu

_EPS = 1e-5  # nn.InstanceNorm2d default (affine=False, biased variance)


# -----------------------------------------------------------------------------
# Fused kernel: whole residual block for one image
# -----------------------------------------------------------------------------
def _resblock_kernel(xr_ref, w1_ref, w2_ref, o_ref, shift_ref):
    """xr_ref:   ((H+2)*W, C) f32   row-reflection-padded image, channels-last
       w1_ref:   (9, C, C)    bf16  layer-1 weights, [ki*3+kj, cin, cout]
       w2_ref:   (9, C, C)    bf16  layer-2 weights
       o_ref:    (H*W, C)     f32   output (channels-last, flattened)
       shift_ref:((H+2)*W+8,C)f32   VMEM scratch used to build +-1 row shifts
    """
    HpW, C = xr_ref.shape
    HW, _ = o_ref.shape
    W = (HpW - HW) // 2                     # HpW = (H+2)*W, HW = H*W

    # Column index within each image row (shared by both layers).
    t = jax.lax.broadcasted_iota(jnp.int32, (HpW, 1), 0)
    col = t % W
    is_first_col = col == 0
    is_last_col = col == W - 1

    xr = xr_ref[...]                        # (HpW, C) f32
    w1 = w1_ref[...]
    w2 = w2_ref[...]

    def conv3x3(yrow, w):
        """3x3 conv with in-kernel reflection column padding.

        yrow: (HpW, C) f32, rows already reflection padded, channels last.
        w:    (9, C, C) bf16.
        Returns the (HW, C) f32 accumulator (no bias: it cancels in IN).
        """
        # Column-shifted variants via the shift scratch:
        #   y_dn[t] = yrow[t-1],   y_up[t] = yrow[t+1]
        # (the one out-of-range row at each end is never selected below).
        shift_ref[1:HpW + 1, :] = yrow
        y_dn = shift_ref[0:HpW, :]
        y_up = shift_ref[2:HpW + 2, :]
        cols = (
            jnp.where(is_first_col, y_up, y_dn).astype(jnp.bfloat16),  # kj = 0
            yrow.astype(jnp.bfloat16),                                 # kj = 1
            jnp.where(is_last_col, y_dn, y_up).astype(jnp.bfloat16),   # kj = 2
        )
        acc = jnp.zeros((HW, C), jnp.float32)
        for k in range(9):
            ki, kj = divmod(k, 3)
            tap = cols[kj][ki * W:ki * W + HW, :]        # aligned row window
            acc = acc + jnp.dot(tap, w[k],
                                preferred_element_type=jnp.float32)
        return acc

    def instance_norm(acc):
        # single-pass centered statistics (biased variance, eps=1e-5)
        mean = jnp.mean(acc, axis=0, keepdims=True)
        centered = acc - mean
        var = jnp.mean(centered * centered, axis=0, keepdims=True)
        return centered * jax.lax.rsqrt(var + _EPS)

    # layer 1: conv3x3 -> InstanceNorm -> ReLU            (stays in VMEM/vregs)
    y1 = jnp.maximum(instance_norm(conv3x3(xr, w1)), 0.0)          # (HW, C)

    # in-kernel row reflection pad of y1 for layer 2 (columns handled in conv3x3)
    y1r = jnp.concatenate(
        [y1[W:2 * W, :], y1, y1[HW - 2 * W:HW - W, :]], axis=0)     # (HpW, C)

    # layer 2: conv3x3 -> InstanceNorm -> + x (f32 skip path)
    y2 = instance_norm(conv3x3(y1r, w2))
    o_ref[...] = xr[W:W + HW, :] + y2


def _fused_residual_block(xr, w1, w2, H, W):
    """xr: (N, (H+2)*W, C) f32; w1, w2: (9, C, C) bf16 -> (N, H*W, C) f32."""
    N, HpW, C = xr.shape
    HW = H * W
    return pl.pallas_call(
        _resblock_kernel,
        out_shape=jax.ShapeDtypeStruct((N, HW, C), jnp.float32),
        grid=(N,),
        in_specs=[
            pl.BlockSpec((None, HpW, C), lambda n: (n, 0, 0)),
            pl.BlockSpec((9, C, C), lambda n: (0, 0, 0)),   # resident weights
            pl.BlockSpec((9, C, C), lambda n: (0, 0, 0)),
        ],
        out_specs=pl.BlockSpec((None, HW, C), lambda n: (n, 0, 0)),
        scratch_shapes=[pltpu.VMEM((HpW + 8, C), jnp.float32)],
        compiler_params=pltpu.CompilerParams(
            dimension_semantics=("parallel",)),   # v7x: batch split across TCs
    )(xr, w1, w2)


# -----------------------------------------------------------------------------
# Host glue (tiny, fused by XLA under the single outer jit)
# -----------------------------------------------------------------------------
@jax.jit
def residual_block_forward(params, x):
    """x: (N, C, H, W) float32 NCHW -> (N, C, H, W) float32."""
    N, C, H, W = x.shape

    # Row-only reflection pad + NCHW -> channels-last flat layout. Same size
    # class as x (no 9x im2col intermediate); column reflection is in-kernel.
    xr = jnp.pad(x, ((0, 0), (0, 0), (1, 1), (0, 0)), mode="reflect")
    xr = jnp.transpose(xr, (0, 2, 3, 1)).reshape(N, (H + 2) * W, C)
    xr = xr.astype(jnp.float32)

    # Weight layout: w[k = ki*3 + kj, cin, cout].  Conv biases are dropped —
    # a per-channel constant added before affine-free InstanceNorm cancels.
    w1 = jnp.transpose(params["w1"], (2, 3, 1, 0)).reshape(9, C, C)
    w2 = jnp.transpose(params["w2"], (2, 3, 1, 0)).reshape(9, C, C)

    out = _fused_residual_block(xr, w1.astype(jnp.bfloat16),
                                w2.astype(jnp.bfloat16), H, W)   # (N, HW, C)
    return jnp.transpose(out.reshape(N, H, W, C), (0, 3, 1, 2))


# -----------------------------------------------------------------------------
# Pure-JAX reference (f32, includes the biases) for a correctness check
# -----------------------------------------------------------------------------
@jax.jit
def _reference_forward(params, x):
    def conv3x3(h, w, b):
        hp = jnp.pad(h, ((0, 0), (0, 0), (1, 1), (1, 1)), mode="reflect")
        y = jax.lax.conv_general_dilated(
            hp, w, window_strides=(1, 1), padding="VALID",
            dimension_numbers=("NCHW", "OIHW", "NCHW"))
        return y + b[None, :, None, None]

    def inorm(y):
        m = jnp.mean(y, axis=(2, 3), keepdims=True)
        v = jnp.var(y, axis=(2, 3), keepdims=True)
        return (y - m) * jax.lax.rsqrt(v + _EPS)

    h = jax.nn.relu(inorm(conv3x3(x, params["w1"], params["b1"])))
    h = inorm(conv3x3(h, params["w2"], params["b2"]))
    return x + h


# -----------------------------------------------------------------------------
if __name__ == "__main__":
    key = jax.random.PRNGKey(0)
    k_x, k_w1, k_b1, k_w2, k_b2 = jax.random.split(key, 5)

    # dim = nef * 4 = 32 as used by the residual blocks in the UNIT model.
    N, dim, H, W = 2, 32, 16, 16
    fan_in = float(3 * 3 * dim)

    x = jax.random.normal(k_x, (N, dim, H, W), jnp.float32)
    params = {
        "w1": jax.random.normal(k_w1, (dim, dim, 3, 3), jnp.float32) / fan_in ** 0.5,
        "b1": jax.random.normal(k_b1, (dim,), jnp.float32) * 0.02,
        "w2": jax.random.normal(k_w2, (dim, dim, 3, 3), jnp.float32) / fan_in ** 0.5,
        "b2": jax.random.normal(k_b2, (dim,), jnp.float32) * 0.02,
    }

    out = jax.block_until_ready(residual_block_forward(params, x))
    assert out.shape == (N, dim, H, W)
    assert bool(jnp.all(jnp.isfinite(out)))

    ref = jax.block_until_ready(_reference_forward(params, x))
    max_err = float(jnp.max(jnp.abs(out - ref)))
    assert max_err < 0.15, f"max abs err vs f32 reference: {max_err}"

    print("KERNEL_OK")
</pallas_src>

<mosaic_0001>
module attributes {stable_mosaic.version = 11 : i64} {
  func.func @_resblock_kernel(%arg0: i32, %arg1: memref<1x288x32xf32, #tpu.memory_space<vmem>>, %arg2: memref<9x32x32xbf16, #tpu.memory_space<vmem>>, %arg3: memref<9x32x32xbf16, #tpu.memory_space<vmem>>, %arg4: memref<1x256x32xf32, #tpu.memory_space<vmem>>, %arg5: memref<296x32xf32, #tpu.memory_space<vmem>>) attributes {dimension_semantics = [#tpu.dimension_semantics<parallel>], iteration_bounds = array<i64: 2>, scalar_prefetch = 0 : i64, scratch_operands = 1 : i64, tpu.core_type = #tpu.core_type<tc>, window_params = [{transform_indices = @transform_0, window_bounds = array<i64: 1, 288, 32>}, {pipeline_mode = #tpu.pipeline_mode<synchronous>, transform_indices = @transform_1, window_bounds = array<i64: 9, 32, 32>}, {pipeline_mode = #tpu.pipeline_mode<synchronous>, transform_indices = @transform_2, window_bounds = array<i64: 9, 32, 32>}, {transform_indices = @transform_3, window_bounds = array<i64: 1, 256, 32>}]} {
    %0 = tpu.iota {dimensions = array<i32: 0>} : vector<288x1xi32>
    %c16_i32 = arith.constant 16 : i32
    %c0_i32 = arith.constant 0 : i32
    %1 = arith.cmpi eq, %c16_i32, %c0_i32 : i32
    %c1_i32 = arith.constant 1 : i32
    %2 = arith.select %1, %c1_i32, %c16_i32 : i32
    %3 = vector.broadcast %2 : i32 to vector<288x1xi32>
    %4 = arith.remsi %0, %3 : vector<288x1xi32>
    %c0_i32_0 = arith.constant 0 : i32
    %5 = vector.broadcast %c0_i32_0 : i32 to vector<288x1xi32>
    %6 = arith.cmpi ne, %4, %5 : vector<288x1xi32>
    %c0_i32_1 = arith.constant 0 : i32
    %7 = vector.broadcast %c0_i32_1 : i32 to vector<288x1xi32>
    %8 = arith.cmpi slt, %4, %7 : vector<288x1xi32>
    %c0_i32_2 = arith.constant 0 : i32
    %9 = arith.cmpi slt, %2, %c0_i32_2 : i32
    %10 = vector.broadcast %9 : i1 to vector<288x1xi1>
    %11 = vector.broadcast %10 : vector<288x1xi1> to vector<288x1xi1>
    %12 = arith.xori %8, %11 : vector<288x1xi1>
    %13 = arith.andi %12, %6 : vector<288x1xi1>
    %14 = vector.broadcast %2 : i32 to vector<288x1xi32>
    %15 = arith.addi %4, %14 : vector<288x1xi32>
    %16 = arith.select %13, %15, %4 : vector<288x1xi1>, vector<288x1xi32>
    %c0_i32_3 = arith.constant 0 : i32
    %17 = vector.broadcast %c0_i32_3 : i32 to vector<288x1xi32>
    %18 = arith.cmpi eq, %16, %17 : vector<288x1xi32>
    %c15_i32 = arith.constant 15 : i32
    %19 = vector.broadcast %c15_i32 : i32 to vector<288x1xi32>
    %20 = arith.cmpi eq, %16, %19 : vector<288x1xi32>
    %c0 = arith.constant 0 : index
    %c0_4 = arith.constant 0 : index
    %c0_5 = arith.constant 0 : index
    %21 = vector.load %arg1[%c0, %c0_4, %c0_5] : memref<1x288x32xf32, #tpu.memory_space<vmem>>, vector<1x288x32xf32>
    %22 = vector.shape_cast %21 : vector<1x288x32xf32> to vector<288x32xf32>
    %c0_6 = arith.constant 0 : index
    %c0_7 = arith.constant 0 : index
    %c0_8 = arith.constant 0 : index
    %23 = vector.load %arg2[%c0_6, %c0_7, %c0_8] : memref<9x32x32xbf16, #tpu.memory_space<vmem>>, vector<9x32x32xbf16>
    %c0_9 = arith.constant 0 : index
    %c0_10 = arith.constant 0 : index
    %c0_11 = arith.constant 0 : index
    %24 = vector.load %arg3[%c0_9, %c0_10, %c0_11] : memref<9x32x32xbf16, #tpu.memory_space<vmem>>, vector<9x32x32xbf16>
    %c1 = arith.constant 1 : index
    %c0_12 = arith.constant 0 : index
    %25 = vector.load %arg5[%c1, %c0_12] : memref<296x32xf32, #tpu.memory_space<vmem>>, vector<288x32xf32>
    tpu.vector_store %arg5[%c1, %c0_12], %22 {strides = array<i32>} : memref<296x32xf32, #tpu.memory_space<vmem>>, vector<288x32xf32>,
    %c0_13 = arith.constant 0 : index
    %c0_14 = arith.constant 0 : index
    %26 = vector.load %arg5[%c0_13, %c0_14] : memref<296x32xf32, #tpu.memory_space<vmem>>, vector<288x32xf32>
    %c2 = arith.constant 2 : index
    %c0_15 = arith.constant 0 : index
    %27 = vector.load %arg5[%c2, %c0_15] : memref<296x32xf32, #tpu.memory_space<vmem>>, vector<288x32xf32>
    %28 = vector.shape_cast %18 : vector<288x1xi1> to vector<288x1xi1>
    %29 = vector.broadcast %28 : vector<288x1xi1> to vector<288x32xi1>
    %30 = arith.select %29, %27, %26 : vector<288x32xi1>, vector<288x32xf32>
    %31 = arith.truncf %30 : vector<288x32xf32> to vector<288x32xbf16>
    %32 = arith.truncf %22 : vector<288x32xf32> to vector<288x32xbf16>
    %33 = vector.shape_cast %20 : vector<288x1xi1> to vector<288x1xi1>
    %34 = vector.broadcast %33 : vector<288x1xi1> to vector<288x32xi1>
    %35 = arith.select %34, %26, %27 : vector<288x32xi1>, vector<288x32xf32>
    %36 = arith.truncf %35 : vector<288x32xf32> to vector<288x32xbf16>
    %cst = arith.constant 0.000000e+00 : f32
    %37 = vector.broadcast %cst : f32 to vector<256x32xf32>
    %38 = vector.extract_strided_slice %31 {offsets = [0, 0], sizes = [256, 32], strides = [1, 1]} : vector<288x32xbf16> to vector<256x32xbf16>
    %39 = vector.extract_strided_slice %23 {offsets = [0, 0, 0], sizes = [1, 32, 32], strides = [1, 1, 1]} : vector<9x32x32xbf16> to vector<1x32x32xbf16>
    %40 = vector.shape_cast %39 : vector<1x32x32xbf16> to vector<32x32xbf16>
    %cst_16 = arith.constant dense<0.000000e+00> : vector<256x32xf32>
    %41 = tpu.matmul %38, %40, %cst_16 {dimension_numbers = #tpu.dot_dimension_numbers<[1], [0], [0], [1], [0, 0, 1, 1], [], []>} : vector<256x32xbf16>, vector<32x32xbf16>, vector<256x32xf32> -> vector<256x32xf32>
    %42 = arith.addf %37, %41 : vector<256x32xf32>
    %43 = vector.extract_strided_slice %32 {offsets = [0, 0], sizes = [256, 32], strides = [1, 1]} : vector<288x32xbf16> to vector<256x32xbf16>
    %44 = vector.extract_strided_slice %23 {offsets = [1, 0, 0], sizes = [1, 32, 32], strides = [1, 1, 1]} : vector<9x32x32xbf16> to vector<1x32x32xbf16>
    %45 = vector.shape_cast %44 : vector<1x32x32xbf16> to vector<32x32xbf16>
    %cst_17 = arith.constant dense<0.000000e+00> : vector<256x32xf32>
    %46 = tpu.matmul %43, %45, %cst_17 {dimension_numbers = #tpu.dot_dimension_numbers<[1], [0], [0], [1], [0, 0, 1, 1], [], []>} : vector<256x32xbf16>, vector<32x32xbf16>, vector<256x32xf32> -> vector<256x32xf32>
    %47 = arith.addf %42, %46 : vector<256x32xf32>
    %48 = vector.extract_strided_slice %36 {offsets = [0, 0], sizes = [256, 32], strides = [1, 1]} : vector<288x32xbf16> to vector<256x32xbf16>
    %49 = vector.extract_strided_slice %23 {offsets = [2, 0, 0], sizes = [1, 32, 32], strides = [1, 1, 1]} : vector<9x32x32xbf16> to vector<1x32x32xbf16>
    %50 = vector.shape_cast %49 : vector<1x32x32xbf16> to vector<32x32xbf16>
    %cst_18 = arith.constant dense<0.000000e+00> : vector<256x32xf32>
    %51 = tpu.matmul %48, %50, %cst_18 {dimension_numbers = #tpu.dot_dimension_numbers<[1], [0], [0], [1], [0, 0, 1, 1], [], []>} : vector<256x32xbf16>, vector<32x32xbf16>, vector<256x32xf32> -> vector<256x32xf32>
    %52 = arith.addf %47, %51 : vector<256x32xf32>
    %53 = vector.extract_strided_slice %31 {offsets = [16, 0], sizes = [256, 32], strides = [1, 1]} : vector<288x32xbf16> to vector<256x32xbf16>
    %54 = vector.extract_strided_slice %23 {offsets = [3, 0, 0], sizes = [1, 32, 32], strides = [1, 1, 1]} : vector<9x32x32xbf16> to vector<1x32x32xbf16>
    %55 = vector.shape_cast %54 : vector<1x32x32xbf16> to vector<32x32xbf16>
    %cst_19 = arith.constant dense<0.000000e+00> : vector<256x32xf32>
    %56 = tpu.matmul %53, %55, %cst_19 {dimension_numbers = #tpu.dot_dimension_numbers<[1], [0], [0], [1], [0, 0, 1, 1], [], []>} : vector<256x32xbf16>, vector<32x32xbf16>, vector<256x32xf32> -> vector<256x32xf32>
    %57 = arith.addf %52, %56 : vector<256x32xf32>
    %58 = vector.extract_strided_slice %32 {offsets = [16, 0], sizes = [256, 32], strides = [1, 1]} : vector<288x32xbf16> to vector<256x32xbf16>
    %59 = vector.extract_strided_slice %23 {offsets = [4, 0, 0], sizes = [1, 32, 32], strides = [1, 1, 1]} : vector<9x32x32xbf16> to vector<1x32x32xbf16>
    %60 = vector.shape_cast %59 : vector<1x32x32xbf16> to vector<32x32xbf16>
    %cst_20 = arith.constant dense<0.000000e+00> : vector<256x32xf32>
    %61 = tpu.matmul %58, %60, %cst_20 {dimension_numbers = #tpu.dot_dimension_numbers<[1], [0], [0], [1], [0, 0, 1, 1], [], []>} : vector<256x32xbf16>, vector<32x32xbf16>, vector<256x32xf32> -> vector<256x32xf32>
    %62 = arith.addf %57, %61 : vector<256x32xf32>
    %63 = vector.extract_strided_slice %36 {offsets = [16, 0], sizes = [256, 32], strides = [1, 1]} : vector<288x32xbf16> to vector<256x32xbf16>
    %64 = vector.extract_strided_slice %23 {offsets = [5, 0, 0], sizes = [1, 32, 32], strides = [1, 1, 1]} : vector<9x32x32xbf16> to vector<1x32x32xbf16>
    %65 = vector.shape_cast %64 : vector<1x32x32xbf16> to vector<32x32xbf16>
    %cst_21 = arith.constant dense<0.000000e+00> : vector<256x32xf32>
    %66 = tpu.matmul %63, %65, %cst_21 {dimension_numbers = #tpu.dot_dimension_numbers<[1], [0], [0], [1], [0, 0, 1, 1], [], []>} : vector<256x32xbf16>, vector<32x32xbf16>, vector<256x32xf32> -> vector<256x32xf32>
    %67 = arith.addf %62, %66 : vector<256x32xf32>
    %68 = vector.extract_strided_slice %31 {offsets = [32, 0], sizes = [256, 32], strides = [1, 1]} : vector<288x32xbf16> to vector<256x32xbf16>
    %69 = vector.extract_strided_slice %23 {offsets = [6, 0, 0], sizes = [1, 32, 32], strides = [1, 1, 1]} : vector<9x32x32xbf16> to vector<1x32x32xbf16>
    %70 = vector.shape_cast %69 : vector<1x32x32xbf16> to vector<32x32xbf16>
    %cst_22 = arith.constant dense<0.000000e+00> : vector<256x32xf32>
    %71 = tpu.matmul %68, %70, %cst_22 {dimension_numbers = #tpu.dot_dimension_numbers<[1], [0], [0], [1], [0, 0, 1, 1], [], []>} : vector<256x32xbf16>, vector<32x32xbf16>, vector<256x32xf32> -> vector<256x32xf32>
    %72 = arith.addf %67, %71 : vector<256x32xf32>
    %73 = vector.extract_strided_slice %32 {offsets = [32, 0], sizes = [256, 32], strides = [1, 1]} : vector<288x32xbf16> to vector<256x32xbf16>
    %74 = vector.extract_strided_slice %23 {offsets = [7, 0, 0], sizes = [1, 32, 32], strides = [1, 1, 1]} : vector<9x32x32xbf16> to vector<1x32x32xbf16>
    %75 = vector.shape_cast %74 : vector<1x32x32xbf16> to vector<32x32xbf16>
    %cst_23 = arith.constant dense<0.000000e+00> : vector<256x32xf32>
    %76 = tpu.matmul %73, %75, %cst_23 {dimension_numbers = #tpu.dot_dimension_numbers<[1], [0], [0], [1], [0, 0, 1, 1], [], []>} : vector<256x32xbf16>, vector<32x32xbf16>, vector<256x32xf32> -> vector<256x32xf32>
    %77 = arith.addf %72, %76 : vector<256x32xf32>
    %78 = vector.extract_strided_slice %36 {offsets = [32, 0], sizes = [256, 32], strides = [1, 1]} : vector<288x32xbf16> to vector<256x32xbf16>
    %79 = vector.extract_strided_slice %23 {offsets = [8, 0, 0], sizes = [1, 32, 32], strides = [1, 1, 1]} : vector<9x32x32xbf16> to vector<1x32x32xbf16>
    %80 = vector.shape_cast %79 : vector<1x32x32xbf16> to vector<32x32xbf16>
    %cst_24 = arith.constant dense<0.000000e+00> : vector<256x32xf32>
    %81 = tpu.matmul %78, %80, %cst_24 {dimension_numbers = #tpu.dot_dimension_numbers<[1], [0], [0], [1], [0, 0, 1, 1], [], []>} : vector<256x32xbf16>, vector<32x32xbf16>, vector<256x32xf32> -> vector<256x32xf32>
    %82 = arith.addf %77, %81 : vector<256x32xf32>
    %cst_25 = arith.constant dense<0.000000e+00> : vector<32xf32>
    %83 = vector.multi_reduction <add>, %82, %cst_25 [0] : vector<256x32xf32> to vector<32xf32>
    %84 = vector.shape_cast %83 : vector<32xf32> to vector<1x32xf32>
    %cst_26 = arith.constant 2.560000e+02 : f32
    %85 = vector.broadcast %cst_26 : f32 to vector<1x32xf32>
    %86 = arith.divf %84, %85 : vector<1x32xf32>
    %87 = vector.broadcast %86 : vector<1x32xf32> to vector<256x32xf32>
    %88 = arith.subf %82, %87 : vector<256x32xf32>
    %89 = arith.mulf %88, %88 : vector<256x32xf32>
    %cst_27 = arith.constant dense<0.000000e+00> : vector<32xf32>
    %90 = vector.multi_reduction <add>, %89, %cst_27 [0] : vector<256x32xf32> to vector<32xf32>
    %91 = vector.shape_cast %90 : vector<32xf32> to vector<1x32xf32>
    %cst_28 = arith.constant 2.560000e+02 : f32
    %92 = vector.broadcast %cst_28 : f32 to vector<1x32xf32>
    %93 = arith.divf %91, %92 : vector<1x32xf32>
    %cst_29 = arith.constant 9.99999974E-6 : f32
    %94 = vector.broadcast %cst_29 : f32 to vector<1x32xf32>
    %95 = arith.addf %93, %94 : vector<1x32xf32>
    %96 = math.rsqrt %95 : vector<1x32xf32>
    %97 = vector.broadcast %96 : vector<1x32xf32> to vector<256x32xf32>
    %98 = arith.mulf %88, %97 : vector<256x32xf32>
    %cst_30 = arith.constant 0.000000e+00 : f32
    %99 = vector.broadcast %cst_30 : f32 to vector<256x32xf32>
    %100 = arith.maximumf %98, %99 : vector<256x32xf32>
    %101 = vector.extract_strided_slice %100 {offsets = [16, 0], sizes = [16, 32], strides = [1, 1]} : vector<256x32xf32> to vector<16x32xf32>
    %102 = vector.extract_strided_slice %100 {offsets = [224, 0], sizes = [16, 32], strides = [1, 1]} : vector<256x32xf32> to vector<16x32xf32>
    %103 = tpu.concatenate %101, %100, %102 in 0 : vector<16x32xf32>, vector<256x32xf32>, vector<16x32xf32> -> vector<288x32xf32>
    %c1_31 = arith.constant 1 : index
    %c0_32 = arith.constant 0 : index
    %104 = vector.load %arg5[%c1_31, %c0_32] : memref<296x32xf32, #tpu.memory_space<vmem>>, vector<288x32xf32>
    tpu.vector_store %arg5[%c1_31, %c0_32], %103 {strides = array<i32>} : memref<296x32xf32, #tpu.memory_space<vmem>>, vector<288x32xf32>,
    %c0_33 = arith.constant 0 : index
    %c0_34 = arith.constant 0 : index
    %105 = vector.load %arg5[%c0_33, %c0_34] : memref<296x32xf32, #tpu.memory_space<vmem>>, vector<288x32xf32>
    %c2_35 = arith.constant 2 : index
    %c0_36 = arith.constant 0 : index
    %106 = vector.load %arg5[%c2_35, %c0_36] : memref<296x32xf32, #tpu.memory_space<vmem>>, vector<288x32xf32>
    %107 = vector.shape_cast %18 : vector<288x1xi1> to vector<288x1xi1>
    %108 = vector.broadcast %107 : vector<288x1xi1> to vector<288x32xi1>
    %109 = arith.select %108, %106, %105 : vector<288x32xi1>, vector<288x32xf32>
    %110 = arith.truncf %109 : vector<288x32xf32> to vector<288x32xbf16>
    %111 = arith.truncf %103 : vector<288x32xf32> to vector<288x32xbf16>
    %112 = vector.shape_cast %20 : vector<288x1xi1> to vector<288x1xi1>
    %113 = vector.broadcast %112 : vector<288x1xi1> to vector<288x32xi1>
    %114 = arith.select %113, %105, %106 : vector<288x32xi1>, vector<288x32xf32>
    %115 = arith.truncf %114 : vector<288x32xf32> to vector<288x32xbf16>
    %cst_37 = arith.constant 0.000000e+00 : f32
    %116 = vector.broadcast %cst_37 : f32 to vector<256x32xf32>
    %117 = vector.extract_strided_slice %110 {offsets = [0, 0], sizes = [256, 32], strides = [1, 1]} : vector<288x32xbf16> to vector<256x32xbf16>
    %118 = vector.extract_strided_slice %24 {offsets = [0, 0, 0], sizes = [1, 32, 32], strides = [1, 1, 1]} : vector<9x32x32xbf16> to vector<1x32x32xbf16>
    %119 = vector.shape_cast %118 : vector<1x32x32xbf16> to vector<32x32xbf16>
    %cst_38 = arith.constant dense<0.000000e+00> : vector<256x32xf32>
    %120 = tpu.matmul %117, %119, %cst_38 {dimension_numbers = #tpu.dot_dimension_numbers<[1], [0], [0], [1], [0, 0, 1, 1], [], []>} : vector<256x32xbf16>, vector<32x32xbf16>, vector<256x32xf32> -> vector<256x32xf32>
    %121 = arith.addf %116, %120 : vector<256x32xf32>
    %122 = vector.extract_strided_slice %111 {offsets = [0, 0], sizes = [256, 32], strides = [1, 1]} : vector<288x32xbf16> to vector<256x32xbf16>
    %123 = vector.extract_strided_slice %24 {offsets = [1, 0, 0], sizes = [1, 32, 32], strides = [1, 1, 1]} : vector<9x32x32xbf16> to vector<1x32x32xbf16>
    %124 = vector.shape_cast %123 : vector<1x32x32xbf16> to vector<32x32xbf16>
    %cst_39 = arith.constant dense<0.000000e+00> : vector<256x32xf32>
    %125 = tpu.matmul %122, %124, %cst_39 {dimension_numbers = #tpu.dot_dimension_numbers<[1], [0], [0], [1], [0, 0, 1, 1], [], []>} : vector<256x32xbf16>, vector<32x32xbf16>, vector<256x32xf32> -> vector<256x32xf32>
    %126 = arith.addf %121, %125 : vector<256x32xf32>
    %127 = vector.extract_strided_slice %115 {offsets = [0, 0], sizes = [256, 32], strides = [1, 1]} : vector<288x32xbf16> to vector<256x32xbf16>
    %128 = vector.extract_strided_slice %24 {offsets = [2, 0, 0], sizes = [1, 32, 32], strides = [1, 1, 1]} : vector<9x32x32xbf16> to vector<1x32x32xbf16>
    %129 = vector.shape_cast %128 : vector<1x32x32xbf16> to vector<32x32xbf16>
    %cst_40 = arith.constant dense<0.000000e+00> : vector<256x32xf32>
    %130 = tpu.matmul %127, %129, %cst_40 {dimension_numbers = #tpu.dot_dimension_numbers<[1], [0], [0], [1], [0, 0, 1, 1], [], []>} : vector<256x32xbf16>, vector<32x32xbf16>, vector<256x32xf32> -> vector<256x32xf32>
    %131 = arith.addf %126, %130 : vector<256x32xf32>
    %132 = vector.extract_strided_slice %110 {offsets = [16, 0], sizes = [256, 32], strides = [1, 1]} : vector<288x32xbf16> to vector<256x32xbf16>
    %133 = vector.extract_strided_slice %24 {offsets = [3, 0, 0], sizes = [1, 32, 32], strides = [1, 1, 1]} : vector<9x32x32xbf16> to vector<1x32x32xbf16>
    %134 = vector.shape_cast %133 : vector<1x32x32xbf16> to vector<32x32xbf16>
    %cst_41 = arith.constant dense<0.000000e+00> : vector<256x32xf32>
    %135 = tpu.matmul %132, %134, %cst_41 {dimension_numbers = #tpu.dot_dimension_numbers<[1], [0], [0], [1], [0, 0, 1, 1], [], []>} : vector<256x32xbf16>, vector<32x32xbf16>, vector<256x32xf32> -> vector<256x32xf32>
    %136 = arith.addf %131, %135 : vector<256x32xf32>
    %137 = vector.extract_strided_slice %111 {offsets = [16, 0], sizes = [256, 32], strides = [1, 1]} : vector<288x32xbf16> to vector<256x32xbf16>
    %138 = vector.extract_strided_slice %24 {offsets = [4, 0, 0], sizes = [1, 32, 32], strides = [1, 1, 1]} : vector<9x32x32xbf16> to vector<1x32x32xbf16>
    %139 = vector.shape_cast %138 : vector<1x32x32xbf16> to vector<32x32xbf16>
    %cst_42 = arith.constant dense<0.000000e+00> : vector<256x32xf32>
    %140 = tpu.matmul %137, %139, %cst_42 {dimension_numbers = #tpu.dot_dimension_numbers<[1], [0], [0], [1], [0, 0, 1, 1], [], []>} : vector<256x32xbf16>, vector<32x32xbf16>, vector<256x32xf32> -> vector<256x32xf32>
    %141 = arith.addf %136, %140 : vector<256x32xf32>
    %142 = vector.extract_strided_slice %115 {offsets = [16, 0], sizes = [256, 32], strides = [1, 1]} : vector<288x32xbf16> to vector<256x32xbf16>
    %143 = vector.extract_strided_slice %24 {offsets = [5, 0, 0], sizes = [1, 32, 32], strides = [1, 1, 1]} : vector<9x32x32xbf16> to vector<1x32x32xbf16>
    %144 = vector.shape_cast %143 : vector<1x32x32xbf16> to vector<32x32xbf16>
    %cst_43 = arith.constant dense<0.000000e+00> : vector<256x32xf32>
    %145 = tpu.matmul %142, %144, %cst_43 {dimension_numbers = #tpu.dot_dimension_numbers<[1], [0], [0], [1], [0, 0, 1, 1], [], []>} : vector<256x32xbf16>, vector<32x32xbf16>, vector<256x32xf32> -> vector<256x32xf32>
    %146 = arith.addf %141, %145 : vector<256x32xf32>
    %147 = vector.extract_strided_slice %110 {offsets = [32, 0], sizes = [256, 32], strides = [1, 1]} : vector<288x32xbf16> to vector<256x32xbf16>
    %148 = vector.extract_strided_slice %24 {offsets = [6, 0, 0], sizes = [1, 32, 32], strides = [1, 1, 1]} : vector<9x32x32xbf16> to vector<1x32x32xbf16>
    %149 = vector.shape_cast %148 : vector<1x32x32xbf16> to vector<32x32xbf16>
    %cst_44 = arith.constant dense<0.000000e+00> : vector<256x32xf32>
    %150 = tpu.matmul %147, %149, %cst_44 {dimension_numbers = #tpu.dot_dimension_numbers<[1], [0], [0], [1], [0, 0, 1, 1], [], []>} : vector<256x32xbf16>, vector<32x32xbf16>, vector<256x32xf32> -> vector<256x32xf32>
    %151 = arith.addf %146, %150 : vector<256x32xf32>
    %152 = vector.extract_strided_slice %111 {offsets = [32, 0], sizes = [256, 32], strides = [1, 1]} : vector<288x32xbf16> to vector<256x32xbf16>
    %153 = vector.extract_strided_slice %24 {offsets = [7, 0, 0], sizes = [1, 32, 32], strides = [1, 1, 1]} : vector<9x32x32xbf16> to vector<1x32x32xbf16>
    %154 = vector.shape_cast %153 : vector<1x32x32xbf16> to vector<32x32xbf16>
    %cst_45 = arith.constant dense<0.000000e+00> : vector<256x32xf32>
    %155 = tpu.matmul %152, %154, %cst_45 {dimension_numbers = #tpu.dot_dimension_numbers<[1], [0], [0], [1], [0, 0, 1, 1], [], []>} : vector<256x32xbf16>, vector<32x32xbf16>, vector<256x32xf32> -> vector<256x32xf32>
    %156 = arith.addf %151, %155 : vector<256x32xf32>
    %157 = vector.extract_strided_slice %115 {offsets = [32, 0], sizes = [256, 32], strides = [1, 1]} : vector<288x32xbf16> to vector<256x32xbf16>
    %158 = vector.extract_strided_slice %24 {offsets = [8, 0, 0], sizes = [1, 32, 32], strides = [1, 1, 1]} : vector<9x32x32xbf16> to vector<1x32x32xbf16>
    %159 = vector.shape_cast %158 : vector<1x32x32xbf16> to vector<32x32xbf16>
    %cst_46 = arith.constant dense<0.000000e+00> : vector<256x32xf32>
    %160 = tpu.matmul %157, %159, %cst_46 {dimension_numbers = #tpu.dot_dimension_numbers<[1], [0], [0], [1], [0, 0, 1, 1], [], []>} : vector<256x32xbf16>, vector<32x32xbf16>, vector<256x32xf32> -> vector<256x32xf32>
    %161 = arith.addf %156, %160 : vector<256x32xf32>
    %cst_47 = arith.constant dense<0.000000e+00> : vector<32xf32>
    %162 = vector.multi_reduction <add>, %161, %cst_47 [0] : vector<256x32xf32> to vector<32xf32>
    %163 = vector.shape_cast %162 : vector<32xf32> to vector<1x32xf32>
    %cst_48 = arith.constant 2.560000e+02 : f32
    %164 = vector.broadcast %cst_48 : f32 to vector<1x32xf32>
    %165 = arith.divf %163, %164 : vector<1x32xf32>
    %166 = vector.broadcast %165 : vector<1x32xf32> to vector<256x32xf32>
    %167 = arith.subf %161, %166 : vector<256x32xf32>
    %168 = arith.mulf %167, %167 : vector<256x32xf32>
    %cst_49 = arith.constant dense<0.000000e+00> : vector<32xf32>
    %169 = vector.multi_reduction <add>, %168, %cst_49 [0] : vector<256x32xf32> to vector<32xf32>
    %170 = vector.shape_cast %169 : vector<32xf32> to vector<1x32xf32>
    %cst_50 = arith.constant 2.560000e+02 : f32
    %171 = vector.broadcast %cst_50 : f32 to vector<1x32xf32>
    %172 = arith.divf %170, %171 : vector<1x32xf32>
    %cst_51 = arith.constant 9.99999974E-6 : f32
    %173 = vector.broadcast %cst_51 : f32 to vector<1x32xf32>
    %174 = arith.addf %172, %173 : vector<1x32xf32>
    %175 = math.rsqrt %174 : vector<1x32xf32>
    %176 = vector.broadcast %175 : vector<1x32xf32> to vector<256x32xf32>
    %177 = arith.mulf %167, %176 : vector<256x32xf32>
    %178 = vector.extract_strided_slice %22 {offsets = [16, 0], sizes = [256, 32], strides = [1, 1]} : vector<288x32xf32> to vector<256x32xf32>
    %179 = arith.addf %178, %177 : vector<256x32xf32>
    %c0_52 = arith.constant 0 : index
    %c0_53 = arith.constant 0 : index
    %c0_54 = arith.constant 0 : index
    %180 = vector.load %arg4[%c0_52, %c0_53, %c0_54] : memref<1x256x32xf32, #tpu.memory_space<vmem>>, vector<1x256x32xf32>
    %181 = vector.shape_cast %180 : vector<1x256x32xf32> to vector<256x32xf32>
    %182 = vector.shape_cast %179 : vector<256x32xf32> to vector<1x256x32xf32>
    tpu.vector_store %arg4[%c0_52, %c0_53, %c0_54], %182 {strides = array<i32>} : memref<1x256x32xf32, #tpu.memory_space<vmem>>, vector<1x256x32xf32>,
    return
  }
  func.func @transform_0(%arg0: i32) -> (i32, i32, i32) {
    %c0_i32 = arith.constant 0 : i32
    %c0_i32_0 = arith.constant 0 : i32
    %c0_i32_1 = arith.constant 0 : i32
    return %arg0, %c0_i32, %c0_i32_0 : i32, i32, i32
  }
  func.func @transform_1(%arg0: i32) -> (i32, i32, i32) {
    %c0_i32 = arith.constant 0 : i32
    %c0_i32_0 = arith.constant 0 : i32
    %c0_i32_1 = arith.constant 0 : i32
    %c0_i32_2 = arith.constant 0 : i32
    return %c0_i32, %c0_i32_0, %c0_i32_1 : i32, i32, i32
  }
  func.func @transform_2(%arg0: i32) -> (i32, i32, i32) {
    %c0_i32 = arith.constant 0 : i32
    %c0_i32_0 = arith.constant 0 : i32
    %c0_i32_1 = arith.constant 0 : i32
    %c0_i32_2 = arith.constant 0 : i32
    return %c0_i32, %c0_i32_0, %c0_i32_1 : i32, i32, i32
  }
  func.func @transform_3(%arg0: i32) -> (i32, i32, i32) {
    %c0_i32 = arith.constant 0 : i32
    %c0_i32_0 = arith.constant 0 : i32
    %c0_i32_1 = arith.constant 0 : i32
    return %arg0, %c0_i32, %c0_i32_0 : i32, i32, i32
  }
}

</mosaic_0001>

<bundles_post_ra>
// kernel: residual_block_forward.1
= control target key start
LH: loop header
LB: loop body
LE: loop exit
PB: predicated region body
PF: predicated region fallthrough
CT: control target
= control target key end

     0   :  { %8 = vsyncpa [#allocation4], 0  ;;  %s9327_s0 = inlined_call_operand.vmem [shape: f32[2,288,32], index: 0, kind: input, shape index: {}]   ;;  %s9328_s1 = inlined_call_operand.vmem [shape: bf16[9,32,32], index: 1, kind: input, shape index: {}]   ;;  %s9329_s2 = inlined_call_operand.vmem [shape: bf16[9,32,32], index: 2, kind: input, shape index: {}]   ;;  %s9330_s3 = inlined_call_operand.hbm [shape: f32[2,256,32], index: 3, kind: output, shape index: {}]  }
   0x1   :  { %10 = vsyncpa [#allocation4 + $0x1], 0  ;;  %s5952_s12 = smov 0   ;;  %s5954_s13 = smov 0  }
   0x2   :  { %s5956_s14 = smov 0   ;;  %s5958_s15 = smov 0  }
   0x3 LB: > { %s5973_s16 = sadd.s32 4294967295, %s5927_s15   ;;  %s5325_s17 = sadd.s32 4294967294, %s5927_s15   ;;  %s5927_s15 = sphi %s5958_s15, %s10333_s15   ;;  %s5923_s14 = sphi %s5956_s14, %s10332_s14   ;;  %s5919_s13 = sphi %s5954_s13, %s10331_s13   ;;  %s5915_s12 = sphi %s5952_s12, %s10330_s12  }
   0x4   : > { %s5977_s18 = sadd.s32 1, %s5927_s15   ;;  %s91_s19 = sadd.s32 1, %s5923_s14 }
   0x5   : > { %s88_s20 = ssub.s32 %s5927_s15, %s5977_s18  ;;  %p101_p0 = scmp.ne.s32.totalorder %s5923_s14, %s5919_s13 }
   0x6   : > { %p89_p1 = scmp.eq.s32.totalorder %s88_s20, 0  ;;  %p102_p2 = scmp.eq.s32.totalorder %s5973_s16, 1 }
   0x7   : > { %p107_p3 = scmp.ne.s32.totalorder %s5919_s13, %s5915_s12  ;;  %p108_p4 = scmp.eq.s32.totalorder %s5325_s17, 1 }
   0x8   : > { %s5988_s21 = scalar_select %p89_p1, %s5923_s14, %s91_s19  }
   0x9   : > { %p5990_p5 = por %p102_p2, %p101_p0  ;;  %p5994_p6 = por %p108_p4, %p107_p3 }
   0xa   : > { %p5328_p7 = scmp.ge.s32.totalorder %s5927_s15, 1  ;;  %p140_p8 = scmp.lt.s32.totalorder %s5927_s15, 3 }
   0xc   : > { %p141_p9 = pnand %p5328_p7, %p140_p8 }
   0xe   : > { %144 = sbr.rel (%p141_p9) target bundleno = 2007 (0x7d7), region = 32 }
  0x13   : > { %v5771_v0 = vld [vmem:[%s9328_s1 + $0x18] sm:$0xff]  ;;  %p164_p10 = scmp.lt.s32.totalorder %s5973_s16, 1  ;;  %v5769_v1 = vld [vmem:[%s9328_s1 + $0x8] sm:$0xff]  ;;  %v170_v2 = vlaneseq  ;;  %v5770_v3 = vld [vmem:[%s9328_s1 + $0x10] sm:$0xff]  ;;  %vm9385_vm0 = vcmask 261120   ;;  %v9519_v33 = vmov 0 }
  0x14   : > { %5805 = vmatpush.bf16.msra.mxu2 %v5771_v0  ;;  %1398 = vmatpush.bf16.msra.mxu0 %v5771_v0  ;;  %v5768_v4 = vld [vmem:[%s9328_s1] sm:$0xff]  ;;  %v5773_v5 = vld [vmem:[%s9328_s1 + $0x28] sm:$0xff]  ;;  %v5775_v7 = vld [vmem:[%s9328_s1 + $0x38] sm:$0xff]  ;;  %v9523_v38 = vmov 0  ;;  %s161_s4 = sand.u32 1, %s5919_s13   ;;  %s5804_s7 = sshll.u32 %s5973_s16, 8 }
  0x15   : > { %s165_s30 = scalar_select %p164_p10, %s5973_s16, 1  ;;  %1627 = vmatpush.bf16.msra.mxu1 %v5769_v1  ;;  %5807 = vmatpush.bf16.msra.mxu3 %v5769_v1  ;;  %v6017_v6 = vshrl.u32 %v170_v2, 7  ;;  %v5777_v8 = vld [vmem:[%s9328_s1 + $0x48] sm:$0xff]  ;;  %v9527_v2 = vmov 0 }
  0x16   : > { %s5329_s5 = sshll.u32 %s161_s4, 8  ;;  %s5259_s9 = scalar_lea.hbm %s9330_s3, %s5804_s7 }
  0x17   : > { %s5809_s6 = smul.u32 288, %s165_s30  ;;  %9508 = vst [vmem:[#allocation6_spill] sm:$0xff] %v6017_v6  ;;  %v187_v17 = vadd.s32 128, %v6017_v6  ;;  %v211_v26 = vand.u32 15, %v6017_v6  ;;  %v173_v35 = vadd.s32 16, %v6017_v6  ;;  %v189_v41 = vadd.s32 144, %v6017_v6 }
  0x18   : > { %5806 = vmatpush.bf16.msra.mxu2 %v5770_v3  ;;  %1399 = vmatpush.bf16.msra.mxu0 %v5770_v3  ;;  %s5262_s11 = sshll.u32 %s5259_s9, 4  ;;  %s5248_s17 = scalar_lea.sflag [#allocation4], %s161_s4  ;;  %s5263_s11 = int_to_ptr.hbm [resolvable:$true] %s5262_s11 }
  0x19   : > { %s6028_s24 = scalar_lea.vmem %s9327_s0, %s5809_s6  ;;  %1628 = vmatpush.bf16.msra.mxu1 %v5768_v4  ;;  %5808 = vmatpush.bf16.msra.mxu3 %v5768_v4  ;;  %v323_v29 = vand.u32 15, %v187_v17  ;;  %vm6084_vm1 = vcmp.eq.s32.totalorder %v211_v26, 0  ;;  %v225_v54 = vand.u32 15, %v173_v35  ;;  %v337_v58 = vand.u32 15, %v189_v41  ;;  %s9134_s6 = scalar_lea.vmem [#allocation3], %s5329_s5 }
  0x1a   : > { %v6031_v9 = vld [vmem:[%s6028_s24 + $0x80] sm:$0xff]  ;;  %v6034_v10 = vld [vmem:[%s6028_s24 + $0x88] sm:$0xff]  ;;  %v6048_v18 = vld [vmem:[%s6028_s24 + $0x78] sm:$0xff]  ;;  %v9520_v33 = vsel %vm6084_vm1, 4294967295, %v9519_v33  ;;  %v175_v35 = vadd.s32 32, %v6017_v6  ;;  %s5260_s10 = sshll.u32 %s9134_s6, 4  ;;  %s5261_s10 = int_to_ptr.vmem [resolvable:$true] %s5260_s10 }
  0x1b   : > { %9509 = vst [vmem:[#allocation7_spill] sm:$0xff] %v6031_v9  ;;  %v711_v11 = vld [vmem:[%s6028_s24] sm:$0xff]  ;;  %v1088_v12 = vpack.c.bf16 %v6031_v9, %v6031_v9  ;;  %v1089_v13 = vpack.c.bf16 %v6034_v10, %v6034_v10  ;;  %v712_v14 = vld [vmem:[%s6028_s24 + $0x8] sm:$0xff]  ;;  %v6052_v22 = vld [vmem:[%s6028_s24 + $0x90] sm:$0xff]  ;;  %vm6094_vm2 = vcmp.eq.s32.totalorder %v323_v29, 0  ;;  %vm6129_vm3 = vcmp.eq.s32.totalorder %v225_v54, 0 }
  0x1c   : > { %9510 = vst [vmem:[#allocation8_spill] sm:$0xff] %v6034_v10  ;;  %1856 = vmatpush.bf16.msrb.mxu2 %v5773_v5  ;;  %v1072_v15 = vpack.c.bf16 %v711_v11, %v711_v11  ;;  %v1073_v16 = vpack.c.bf16 %v712_v14, %v712_v14  ;;  %2138 = vmatpush.bf16.msrb.mxu0 %v5777_v8  ;;  %v6056_v24 = vld [vmem:[%s6028_s24 + $0x98] sm:$0xff]  ;;  %v6064_v27 = vld [vmem:[%s6028_s24 + $0x10] sm:$0xff]  ;;  %v6076_v31 = vld [vmem:[%s6028_s24 + $0xa0] sm:$0xff]  ;;  %v9524_v38 = vsel %vm6094_vm2, 4294967295, %v9523_v38  ;;  %v9528_v2 = vsel %vm6129_vm3, 4294967295, %v9527_v2 }
  0x1d   : > { %836 = vst.msk [vmem:[#allocation2 + $0x81] sm:$0xff] %vm9385_vm0, %v6031_v9  ;;  %1997 = vmatpush.bf16.msrb.mxu3 %v5775_v7  ;;  %v1300_v19 = vunpack.c.l.b16 %v1088_v12  ;;  %v1301_v20 = vunpack.c.l.b16 %v1089_v13  ;;  %v6069_v30 = vld [vmem:[%s6028_s24 + $0x18] sm:$0xff]  ;;  %v6082_v32 = vld [vmem:[%s6028_s24 + $0xa8] sm:$0xff]  ;;  %v6092_v36 = vld [vmem:[%s6028_s24 + $0x20] sm:$0xff]  ;;  %v1090_v45 = vpack.c.bf16 %v6052_v22, %v6052_v22  ;;  %v1091_v46 = vpack.c.bf16 %v6056_v24, %v6056_v24  ;;  %s5879_s19 = sshra.s32 %s5263_s11, 4  ;;  %s5885_s27 = scalar_lea.hbm %s9330_s3, 512  ;;  %s5880_s19 = int_to_ptr.hbm [resolvable:$true] %s5879_s19 }
  0x1e   : > { %837 = vst.msk [vmem:[#allocation2 + $0x89] sm:$0xff] %vm9385_vm0, %v6034_v10  ;;  %v1284_v21 = vunpack.c.l.b16 %v1072_v15  ;;  %v1285_v23 = vunpack.c.l.b16 %v1073_v16  ;;  %v6102_v42 = vld [vmem:[%s6028_s24 + $0x28] sm:$0xff]  ;;  %v1074_v50 = vpack.c.bf16 %v6064_v27, %v6064_v27  ;;  %v1075_v51 = vpack.c.bf16 %v6069_v30, %v6069_v30  ;;  %v6154_v17 = vld [vmem:[%s6028_s24 + $0xb0] sm:$0xff]  ;;  %s5881_s20 = scalar_lea.hbm %s5880_s19, 256  ;;  %p5886_p0 = scmp.lt.s32.totalorder %s5880_s19, %s9330_s3 }
  0x1f   : > { %9511 = vst [vmem:[#allocation9_spill] sm:$0xff] %v6048_v18  ;;  %v6058_v25 = vpack.c.b16 %v1301_v20, %v1300_v19  ;;  %v1302_v60 = vunpack.c.l.b16 %v1090_v45  ;;  %v1303_v61 = vunpack.c.l.b16 %v1091_v46  ;;  %vm6137_vm4 = vcmp.eq.s32.totalorder %v337_v58, 0  ;;  %v6159_v20 = vld [vmem:[%s6028_s24 + $0xb8] sm:$0xff]  ;;  %p5882_p11 = scmp.ne.s32.totalorder %s5880_s19, %s5881_s20  ;;  %p5887_p1 = scmp.lt.s32.totalorder %s5885_s27, %s5881_s20 }
  0x20   : > { %820 = vst.msk [vmem:[#allocation2 + $0x1] sm:$0xff] %vm9385_vm0, %v711_v11  ;;  %v1316_v28 = vpack.c.b16 %v1285_v23, %v1284_v21  ;;  %v1286_v63 = vunpack.c.l.b16 %v1074_v50  ;;  %v1287_v0 = vunpack.c.l.b16 %v1075_v51  ;;  %v9531_v7 = vmov 0  ;;  %v6164_v21 = vld [vmem:[%s6028_s24 + $0x30] sm:$0xff]  ;;  %v6167_v23 = vld [vmem:[%s6028_s24 + $0x38] sm:$0xff] }
  0x21   : > { %9512 = vst [vmem:[#allocation10_spill] sm:$0xff] %v6052_v22  ;;  %5347 = vmatmul.msk.bf16.vlgmr.msra.gmra.mxu2 %vm9385_vm0, %v6058_v25  ;;  %v9532_v7 = vsel %vm6137_vm4, 4294967295, %v9531_v7  ;;  %v6142_v12 = vpack.c.b16 %v1303_v61, %v1302_v60  ;;  %v1092_v41 = vpack.c.bf16 %v6076_v31, %v6076_v31  ;;  %v1093_v45 = vpack.c.bf16 %v6082_v32, %v6082_v32  ;;  %p5883_p12 = pnand %p5882_p11, %p5990_p5  ;;  %p5888_p2 = por %p5887_p1, %p5886_p0 }
  0x22   : > { %821 = vst.msk [vmem:[#allocation2 + $0x9] sm:$0xff] %vm9385_vm0, %v712_v14  ;;  %5339 = vmatmul.msk.bf16.vlgmr.msra.gmra.mxu0 %vm9385_vm0, %v1316_v28  ;;  %v6146_v13 = vpack.c.b16 %v1287_v0, %v1286_v63  ;;  %v239_v50 = vand.u32 15, %v175_v35  ;;  %v9540_v58 = vmov 0  ;;  %v9543_v61 = vmov 0  ;;  %v5772_v35 = vld [vmem:[%s9328_s1 + $0x20] sm:$0xff] }
  0x23   : > { %9513 = vst [vmem:[#allocation11_spill] sm:$0xff] %v6056_v24  ;;  %v1305_v54 = vunpack.c.l.b16 %v1093_v45  ;;  %1857 = vmatpush.bf16.msrb.mxu2 %v5772_v35  ;;  %p5884_p13 = pneg %p5883_p12 }
  0x24   : > { %9514 = vst [vmem:[#allocation12_spill] sm:$0xff] %v6058_v25  ;;  %vm6195_vm5 = vcmp.eq.s32.totalorder %v239_v50, 0 }
  0x25   : > { %835 = vst.msk [vmem:[#allocation2 + $0x79] sm:$0xff] %vm9385_vm0, %v6048_v18  ;;  %v873_v34 = vld [vmem:[#allocation2 + $0x88] sm:$0xff]  ;;  %v9541_v58 = vsel %vm6195_vm5, 4294967295, %v9540_v58  ;;  %p5889_p3 = pnand %p5888_p2, %p5884_p13 }
  0x26   : > { %9515 = vst [vmem:[#allocation13_spill] sm:$0xff] %v6064_v27  ;;  %v908_v39 = vld [vmem:[#allocation2 + $0x82] sm:$0xff]  ;;  %v1053_v40 = vpack.c.bf16 %v873_v34, %v873_v34 }
  0x27   : > { %838 = vst.msk [vmem:[#allocation2 + $0x91] sm:$0xff] %vm9385_vm0, %v6052_v22  ;;  %v856_v37 = vld [vmem:[#allocation2] sm:$0xff] }
  0x28   : > { %9516 = vst [vmem:[#allocation14_spill] sm:$0xff] %v6069_v30  ;;  %v1530_v57 = vunpack.c.l.b16 %v1053_v40 }
  0x29   : > { %839 = vst.msk [vmem:[#allocation2 + $0x99] sm:$0xff] %vm9385_vm0, %v6056_v24  ;;  %v6104_v43 = vld [vmem:[#allocation2 + $0x8] sm:$0xff] }
  0x2a   : > { %9517 = vst [vmem:[#allocation15_spill] sm:$0xff] %v6076_v31  ;;  %v6106_v44 = vld [vmem:[#allocation2 + $0x2] sm:$0xff]  ;;  %v1037_v48 = vpack.c.bf16 %v6104_v43, %v6104_v43 }
  0x2b   : > { %822 = vst.msk [vmem:[#allocation2 + $0x11] sm:$0xff] %vm9385_vm0, %v6064_v27  ;;  %v1000_v47 = vsel %vm6084_vm1, %v6106_v44, %v856_v37  ;;  %v191_v37 = vadd.s32 160, %v6017_v6 }
  0x2c   : > { %9518 = vst [vmem:[#allocation16_spill] sm:$0xff] %v6082_v32  ;;  %v872_v49 = vld [vmem:[#allocation2 + $0x80] sm:$0xff]  ;;  %v1036_v52 = vpack.c.bf16 %v1000_v47, %v1000_v47  ;;  %v1514_v55 = vunpack.c.l.b16 %v1037_v48  ;;  %v1076_v48 = vpack.c.bf16 %v6092_v36, %v6092_v36 }
  0x2d   : > { %9521 = vst [vmem:[#allocation17_spill] sm:$0xff] %v9520_v33  ;;  %v1016_v53 = vsel %vm6094_vm2, %v908_v39, %v872_v49  ;;  %v1077_v49 = vpack.c.bf16 %v6102_v42, %v6102_v42  ;;  %v351_v51 = vand.u32 15, %v191_v37 }
  0x2e   : > { %823 = vst.msk [vmem:[#allocation2 + $0x19] sm:$0xff] %vm9385_vm0, %v6069_v30  ;;  %v1052_v56 = vpack.c.bf16 %v1016_v53, %v1016_v53  ;;  %v1513_v59 = vunpack.c.l.b16 %v1036_v52  ;;  %v874_v8 = vld [vmem:[#allocation2 + $0x90] sm:$0xff]  ;;  %v1304_v53 = vunpack.c.l.b16 %v1092_v41  ;;  %v193_v41 = vadd.s32 176, %v6017_v6 }
  0x2f   : > { %9522 = vst [vmem:[#allocation18_spill] sm:$0xff] %v6092_v36  ;;  %vm6201_vm6 = vcmp.eq.s32.totalorder %v351_v51, 0  ;;  %v1078_v51 = vpack.c.bf16 %v6164_v21, %v6164_v21 }
  0x30   : > { %9525 = vst [vmem:[#allocation19_spill] sm:$0xff] %v9524_v38  ;;  %v1529_v62 = vunpack.c.l.b16 %v1052_v56  ;;  %v1545_v1 = vpack.c.b16 %v1514_v55, %v1513_v59  ;;  %v910_v11 = vld [vmem:[#allocation2 + $0x92] sm:$0xff]  ;;  %v1288_v56 = vunpack.c.l.b16 %v1076_v48  ;;  %v9544_v61 = vsel %vm6201_vm6, 4294967295, %v9543_v61 }
  0x31   : > { %840 = vst.msk [vmem:[#allocation2 + $0xa1] sm:$0xff] %vm9385_vm0, %v6076_v31  ;;  %v875_v16 = vld [vmem:[#allocation2 + $0x98] sm:$0xff]  ;;  %v1018_v19 = vsel %vm6137_vm4, %v910_v11, %v874_v8  ;;  %5348 = vmatmul.msk.bf16.gmra.mxu2 %vm9385_vm0, %v6142_v12  ;;  %v6207_v0 = vpack.c.b16 %v1305_v54, %v1304_v53  ;;  %v6219_v11 = vld [vmem:[%s6028_s24 + $0xc0] sm:$0xff]  ;;  %v1095_v48 = vpack.c.bf16 %v6159_v20, %v6159_v20 }
  0x32   : > { %9526 = vst [vmem:[#allocation20_spill] sm:$0xff] %v6102_v42  ;;  %v858_v3 = vld [vmem:[#allocation2 + $0x10] sm:$0xff]  ;;  %v6135_v5 = vpack.c.b16 %v1530_v57, %v1529_v62  ;;  %5363 = vmatmul.msk.bf16.vlgmr.msra.gmra.mxu1 %vm9385_vm0, %v1545_v1  ;;  %5340 = vmatmul.msk.bf16.gmra.mxu0 %vm9385_vm0, %v6146_v13  ;;  %v1054_v29 = vpack.c.bf16 %v1018_v19, %v1018_v19  ;;  %v1289_v57 = vunpack.c.l.b16 %v1077_v49 }
  0x33   : > { %841 = vst.msk [vmem:[#allocation2 + $0xa9] sm:$0xff] %vm9385_vm0, %v6082_v32  ;;  %v1055_v34 = vpack.c.bf16 %v875_v16, %v875_v16  ;;  %v6225_v16 = vld [vmem:[%s6028_s24 + $0x40] sm:$0xff]  ;;  %v1079_v53 = vpack.c.bf16 %v6167_v23, %v6167_v23 }
  0x34   : > { %824 = vst.msk [vmem:[#allocation2 + $0x21] sm:$0xff] %vm9385_vm0, %v6092_v36  ;;  %5371 = vmatmul.msk.bf16.vlgmr.msra.gmra.mxu3 %vm9385_vm0, %v6135_v5  ;;  %v1531_v46 = vunpack.c.l.b16 %v1054_v29  ;;  %v1080_v24 = vpack.c.bf16 %v6225_v16, %v6225_v16 }
  0x35   : > { %825 = vst.msk [vmem:[#allocation2 + $0x29] sm:$0xff] %vm9385_vm0, %v6102_v42  ;;  %v6133_v4 = vld [vmem:[#allocation2 + $0x12] sm:$0xff]  ;;  %v1532_v47 = vunpack.c.l.b16 %v1055_v34 }
  0x36   : > { %9529 = vst [vmem:[#allocation21_spill] sm:$0xff] %v9528_v2  ;;  %v6148_v14 = vld [vmem:[#allocation2 + $0x18] sm:$0xff]  ;;  %v1002_v15 = vsel %vm6129_vm3, %v6133_v4, %v858_v3  ;;  %v6213_v3 = vpack.c.b16 %v1289_v57, %v1288_v56  ;;  %v365_v56 = vand.u32 15, %v193_v41 }
  0x37   : > { %9530 = vst [vmem:[#allocation22_spill] sm:$0xff] %v6135_v5  ;;  %v1038_v26 = vpack.c.bf16 %v1002_v15, %v1002_v15  ;;  %v1039_v28 = vpack.c.bf16 %v6148_v14, %v6148_v14  ;;  %v6193_v55 = vpack.c.b16 %v1532_v47, %v1531_v46  ;;  %v6222_v15 = vld [vmem:[%s6028_s24 + $0xc8] sm:$0xff]  ;;  %v1094_v47 = vpack.c.bf16 %v6154_v17, %v6154_v17 }
  0x38   : > { %9533 = vst [vmem:[#allocation23_spill] sm:$0xff] %v9532_v7  ;;  %v876_v62 = vld [vmem:[#allocation2 + $0xa0] sm:$0xff]  ;;  %vm6273_vm8 = vcmp.eq.s32.totalorder %v365_v56, 0  ;;  %v6312_v56 = vld [vmem:[%s6028_s24 + $0x58] sm:$0xff]  ;;  %v1097_v32 = vpack.c.bf16 %v6222_v15, %v6222_v15 }
  0x39   : > { %9534 = vst [vmem:[#allocation24_spill] sm:$0xff] %v6142_v12  ;;  %v1515_v39 = vunpack.c.l.b16 %v1038_v26  ;;  %v1516_v40 = vunpack.c.l.b16 %v1039_v28  ;;  %v6234_v28 = vld [vmem:[%s6028_s24 + $0x48] sm:$0xff] }
  0x3a   : > { %9535 = vst [vmem:[#allocation25_spill] sm:$0xff] %v6154_v17  ;;  %v912_v63 = vld [vmem:[#allocation2 + $0xa2] sm:$0xff]  ;;  %v1081_v22 = vpack.c.bf16 %v6234_v28, %v6234_v28 }
  0x3b   : > { %9536 = vst [vmem:[#allocation26_spill] sm:$0xff] %v6159_v20  ;;  %v6191_v52 = vpack.c.b16 %v1516_v40, %v1515_v39  ;;  %v860_v59 = vld [vmem:[#allocation2 + $0x20] sm:$0xff]  ;;  %v6227_v19 = vld [vmem:[#allocation2 + $0xa8] sm:$0xff]  ;;  %v1020_v26 = vsel %vm6201_vm6, %v912_v63, %v876_v62  ;;  %v177_v40 = vadd.s32 48, %v6017_v6  ;;  %v1307_v62 = vunpack.c.l.b16 %v1095_v48  ;;  %v5774_v48 = vld [vmem:[%s9328_s1 + $0x30] sm:$0xff] }
  0x3c   : > { %842 = vst.msk [vmem:[#allocation2 + $0xb1] sm:$0xff] %vm9385_vm0, %v6154_v17  ;;  %v6199_v60 = vld [vmem:[#allocation2 + $0x22] sm:$0xff]  ;;  %v1056_v37 = vpack.c.bf16 %v1020_v26, %v1020_v26  ;;  %v1057_v39 = vpack.c.bf16 %v6227_v19, %v6227_v19  ;;  %v1291_v26 = vunpack.c.l.b16 %v1079_v53  ;;  %1998 = vmatpush.bf16.msrb.mxu3 %v5774_v48  ;;  %v1096_v17 = vpack.c.bf16 %v6219_v11, %v6219_v11 }
  0x3d   : > { %9537 = vst [vmem:[#allocation27_spill] sm:$0xff] %v6164_v21  ;;  %v6209_v1 = vld [vmem:[#allocation2 + $0x28] sm:$0xff]  ;;  %v1004_v8 = vsel %vm6195_vm5, %v6199_v60, %v860_v59  ;;  %v253_v54 = vand.u32 15, %v177_v40  ;;  %v1306_v59 = vunpack.c.l.b16 %v1094_v47 }
  0x3e   : > { %9538 = vst [vmem:[#allocation28_spill] sm:$0xff] %v6167_v23  ;;  %v1040_v29 = vpack.c.bf16 %v1004_v8, %v1004_v8  ;;  %v1041_v34 = vpack.c.bf16 %v6209_v1, %v6209_v1  ;;  %v1533_v49 = vunpack.c.l.b16 %v1056_v37  ;;  %v1534_v50 = vunpack.c.l.b16 %v1057_v39 }
  0x3f   : > { %843 = vst.msk [vmem:[#allocation2 + $0xb9] sm:$0xff] %vm9385_vm0, %v6159_v20  ;;  %v1290_v8 = vunpack.c.l.b16 %v1078_v51  ;;  %vm6267_vm7 = vcmp.eq.s32.totalorder %v253_v54, 0  ;;  %v9554_v37 = vmov 0  ;;  %v6281_v41 = vpack.c.b16 %v1307_v62, %v1306_v59  ;;  %v6309_v54 = vld [vmem:[%s6028_s24 + $0x50] sm:$0xff] }
  0x40   : > { %826 = vst.msk [vmem:[#allocation2 + $0x31] sm:$0xff] %vm9385_vm0, %v6164_v21  ;;  %v1517_v45 = vunpack.c.l.b16 %v1040_v29  ;;  %v1518_v46 = vunpack.c.l.b16 %v1041_v34  ;;  %v6265_v63 = vpack.c.b16 %v1534_v50, %v1533_v49  ;;  %v9551_v29 = vmov 0  ;;  %v6296_v49 = vld [vmem:[%s6028_s24 + $0xd0] sm:$0xff]  ;;  %v6299_v50 = vld [vmem:[%s6028_s24 + $0xd8] sm:$0xff] }
  0x41   : > { %827 = vst.msk [vmem:[#allocation2 + $0x39] sm:$0xff] %vm9385_vm0, %v6167_v23  ;;  %5349 = vmatmul.msk.bf16.gmra.mxu2 %vm9385_vm0, %v6207_v0  ;;  %v9552_v29 = vsel %vm6267_vm7, 4294967295, %v9551_v29  ;;  %v9555_v37 = vsel %vm6273_vm8, 4294967295, %v9554_v37  ;;  %v1098_v42 = vpack.c.bf16 %v6296_v49, %v6296_v49  ;;  %v1099_v36 = vpack.c.bf16 %v6299_v50, %v6299_v50 }
  0x42   : > { %9539 = vst [vmem:[#allocation29_spill] sm:$0xff] %v6193_v55  ;;  %5364 = vmatmul.msk.bf16.gmra.mxu1 %vm9385_vm0, %v6191_v52  ;;  %5341 = vmatmul.msk.bf16.gmra.mxu0 %vm9385_vm0, %v6213_v3  ;;  %v6263_v57 = vpack.c.b16 %v1518_v46, %v1517_v45  ;;  %v6287_v46 = vpack.c.b16 %v1291_v26, %v1290_v8  ;;  %v5776_v8 = vld [vmem:[%s9328_s1 + $0x40] sm:$0xff] }
  0x43   : > { %9542 = vst [vmem:[#allocation30_spill] sm:$0xff] %v9541_v58  ;;  %v878_v39 = vld [vmem:[#allocation2 + $0xb0] sm:$0xff]  ;;  %2139 = vmatpush.bf16.msrb.mxu0 %v5776_v8  ;;  %v1082_v27 = vpack.c.bf16 %v6309_v54, %v6309_v54 }
  0x44   : > { %9545 = vst [vmem:[#allocation31_spill] sm:$0xff] %v9544_v61  ;;  %5372 = vmatmul.msk.bf16.gmra.mxu3 %vm9385_vm0, %v6193_v55 }
  0x45   : > { %9546 = vst [vmem:[#allocation32_spill] sm:$0xff] %v6207_v0 }
  0x46   : > { %9547 = vst [vmem:[#allocation33_spill] sm:$0xff] %v6219_v11  ;;  %v6277_v40 = vld [vmem:[#allocation2 + $0xb2] sm:$0xff] }
  0x47   : > { %9548 = vst [vmem:[#allocation34_spill] sm:$0xff] %v6222_v15  ;;  %v862_v34 = vld [vmem:[#allocation2 + $0x30] sm:$0xff]  ;;  %v6301_v51 = vld [vmem:[#allocation2 + $0xb8] sm:$0xff]  ;;  %v1022_v53 = vsel %vm6273_vm8, %v6277_v40, %v878_v39  ;;  %v179_v39 = vadd.s32 64, %v6017_v6 }
  0x48   : > { %9549 = vst [vmem:[#allocation35_spill] sm:$0xff] %v6225_v16  ;;  %v6271_v35 = vld [vmem:[#allocation2 + $0x32] sm:$0xff]  ;;  %v1058_v26 = vpack.c.bf16 %v1022_v53, %v1022_v53 }
  0x49   : > { %844 = vst.msk [vmem:[#allocation2 + $0xc1] sm:$0xff] %vm9385_vm0, %v6219_v11  ;;  %v6283_v45 = vld [vmem:[#allocation2 + $0x38] sm:$0xff]  ;;  %v1006_v47 = vsel %vm6267_vm7, %v6271_v35, %v862_v34  ;;  %v1059_v34 = vpack.c.bf16 %v6301_v51, %v6301_v51  ;;  %v267_v10 = vand.u32 15, %v179_v39  ;;  %v1292_v11 = vunpack.c.l.b16 %v1080_v24  ;;  %v6371_v39 = vld [vmem:[%s6028_s24 + $0xe0] sm:$0xff] }
  0x4a   : > { %9550 = vst [vmem:[#allocation36_spill] sm:$0xff] %v6234_v28  ;;  %v1042_v59 = vpack.c.bf16 %v1006_v47, %v1006_v47  ;;  %v1043_v62 = vpack.c.bf16 %v6283_v45, %v6283_v45  ;;  %v195_v47 = vadd.s32 192, %v6017_v6  ;;  %v1535_v53 = vunpack.c.l.b16 %v1058_v26 }
  0x4b   : > { %845 = vst.msk [vmem:[#allocation2 + $0xc9] sm:$0xff] %vm9385_vm0, %v6222_v15  ;;  %v1536_v31 = vunpack.c.l.b16 %v1059_v34  ;;  %v1293_v26 = vunpack.c.l.b16 %v1081_v22  ;;  %vm6345_vm9 = vcmp.eq.s32.totalorder %v267_v10, 0  ;;  %v9562_v34 = vmov 0 }
  0x4c   : > { %828 = vst.msk [vmem:[#allocation2 + $0x41] sm:$0xff] %vm9385_vm0, %v6225_v16  ;;  %v1519_v48 = vunpack.c.l.b16 %v1042_v59  ;;  %v1520_v20 = vunpack.c.l.b16 %v1043_v62  ;;  %v379_v8 = vand.u32 15, %v195_v47  ;;  %v1308_v59 = vunpack.c.l.b16 %v1096_v17  ;;  %v6374_v47 = vld [vmem:[%s6028_s24 + $0xe8] sm:$0xff] }
  0x4d   : > { %829 = vst.msk [vmem:[#allocation2 + $0x49] sm:$0xff] %vm9385_vm0, %v6234_v28  ;;  %v1309_v62 = vunpack.c.l.b16 %v1097_v32  ;;  %v6343_v23 = vpack.c.b16 %v1536_v31, %v1535_v53  ;;  %v9563_v34 = vsel %vm6345_vm9, 4294967295, %v9562_v34  ;;  %v6365_v22 = vpack.c.b16 %v1293_v26, %v1292_v11  ;;  %v6387_v11 = vld [vmem:[%s6028_s24 + $0x68] sm:$0xff] }
  0x4e   : > { %9553 = vst [vmem:[#allocation37_spill] sm:$0xff] %v9552_v29  ;;  %v6341_v9 = vpack.c.b16 %v1520_v20, %v1519_v48  ;;  %vm6351_vm10 = vcmp.eq.s32.totalorder %v379_v8, 0  ;;  %v9565_v20 = vmov 0  ;;  %v6377_v48 = vld [vmem:[%s6028_s24 + $0x60] sm:$0xff]  ;;  %v1085_v58 = vpack.c.bf16 %v6387_v11, %v6387_v11 }
  0x4f   : > { %9556 = vst [vmem:[#allocation38_spill] sm:$0xff] %v9555_v37  ;;  %v9566_v20 = vsel %vm6351_vm10, 4294967295, %v9565_v20  ;;  %v6359_v24 = vpack.c.b16 %v1309_v62, %v1308_v59 }
  0x50   : > { %9557 = vst [vmem:[#allocation39_spill] sm:$0xff] %v6287_v46  ;;  %v880_v32 = vld [vmem:[#allocation2 + $0xc0] sm:$0xff] }
  0x51   : > { %9558 = vst [vmem:[#allocation40_spill] sm:$0xff] %v6296_v49  ;;  %5350 = vmatmul.msk.bf16.gmra.mxu2 %vm9385_vm0, %v6281_v41 }
  0x52   : > { %5365 = vmatmul.msk.bf16.gmra.mxu1 %vm9385_vm0, %v6263_v57  ;;  %9559 = vst [vmem:[#allocation41_spill] sm:$0xff] %v6299_v50  ;;  %5342 = vmatmul.msk.bf16.gmra.mxu0 %vm9385_vm0, %v6287_v46  ;;  %v6355_v17 = vld [vmem:[#allocation2 + $0xc2] sm:$0xff] }
  0x53   : > { %846 = vst.msk [vmem:[#allocation2 + $0xd1] sm:$0xff] %vm9385_vm0, %v6296_v49  ;;  %v864_v15 = vld [vmem:[#allocation2 + $0x40] sm:$0xff]  ;;  %v6379_v53 = vld [vmem:[#allocation2 + $0xc8] sm:$0xff]  ;;  %v1024_v8 = vsel %vm6351_vm10, %v6355_v17, %v880_v32  ;;  %v181_v32 = vadd.s32 80, %v6017_v6  ;;  %v1294_v49 = vunpack.c.l.b16 %v1082_v27 }
  0x54   : > { %5373 = vmatmul.msk.bf16.gmra.mxu3 %vm9385_vm0, %v6265_v63  ;;  %9560 = vst [vmem:[#allocation42_spill] sm:$0xff] %v6309_v54  ;;  %v6349_v16 = vld [vmem:[#allocation2 + $0x42] sm:$0xff]  ;;  %v1060_v62 = vpack.c.bf16 %v1024_v8, %v1024_v8  ;;  %v1061_v26 = vpack.c.bf16 %v6379_v53, %v6379_v53 }
  0x55   : > { %9561 = vst [vmem:[#allocation43_spill] sm:$0xff] %v6312_v56  ;;  %v6361_v10 = vld [vmem:[#allocation2 + $0x48] sm:$0xff]  ;;  %v1008_v31 = vsel %vm6345_vm9, %v6349_v16, %v864_v15  ;;  %v281_v37 = vand.u32 15, %v181_v32  ;;  %v9576_v32 = vmov 0 }
  0x56   : > { %847 = vst.msk [vmem:[#allocation2 + $0xd9] sm:$0xff] %vm9385_vm0, %v6299_v50  ;;  %v1044_v15 = vpack.c.bf16 %v1008_v31, %v1008_v31  ;;  %v1045_v59 = vpack.c.bf16 %v6361_v10, %v6361_v10  ;;  %v197_v31 = vadd.s32 208, %v6017_v6  ;;  %v1537_v30 = vunpack.c.l.b16 %v1060_v62 }
  0x57   : > { %830 = vst.msk [vmem:[#allocation2 + $0x51] sm:$0xff] %vm9385_vm0, %v6309_v54  ;;  %v1538_v8 = vunpack.c.l.b16 %v1061_v26  ;;  %vm6417_vm11 = vcmp.eq.s32.totalorder %v281_v37, 0  ;;  %v9573_v26 = vmov 0  ;;  %v6446_v37 = vld [vmem:[%s6028_s24 + $0xf8] sm:$0xff] }
  0x58   : > { %831 = vst.msk [vmem:[#allocation2 + $0x59] sm:$0xff] %vm9385_vm0, %v6312_v56  ;;  %v1521_v28 = vunpack.c.l.b16 %v1044_v15  ;;  %v1522_v21 = vunpack.c.l.b16 %v1045_v59  ;;  %v393_v61 = vand.u32 15, %v197_v31  ;;  %v1310_v15 = vunpack.c.l.b16 %v1098_v42 }
  0x59   : > { %9564 = vst [vmem:[#allocation44_spill] sm:$0xff] %v9563_v34  ;;  %v1311_v59 = vunpack.c.l.b16 %v1099_v36  ;;  %v6415_v38 = vpack.c.b16 %v1538_v8, %v1537_v30  ;;  %v9574_v26 = vsel %vm6417_vm11, 4294967295, %v9573_v26 }
  0x5a   : > { %9567 = vst [vmem:[#allocation45_spill] sm:$0xff] %v9566_v20  ;;  %v1083_v20 = vpack.c.bf16 %v6312_v56, %v6312_v56  ;;  %v6413_v7 = vpack.c.b16 %v1522_v21, %v1521_v28  ;;  %vm6423_vm12 = vcmp.eq.s32.totalorder %v393_v61, 0  ;;  %v882_v42 = vld [vmem:[#allocation2 + $0xd0] sm:$0xff] }
  0x5b   : > { %9568 = vst [vmem:[#allocation46_spill] sm:$0xff] %v6365_v22  ;;  %v9577_v32 = vsel %vm6423_vm12, 4294967295, %v9576_v32  ;;  %v6431_v27 = vpack.c.b16 %v1311_v59, %v1310_v15  ;;  %v6443_v28 = vld [vmem:[%s6028_s24 + $0xf0] sm:$0xff] }
  0x5c   : > { %9569 = vst [vmem:[#allocation47_spill] sm:$0xff] %v6371_v39  ;;  %v1295_v62 = vunpack.c.l.b16 %v1083_v20  ;;  %v6449_v20 = vld [vmem:[%s6028_s24 + $0x70] sm:$0xff] }
  0x5d   : > { %9570 = vst [vmem:[#allocation48_spill] sm:$0xff] %v6374_v47  ;;  %v6427_v36 = vld [vmem:[#allocation2 + $0xd2] sm:$0xff] }
  0x5e   : > { %9571 = vst [vmem:[#allocation49_spill] sm:$0xff] %v6377_v48  ;;  %v866_v50 = vld [vmem:[#allocation2 + $0x50] sm:$0xff]  ;;  %v6437_v21 = vpack.c.b16 %v1295_v62, %v1294_v49  ;;  %v6451_v31 = vld [vmem:[#allocation2 + $0xd8] sm:$0xff]  ;;  %v1026_v8 = vsel %vm6423_vm12, %v6427_v36, %v882_v42  ;;  %v183_v62 = vadd.s32 96, %v6017_v6  ;;  %v199_v42 = vadd.s32 224, %v6017_v6 }
  0x5f   : > { %848 = vst.msk [vmem:[#allocation2 + $0xe1] sm:$0xff] %vm9385_vm0, %v6371_v39  ;;  %v6421_v54 = vld [vmem:[#allocation2 + $0x52] sm:$0xff]  ;;  %v1062_v15 = vpack.c.bf16 %v1026_v8, %v1026_v8  ;;  %v1063_v59 = vpack.c.bf16 %v6451_v31, %v6451_v31  ;;  %v1084_v8 = vpack.c.bf16 %v6377_v48, %v6377_v48 }
  0x60   : > { %9572 = vst [vmem:[#allocation50_spill] sm:$0xff] %v6387_v11  ;;  %v6433_v30 = vld [vmem:[#allocation2 + $0x58] sm:$0xff]  ;;  %v1010_v61 = vsel %vm6417_vm11, %v6421_v54, %v866_v50  ;;  %v295_v2 = vand.u32 15, %v183_v62  ;;  %v407_v33 = vand.u32 15, %v199_v42 }
  0x61   : > { %849 = vst.msk [vmem:[#allocation2 + $0xe9] sm:$0xff] %vm9385_vm0, %v6374_v47  ;;  %5351 = vmatmul.msk.bf16.gmra.mxu2 %vm9385_vm0, %v6359_v24  ;;  %v1046_v49 = vpack.c.bf16 %v1010_v61, %v1010_v61  ;;  %v1047_v50 = vpack.c.bf16 %v6433_v30, %v6433_v30  ;;  %v1100_v61 = vpack.c.bf16 %v6371_v39, %v6371_v39  ;;  %v1539_v34 = vunpack.c.l.b16 %v1062_v15 }
  0x62   : > { %5366 = vmatmul.msk.bf16.gmra.mxu1 %vm9385_vm0, %v6341_v9  ;;  %832 = vst.msk [vmem:[#allocation2 + $0x61] sm:$0xff] %vm9385_vm0, %v6377_v48  ;;  %5343 = vmatmul.msk.bf16.gmra.mxu0 %vm9385_vm0, %v6365_v22  ;;  %v1540_v29 = vunpack.c.l.b16 %v1063_v59  ;;  %v1296_v39 = vunpack.c.l.b16 %v1084_v8  ;;  %vm6484_vm13 = vcmp.eq.s32.totalorder %v295_v2, 0  ;;  %vm6490_vm14 = vcmp.eq.s32.totalorder %v407_v33, 0 }
  0x63   : > { %833 = vst.msk [vmem:[#allocation2 + $0x69] sm:$0xff] %vm9385_vm0, %v6387_v11  ;;  %v1523_v56 = vunpack.c.l.b16 %v1046_v49  ;;  %v1312_v49 = vunpack.c.l.b16 %v1100_v61  ;;  %v9590_v48 = vmov 0  ;;  %v185_v61 = vadd.s32 112, %v6017_v6 }
  0x64   : > { %5374 = vmatmul.msk.bf16.gmra.mxu3 %vm9385_vm0, %v6343_v23  ;;  %9575 = vst [vmem:[#allocation51_spill] sm:$0xff] %v9574_v26  ;;  %v1101_v26 = vpack.c.bf16 %v6374_v47, %v6374_v47  ;;  %v9587_v47 = vmov 0  ;;  %v9591_v48 = vsel %vm6490_vm14, 4294967295, %v9590_v48  ;;  %v201_v8 = vadd.s32 240, %v6017_v6 }
  0x65   : > { %9578 = vst [vmem:[#allocation52_spill] sm:$0xff] %v9577_v32  ;;  %v1524_v32 = vunpack.c.l.b16 %v1047_v50  ;;  %v9588_v47 = vsel %vm6484_vm13, 4294967295, %v9587_v47 }
  0x66   : > { %9579 = vst [vmem:[#allocation53_spill] sm:$0xff] %v6427_v36  ;;  %v1313_v50 = vunpack.c.l.b16 %v1101_v26  ;;  %v884_v62 = vld [vmem:[#allocation2 + $0xe0] sm:$0xff] }
  0x67   : > { %9580 = vst [vmem:[#allocation54_spill] sm:$0xff] %v6431_v27  ;;  %v6480_v36 = vpack.c.b16 %v1524_v32, %v1523_v56 }
  0x68   : > { %9581 = vst [vmem:[#allocation55_spill] sm:$0xff] %v6437_v21  ;;  %v6494_v56 = vld [vmem:[#allocation2 + $0xe2] sm:$0xff] }
  0x69   : > { %9582 = vst [vmem:[#allocation56_spill] sm:$0xff] %v6443_v28  ;;  %v868_v15 = vld [vmem:[#allocation2 + $0x60] sm:$0xff]  ;;  %v1028_v26 = vsel %vm6490_vm14, %v6494_v56, %v884_v62  ;;  %v1103_v62 = vpack.c.bf16 %v6446_v37, %v6446_v37  ;;  %vm9604_vm14 = vcmask 261120  }
  0x6a   : > { %9583 = vst [vmem:[#allocation57_spill] sm:$0xff] %v6446_v37  ;;  %v6488_v59 = vld [vmem:[#allocation2 + $0x62] sm:$0xff]  ;;  %vm9606_vm12 = vmmov %vm9604_vm14 }
  0x6b   : > { %9584 = vst [vmem:[#allocation58_spill] sm:$0xff] %v6449_v20  ;;  %v1012_v33 = vsel %vm6484_vm13, %v6488_v59, %v868_v15  ;;  %v1102_v15 = vpack.c.bf16 %v6443_v28, %v6443_v28 }
  0x6c   : > { %9585 = vst [vmem:[#allocation59_spill] sm:$0xff] %v6451_v31  ;;  %v1297_v31 = vunpack.c.l.b16 %v1085_v58  ;;  %v6504_v58 = vld [vmem:[#allocation2 + $0x68] sm:$0xff]  ;;  %v1048_v32 = vpack.c.bf16 %v1012_v33, %v1012_v33 }
  0x6d   : > { %850 = vst.msk [vmem:[#allocation2 + $0xf1] sm:$0xff] %vm9385_vm0, %v6443_v28 }
  0x6e   : > { %851 = vst.msk [vmem:[#allocation2 + $0xf9] sm:$0xff] %vm9385_vm0, %v6446_v37  ;;  %v6502_v2 = vpack.c.b16 %v1297_v31, %v1296_v39  ;;  %v1049_v39 = vpack.c.bf16 %v6504_v58, %v6504_v58  ;;  %v1064_v31 = vpack.c.bf16 %v1028_v26, %v1028_v26  ;;  %v1086_v26 = vpack.c.bf16 %v6449_v20, %v6449_v20 }
  0x6f   : > { %834 = vst.msk [vmem:[#allocation2 + $0x71] sm:$0xff] %vm9385_vm0, %v6449_v20 }
  0x70   : > { %9589 = vst [vmem:[#allocation61_spill] sm:$0xff] %v9588_v47  ;;  %v1541_v33 = vunpack.c.l.b16 %v1064_v31  ;;  %v309_v47 = vand.u32 15, %v185_v61  ;;  %v9597_v31 = vmov 0  ;;  %v5781_v61 = vld [vmem:[%s9328_s1 + $0x68] sm:$0xff] }
  0x71   : > { %5352 = vmatmul.msk.bf16.gmra.mxu2 %vm9385_vm0, %v6431_v27  ;;  %v6482_v27 = vpack.c.b16 %v1540_v29, %v1539_v34  ;;  %9592 = vst [vmem:[#allocation62_spill] sm:$0xff] %v9591_v48  ;;  %v6498_v29 = vpack.c.b16 %v1313_v50, %v1312_v49  ;;  %v6509_v34 = vld [vmem:[#allocation2 + $0xe8] sm:$0xff]  ;;  %v1525_v49 = vunpack.c.l.b16 %v1048_v32  ;;  %v1526_v50 = vunpack.c.l.b16 %v1049_v39 }
  0x72   : > { %5367 = vmatmul.msk.bf16.gmra.mxu1 %vm9385_vm0, %v6413_v7  ;;  %5344 = vmatmul.msk.bf16.gmra.mxu0 %vm9385_vm0, %v6437_v21  ;;  %9593 = vst [vmem:[#allocation63_spill] sm:$0xff] %v6494_v56  ;;  %v1065_v42 = vpack.c.bf16 %v6509_v34, %v6509_v34  ;;  %v1087_v48 = vpack.c.bf16 %v6048_v18, %v6048_v18  ;;  %v172_v56 = vadd.s32 8, %v6017_v6  ;;  %v1314_v39 = vunpack.c.l.b16 %v1102_v15 }
  0x73   : > { %9586 = vst [vmem:[#allocation60_spill] sm:$0xff] %v6482_v27  ;;  %v6533_v32 = vpack.c.b16 %v1526_v50, %v1525_v49  ;;  %vm6537_vm15 = vcmp.eq.s32.totalorder %v309_v47, 0  ;;  %2420 = vmatpush.bf16.msra.mxu2 %v5781_v61  ;;  %v5783_v50 = vld [vmem:[%s9328_s1 + $0x78] sm:$0xff]  ;;  %v5778_v61 = vld [vmem:[%s9328_s1 + $0x50] sm:$0xff] }
  0x74   : > { %5375 = vmatmul.msk.bf16.gmra.mxu3 %vm9385_vm0, %v6415_v38  ;;  %9594 = vst [vmem:[#allocation64_spill] sm:$0xff] %v6498_v29  ;;  %v1542_v11 = vunpack.c.l.b16 %v1065_v42  ;;  %v1299_v37 = vunpack.c.l.b16 %v1087_v48  ;;  %v9598_v31 = vsel %vm6537_vm15, 4294967295, %v9597_v31  ;;  %v218_v18 = vand.u32 15, %v172_v56 }
  0x75   : > { %9595 = vst [vmem:[#allocation65_spill] sm:$0xff] %v6502_v2  ;;  %v6550_v49 = vld [vmem:[#allocation2 + $0xf2] sm:$0xff]  ;;  %2561 = vmatpush.bf16.msra.mxu3 %v5783_v50 }
  0x76   : > { %9596 = vst [vmem:[#allocation66_spill] sm:$0xff] %v6509_v34  ;;  %v1315_v34 = vunpack.c.l.b16 %v1103_v62  ;;  %v6535_v28 = vpack.c.b16 %v1542_v11, %v1541_v33  ;;  %v870_v42 = vld [vmem:[#allocation2 + $0x70] sm:$0xff]  ;;  %v6556_v48 = vld [vmem:[#allocation2 + $0x78] sm:$0xff]  ;;  %v9609_v62 = vmov 0 }
  0x77   : > { %9599 = vst [vmem:[#allocation67_spill] sm:$0xff] %v9598_v31  ;;  %v6541_v20 = vld [vmem:[#allocation2 + $0x72] sm:$0xff]  ;;  %v1051_v33 = vpack.c.bf16 %v6556_v48, %v6556_v48 }
  0x78   : > { %v886_v11 = vld [vmem:[#allocation2 + $0xf0] sm:$0xff]  ;;  %9603 = vst [vmem:[#allocation69_spill] sm:$0xff] %v6550_v49  ;;  %v6554_v47 = vpack.c.b16 %v1315_v34, %v1314_v39  ;;  %v6568_v15 = vld [vmem:[#allocation2 + $0xf8] sm:$0xff] }
  0x79   : > { %9608 = vst [vmem:[#allocation72_spill] sm:$0xff] %v6568_v15  ;;  %v1067_v39 = vpack.c.bf16 %v6568_v15, %v6568_v15 }
  0x7a   : > { %9605 = vst [vmem:[#allocation70_spill] sm:$0xff] %v6554_v47 }
  0x81   : > { %5353 = vmatmul.msk.bf16.gmra.mxu2 %vm9385_vm0, %v6498_v29  ;;  %v421_v29 = vand.u32 15, %v201_v8  ;;  %v9600_v8 = vmov 0 }
  0x82   : > { %5368 = vmatmul.msk.bf16.gmra.mxu1 %vm9385_vm0, %v6480_v36  ;;  %5345 = vmatmul.msk.bf16.gmra.mxu0 %vm9385_vm0, %v6502_v2 }
  0x84   : > { %5376 = vmatmul.msk.bf16.gmra.mxu3 %vm9385_vm0, %v6482_v27  ;;  %v1298_v27 = vunpack.c.l.b16 %v1086_v26  ;;  %vm6546_vm0 = vcmp.eq.s32.totalorder %v421_v29, 0  ;;  %v1014_v29 = vsel %vm6537_vm15, %v6541_v20, %v870_v42 }
  0x85   : > { %v9601_v8 = vsel %vm6546_vm0, 4294967295, %v9600_v8  ;;  %v1030_v34 = vsel %vm6546_vm0, %v6550_v49, %v886_v11  ;;  %v1050_v26 = vpack.c.bf16 %v1014_v29, %v1014_v29  ;;  %vm9612_vm0 = vmmov %vm9606_vm12  ;;  %v5785_v11 = vld [vmem:[%s9328_s1 + $0x88] sm:$0xff]  ;;  %v1528_v29 = vunpack.c.l.b16 %v1051_v33 }
  0x86   : > { %9602 = vst [vmem:[#allocation68_spill] sm:$0xff] %v9601_v8  ;;  %v6560_v56 = vpack.c.b16 %v1299_v37, %v1298_v27  ;;  %v893_v27 = vld [vmem:[#allocation2 + $0xa] sm:$0xff]  ;;  %v5779_v37 = vld [vmem:[%s9328_s1 + $0x58] sm:$0xff]  ;;  %v174_v8 = vadd.s32 24, %v6017_v6  ;;  %2702 = vmatpush.bf16.msra.mxu0 %v5785_v11  ;;  %vm9617_vm10 = vmmov %vm9612_vm0 }
  0x87   : > { %2279 = vmatpush.bf16.msrb.mxu1 %v5779_v37  ;;  %v1527_v50 = vunpack.c.l.b16 %v1050_v26  ;;  %v895_v26 = vld [vmem:[#allocation2 + $0x1a] sm:$0xff]  ;;  %vm9618_vm8 = vmmov %vm9612_vm0 }
  0x88   : > { %9607 = vst [vmem:[#allocation71_spill] sm:$0xff] %v6560_v56  ;;  %vm9619_vm6 = vmmov %vm9612_vm0 }
  0x8b   : > { %2280 = vmatpush.bf16.msrb.mxu1 %v5778_v61 }
  0x91   : > { %5354 = vmatmul.msk.bf16.gmra.mxu2 %vm9606_vm12, %v6554_v47  ;;  %v232_v47 = vand.u32 15, %v174_v8 }
  0x92   : > { %5369 = vmatmul.msk.bf16.gmra.mxu1 %vm9604_vm14, %v6533_v32  ;;  %vm6573_vm14 = vcmp.eq.s32.totalorder %v218_v18, 15  ;;  %5346 = vmatmul.msk.bf16.gmra.mxu0 %vm9612_vm0, %v6560_v56  ;;  %v1066_v18 = vpack.c.bf16 %v1030_v34, %v1030_v34  ;;  %v1216_v34 = vpack.c.bf16 %v6106_v44, %v6106_v44  ;;  %v9614_v44 = vmov 0 }
  0x93   : > { %v9610_v62 = vsel %vm6573_vm14, 4294967295, %v9609_v62  ;;  %v1181_v42 = vsel %vm6573_vm14, %v6104_v43, %v893_v27  ;;  %v1544_v43 = vunpack.c.l.b16 %v1067_v39  ;;  %v6600_v27 = vpack.c.b16 %v1528_v29, %v1527_v50 }
  0x94   : > { %5377 = vmatmul.msk.bf16.gmra.mxu3 %vm9606_vm12, %v6535_v28  ;;  %9611 = vst [vmem:[#allocation73_spill] sm:$0xff] %v9610_v62  ;;  %v1217_v37 = vpack.c.bf16 %v1181_v42, %v1181_v42  ;;  %v1543_v31 = vunpack.c.l.b16 %v1066_v18  ;;  %v1742_v62 = vunpack.c.l.b16 %v1216_v34  ;;  %vm6606_vm12 = vcmp.eq.s32.totalorder %v232_v47, 15 }
  0x95   : > { %9613 = vst [vmem:[#allocation74_spill] sm:$0xff] %v6600_v27  ;;  %v9615_v44 = vsel %vm6606_vm12, 4294967295, %v9614_v44  ;;  %v1183_v39 = vsel %vm6606_vm12, %v6148_v14, %v895_v26  ;;  %v176_v47 = vadd.s32 40, %v6017_v6 }
  0x96   : > { %v1743_v49 = vunpack.c.l.b16 %v1217_v37  ;;  %v6602_v15 = vpack.c.b16 %v1544_v43, %v1543_v31  ;;  %9616 = vst [vmem:[#allocation75_spill] sm:$0xff] %v9615_v44  ;;  %v1218_v31 = vpack.c.bf16 %v6133_v4, %v6133_v4  ;;  %v1219_v8 = vpack.c.bf16 %v1183_v39, %v1183_v39  ;;  %v897_v4 = vld [vmem:[#allocation2 + $0x2a] sm:$0xff] }
  0x97   : > { %v246_v11 = vand.u32 15, %v176_v47  ;;  %v178_v47 = vadd.s32 56, %v6017_v6 }
  0x98   : > { %v1774_v33 = vpack.c.b16 %v1743_v49, %v1742_v62  ;;  %v1744_v42 = vunpack.c.l.b16 %v1218_v31  ;;  %v1745_v61 = vunpack.c.l.b16 %v1219_v8  ;;  %v1220_v31 = vpack.c.bf16 %v6199_v60, %v6199_v60 }
  0x99   : > { %v9627_v60 = vmov 0 }
  0x9a   : > { %v1775_v14 = vpack.c.b16 %v1745_v61, %v1744_v42 }
  0x9f   : > { %v1401_v18 = vpop.f32.mrf.mxu0 }
  0xa1   : > { %5387 = vmatmul.msk.bf16.vlgmr.msrb.gmra.mxu2 %vm9618_vm8, %v1774_v33  ;;  %vm9620_vm8 = vmmov %vm9612_vm0 }
  0xa2   : > { %5370 = vmatmul.msk.bf16.gmra.mxu1 %vm9612_vm0, %v6600_v27  ;;  %5435 = vmatmul.msk.bf16.vlgmr.msrb.gmra.mxu0 %vm9619_vm6, %v6146_v13  ;;  %v9621_v13 = vmov 0  ;;  %vm9624_vm6 = vmmov %vm9612_vm0 }
  0xa4   : > { %5378 = vmatmul.msk.bf16.gmra.mxu3 %vm9617_vm10, %v6602_v15  ;;  %v1441_v49 = vpop.f32.mrf.mxu2  ;;  %vm6624_vm10 = vcmp.eq.s32.totalorder %v246_v11, 15 }
  0xa5   : > { %v9622_v13 = vsel %vm6624_vm10, 4294967295, %v9621_v13  ;;  %v1185_v43 = vsel %vm6624_vm10, %v6209_v1, %v897_v4  ;;  %v1746_v1 = vunpack.c.l.b16 %v1220_v31 }
  0xa6   : > { %9623 = vst [vmem:[#allocation76_spill] sm:$0xff] %v9622_v13 }
  0xa7   : > { %v1403_v62 = vpop.f32.mrf.mxu0 }
  0xac   : > { %v1443_v34 = vpop.f32.mrf.mxu2 }
  0xaf   : > { %v1630_v29 = vpop.f32.mrf.mxu1  ;;  %v1406_v37 = vpop.f32.mrf.mxu0 }
  0xb0   : > { %v6621_v50 = vadd.f32 %v1630_v29, %v1401_v18  ;;  %v260_v29 = vand.u32 15, %v178_v47 }
  0xb1   : > { %5388 = vmatmul.msk.bf16.gmra.mxu2 %vm9612_vm0, %v1775_v14 }
  0xb2   : > { %5459 = vmatmul.msk.bf16.vlgmr.msrb.gmra.mxu1 %vm9620_vm8, %v1775_v14  ;;  %vm9625_vm8 = vmmov %vm9612_vm0 }
  0xb3   : > { %5436 = vmatmul.msk.bf16.gmra.mxu0 %vm9625_vm8, %v6213_v3 }
  0xb4   : > { %5411 = vmatmul.msk.bf16.vlgmr.msrb.gmra.mxu3 %vm9624_vm6, %v6191_v52  ;;  %v1221_v52 = vpack.c.bf16 %v1185_v43, %v1185_v43  ;;  %v1446_v8 = vpop.f32.mrf.mxu2  ;;  %vm9626_vm6 = vmmov %vm9612_vm0  ;;  %vm6651_vm0 = vcmp.eq.s32.totalorder %v260_v29, 15  ;;  %v899_v43 = vld [vmem:[#allocation2 + $0x3a] sm:$0xff]  ;;  %v180_v29 = vadd.s32 72, %v6017_v6 }
  0xb5   : > { %v9628_v60 = vsel %vm6651_vm0, 4294967295, %v9627_v60  ;;  %vm9630_vm8 = vmmov %vm9626_vm6 }
  0xb6   : > { %v1747_v61 = vunpack.c.l.b16 %v1221_v52  ;;  %9629 = vst [vmem:[#allocation77_spill] sm:$0xff] %v9628_v60  ;;  %vm9631_vm4 = vmmov %vm9626_vm6  ;;  %v274_v13 = vand.u32 15, %v180_v29 }
  0xb7   : > { %v1670_v33 = vpop.f32.mrf.mxu3  ;;  %v1632_v18 = vpop.f32.mrf.mxu1  ;;  %vm9638_vm2 = vmmov %vm9631_vm4 }
  0xb8   : > { %v6634_v26 = vadd.f32 %v1670_v33, %v1441_v49  ;;  %v6638_v39 = vadd.f32 %v1632_v18, %v1403_v62  ;;  %v1408_v42 = vpop.f32.mrf.mxu0  ;;  %v6647_v33 = vpack.c.b16 %v1747_v61, %v1746_v1  ;;  %v1222_v1 = vpack.c.bf16 %v6271_v35, %v6271_v35  ;;  %vm9646_vm15 = vmmov %vm9638_vm2 }
  0xb9   : > { %v9634_v35 = vmov 0  ;;  %vm9653_vm13 = vmmov %vm9638_vm2 }
  0xbc   : > { %v1448_v62 = vpop.f32.mrf.mxu2 }
  0xbf   : > { %v1672_v11 = vpop.f32.mrf.mxu3  ;;  %v1635_v14 = vpop.f32.mrf.mxu1 }
  0xc0   : > { %v6643_v49 = vadd.f32 %v1672_v11, %v1443_v34  ;;  %v6645_v4 = vadd.f32 %v1635_v14, %v1406_v37  ;;  %v1411_v18 = vpop.f32.mrf.mxu0  ;;  %v1187_v34 = vsel %vm6651_vm0, %v6283_v45, %v899_v43  ;;  %v1748_v14 = vunpack.c.l.b16 %v1222_v1 }
  0xc1   : > { %5389 = vmatmul.msk.bf16.gmra.mxu2 %vm9631_vm4, %v6647_v33  ;;  %v1223_v61 = vpack.c.bf16 %v1187_v34, %v1187_v34  ;;  %v901_v34 = vld [vmem:[#allocation2 + $0x4a] sm:$0xff] }
  0xc2   : > { %5460 = vmatmul.msk.bf16.gmra.mxu1 %vm9626_vm6, %v6647_v33  ;;  %vm9632_vm6 = vmmov %vm9631_vm4 }
  0xc3   : > { %5437 = vmatmul.msk.bf16.gmra.mxu0 %vm9632_vm6, %v6287_v46  ;;  %v1749_v43 = vunpack.c.l.b16 %v1223_v61  ;;  %vm9637_vm6 = vmmov %vm9631_vm4  ;;  %v1224_v61 = vpack.c.bf16 %v6349_v16, %v6349_v16  ;;  %v9642_v16 = vmov 0 }
  0xc4   : > { %5412 = vmatmul.msk.bf16.gmra.mxu3 %vm9630_vm8, %v6263_v57  ;;  %v1451_v11 = vpop.f32.mrf.mxu2  ;;  %vm6679_vm8 = vcmp.eq.s32.totalorder %v274_v13, 15 }
  0xc5   : > { %v6675_v46 = vpack.c.b16 %v1749_v43, %v1748_v14  ;;  %v9635_v35 = vsel %vm6679_vm8, 4294967295, %v9634_v35  ;;  %v182_v43 = vadd.s32 88, %v6017_v6 }
  0xc6   : > { %9636 = vst [vmem:[#allocation79_spill] sm:$0xff] %v9635_v35 }
  0xc7   : > { %v1675_v37 = vpop.f32.mrf.mxu3  ;;  %v1637_v52 = vpop.f32.mrf.mxu1 }
  0xc8   : > { %v6662_v31 = vadd.f32 %v1675_v37, %v1446_v8  ;;  %v6666_v47 = vadd.f32 %v1637_v52, %v1408_v42  ;;  %v1413_v45 = vpop.f32.mrf.mxu0 }
  0xcc   : > { %v1453_v42 = vpop.f32.mrf.mxu2 }
  0xcf   : > { %v1677_v60 = vpop.f32.mrf.mxu3  ;;  %v1640_v37 = vpop.f32.mrf.mxu1 }
  0xd0   : > { %v6671_v8 = vadd.f32 %v1677_v60, %v1448_v62  ;;  %v6673_v44 = vadd.f32 %v1640_v37, %v1411_v18  ;;  %v1416_v52 = vpop.f32.mrf.mxu0  ;;  %v1189_v62 = vsel %vm6679_vm8, %v6361_v10, %v901_v34  ;;  %v1750_v37 = vunpack.c.l.b16 %v1224_v61 }
  0xd1   : > { %5390 = vmatmul.msk.bf16.gmra.mxu2 %vm9638_vm2, %v6675_v46  ;;  %v1225_v29 = vpack.c.bf16 %v1189_v62, %v1189_v62  ;;  %v903_v62 = vld [vmem:[#allocation2 + $0x5a] sm:$0xff] }
  0xd2   : > { %9633 = vst [vmem:[#allocation78_spill] sm:$0xff] %v6671_v8  ;;  %5461 = vmatmul.msk.bf16.gmra.mxu1 %vm9631_vm4, %v6675_v46  ;;  %vm9640_vm4 = vmmov %vm9638_vm2  ;;  %v288_v8 = vand.u32 15, %v182_v43 }
  0xd3   : > { %5438 = vmatmul.msk.bf16.gmra.mxu0 %vm9640_vm4, %v6365_v22  ;;  %v1751_v34 = vunpack.c.l.b16 %v1225_v29  ;;  %vm9645_vm4 = vmmov %vm9638_vm2  ;;  %v1226_v29 = vpack.c.bf16 %v6421_v54, %v6421_v54  ;;  %v9650_v54 = vmov 0 }
  0xd4   : > { %5413 = vmatmul.msk.bf16.gmra.mxu3 %vm9637_vm6, %v6341_v9  ;;  %v1456_v14 = vpop.f32.mrf.mxu2  ;;  %vm6707_vm6 = vcmp.eq.s32.totalorder %v288_v8, 15 }
  0xd5   : > { %v6703_v22 = vpack.c.b16 %v1751_v34, %v1750_v37  ;;  %v9643_v16 = vsel %vm6707_vm6, 4294967295, %v9642_v16  ;;  %v184_v34 = vadd.s32 104, %v6017_v6 }
  0xd6   : > { %9644 = vst [vmem:[#allocation82_spill] sm:$0xff] %v9643_v16 }
  0xd7   : > { %v1680_v60 = vpop.f32.mrf.mxu3  ;;  %v1642_v1 = vpop.f32.mrf.mxu1 }
  0xd8   : > { %v6690_v18 = vadd.f32 %v1680_v60, %v1451_v11  ;;  %v6694_v13 = vadd.f32 %v1642_v1, %v1413_v45  ;;  %v1418_v10 = vpop.f32.mrf.mxu0 }
  0xda   : > { %9639 = vst [vmem:[#allocation80_spill] sm:$0xff] %v6690_v18 }
  0xdc   : > { %v1458_v45 = vpop.f32.mrf.mxu2 }
  0xdf   : > { %v1682_v35 = vpop.f32.mrf.mxu3  ;;  %v1645_v60 = vpop.f32.mrf.mxu1 }
  0xe0   : > { %v6699_v11 = vadd.f32 %v1682_v35, %v1453_v42  ;;  %v6701_v18 = vadd.f32 %v1645_v60, %v1416_v52  ;;  %v1421_v1 = vpop.f32.mrf.mxu0  ;;  %v1191_v42 = vsel %vm6707_vm6, %v6433_v30, %v903_v62  ;;  %v1752_v60 = vunpack.c.l.b16 %v1226_v29 }
  0xe1   : > { %5391 = vmatmul.msk.bf16.gmra.mxu2 %vm9646_vm15, %v6703_v22  ;;  %v1227_v43 = vpack.c.bf16 %v1191_v42, %v1191_v42  ;;  %vm9649_vm15 = vmmov %vm9638_vm2  ;;  %v905_v42 = vld [vmem:[#allocation2 + $0x6a] sm:$0xff] }
  0xe2   : > { %9641 = vst [vmem:[#allocation81_spill] sm:$0xff] %v6699_v11  ;;  %5462 = vmatmul.msk.bf16.gmra.mxu1 %vm9638_vm2, %v6703_v22  ;;  %v302_v11 = vand.u32 15, %v184_v34 }
  0xe3   : > { %5439 = vmatmul.msk.bf16.gmra.mxu0 %vm9638_vm2, %v6437_v21  ;;  %v1753_v62 = vunpack.c.l.b16 %v1227_v43  ;;  %v1228_v43 = vpack.c.bf16 %v6488_v59, %v6488_v59  ;;  %v9659_v59 = vmov 0 }
  0xe4   : > { %5414 = vmatmul.msk.bf16.gmra.mxu3 %vm9645_vm4, %v6413_v7  ;;  %v1461_v37 = vpop.f32.mrf.mxu2  ;;  %vm6735_vm4 = vcmp.eq.s32.totalorder %v302_v11, 15 }
  0xe5   : > { %v6731_v21 = vpack.c.b16 %v1753_v62, %v1752_v60  ;;  %v9651_v54 = vsel %vm6735_vm4, 4294967295, %v9650_v54  ;;  %v186_v62 = vadd.s32 120, %v6017_v6 }
  0xe6   : > { %9652 = vst [vmem:[#allocation85_spill] sm:$0xff] %v9651_v54 }
  0xe7   : > { %v1685_v35 = vpop.f32.mrf.mxu3  ;;  %v1647_v61 = vpop.f32.mrf.mxu1 }
  0xe8   : > { %v6718_v52 = vadd.f32 %v1685_v35, %v1456_v14  ;;  %v6722_v8 = vadd.f32 %v1647_v61, %v1418_v10  ;;  %v1423_v30 = vpop.f32.mrf.mxu0 }
  0xea   : > { %9647 = vst [vmem:[#allocation83_spill] sm:$0xff] %v6718_v52 }
  0xec   : > { %v1463_v10 = vpop.f32.mrf.mxu2 }
  0xef   : > { %v1687_v16 = vpop.f32.mrf.mxu3  ;;  %v1650_v35 = vpop.f32.mrf.mxu1 }
  0xf0   : > { %v6727_v14 = vadd.f32 %v1687_v16, %v1458_v45  ;;  %v6729_v52 = vadd.f32 %v1650_v35, %v1421_v1  ;;  %v1426_v61 = vpop.f32.mrf.mxu0  ;;  %v1193_v45 = vsel %vm6735_vm4, %v6504_v58, %v905_v42  ;;  %v1754_v35 = vunpack.c.l.b16 %v1228_v43 }
  0xf1   : > { %5392 = vmatmul.msk.bf16.gmra.mxu2 %vm9653_vm13, %v6731_v21  ;;  %v1229_v34 = vpack.c.bf16 %v1193_v45, %v1193_v45  ;;  %vm9658_vm13 = vmmov %vm9638_vm2  ;;  %v907_v45 = vld [vmem:[#allocation2 + $0x7a] sm:$0xff] }
  0xf2   : > { %9648 = vst [vmem:[#allocation84_spill] sm:$0xff] %v6727_v14  ;;  %5463 = vmatmul.msk.bf16.gmra.mxu1 %vm9649_vm15, %v6731_v21  ;;  %vm9655_vm15 = vmmov %vm9638_vm2  ;;  %v316_v14 = vand.u32 15, %v186_v62 }
  0xf3   : > { %5440 = vmatmul.msk.bf16.gmra.mxu0 %vm9655_vm15, %v6502_v2  ;;  %v1755_v42 = vunpack.c.l.b16 %v1229_v34  ;;  %vm9662_vm15 = vmmov %vm9658_vm13  ;;  %v1230_v34 = vpack.c.bf16 %v6541_v20, %v6541_v20 }
  0xf4   : > { %5415 = vmatmul.msk.bf16.gmra.mxu3 %vm9638_vm2, %v6480_v36  ;;  %v1466_v60 = vpop.f32.mrf.mxu2  ;;  %vm6763_vm2 = vcmp.eq.s32.totalorder %v316_v14, 15  ;;  %vm9663_vm4 = vmmov %vm9658_vm13 }
  0xf5   : > { %v6759_v2 = vpack.c.b16 %v1755_v42, %v1754_v35  ;;  %v9660_v59 = vsel %vm6763_vm2, 4294967295, %v9659_v59  ;;  %v188_v42 = vadd.s32 136, %v6017_v6 }
  0xf6   : > { %9661 = vst [vmem:[#allocation89_spill] sm:$0xff] %v9660_v59 }
  0xf7   : > { %v1690_v16 = vpop.f32.mrf.mxu3  ;;  %v1652_v29 = vpop.f32.mrf.mxu1  ;;  %9657 = vst [vmem:[#allocation88_spill] sm:$0xff] %v6759_v2 }
  0xf8   : > { %v6746_v1 = vadd.f32 %v1690_v16, %v1461_v37  ;;  %v6750_v11 = vadd.f32 %v1652_v29, %v1423_v30  ;;  %v1428_v58 = vpop.f32.mrf.mxu0 }
  0xfa   : > { %9654 = vst [vmem:[#allocation86_spill] sm:$0xff] %v6746_v1 }
  0xfc   : > { %v1468_v30 = vpop.f32.mrf.mxu2 }
  0xff   : > { %v1692_v54 = vpop.f32.mrf.mxu3  ;;  %v1655_v16 = vpop.f32.mrf.mxu1 }
 0x100   : > { %v6755_v37 = vadd.f32 %v1692_v54, %v1463_v10  ;;  %v6757_v1 = vadd.f32 %v1655_v16, %v1426_v61  ;;  %v1431_v29 = vpop.f32.mrf.mxu0  ;;  %v1195_v10 = vsel %vm6763_vm2, %v6556_v48, %v907_v45  ;;  %v1756_v16 = vunpack.c.l.b16 %v1230_v34  ;;  %v5858_v34 = vld [vmem:[#allocation2 + $0x88] sm:$0xff]  ;;  %vm9673_vm2 = vmmov %vm9663_vm4 }
 0x101   : > { %5393 = vmatmul.msk.bf16.gmra.mxu2 %vm9663_vm4, %v6759_v2  ;;  %v1231_v62 = vpack.c.bf16 %v1195_v10, %v1195_v10  ;;  %v9668_v10 = vmov 0 }
 0x102   : > { %9656 = vst [vmem:[#allocation87_spill] sm:$0xff] %v6755_v37  ;;  %5464 = vmatmul.msk.bf16.gmra.mxu1 %vm9658_vm13, %v6759_v2  ;;  %vm9665_vm13 = vmmov %vm9663_vm4  ;;  %v330_v37 = vand.u32 15, %v188_v42 }
 0x103   : > { %5441 = vmatmul.msk.bf16.gmra.mxu0 %vm9665_vm13, %v6560_v56  ;;  %v1757_v45 = vunpack.c.l.b16 %v1231_v62  ;;  %vm9671_vm13 = vmmov %vm9663_vm4 }
 0x104   : > { %5416 = vmatmul.msk.bf16.gmra.mxu3 %vm9662_vm15, %v6533_v32  ;;  %v1471_v35 = vpop.f32.mrf.mxu2  ;;  %vm6794_vm15 = vcmp.eq.s32.totalorder %v330_v37, 15 }
 0x105   : > { %v6790_v56 = vpack.c.b16 %v1757_v45, %v1756_v16  ;;  %v9669_v10 = vsel %vm6794_vm15, 4294967295, %v9668_v10 }
 0x106   : > { %9670 = vst [vmem:[#allocation93_spill] sm:$0xff] %v9669_v10  ;;  %v190_v10 = vadd.s32 152, %v6017_v6 }
 0x107   : > { %v1695_v54 = vpop.f32.mrf.mxu3  ;;  %v1657_v43 = vpop.f32.mrf.mxu1  ;;  %9667 = vst [vmem:[#allocation92_spill] sm:$0xff] %v6790_v56 }
 0x108   : > { %v6774_v61 = vadd.f32 %v1695_v54, %v1466_v60  ;;  %v6778_v14 = vadd.f32 %v1657_v43, %v1428_v58  ;;  %v1433_v48 = vpop.f32.mrf.mxu0  ;;  %v5780_v58 = vld [vmem:[%s9328_s1 + $0x60] sm:$0xff] }
 0x109   : > { %2421 = vmatpush.bf16.msra.mxu2 %v5780_v58 }
 0x10a   : > { %9664 = vst [vmem:[#allocation90_spill] sm:$0xff] %v6774_v61 }
 0x10c   : > { %v1473_v20 = vpop.f32.mrf.mxu2 }
 0x10f   : > { %v1697_v59 = vpop.f32.mrf.mxu3  ;;  %v1660_v54 = vpop.f32.mrf.mxu1 }
 0x110   : > { %v6783_v60 = vadd.f32 %v1697_v59, %v1468_v30  ;;  %v6788_v43 = vadd.f32 %v1660_v54, %v1431_v29  ;;  %v909_v30 = vld [vmem:[#allocation2 + $0x8a] sm:$0xff]  ;;  %v1436_v29 = vpop.f32.mrf.mxu0  ;;  %v5859_v54 = vld [vmem:[#allocation2 + $0x82] sm:$0xff] }
 0x111   : > { %v5782_v59 = vld [vmem:[%s9328_s1 + $0x70] sm:$0xff]  ;;  %v1197_v62 = vsel %vm6794_vm15, %v5858_v34, %v909_v30  ;;  %5394 = vmatmul.msk.bf16.gmra.mxu2 %vm9663_vm4, %v6790_v56  ;;  %v1232_v58 = vpack.c.bf16 %v5859_v54, %v5859_v54  ;;  %v5784_v30 = vld [vmem:[%s9328_s1 + $0x80] sm:$0xff]  ;;  %vm9680_vm15 = vmmov %vm9673_vm2 }
 0x112   : > { %9666 = vst [vmem:[#allocation91_spill] sm:$0xff] %v6783_v60  ;;  %5465 = vmatmul.msk.bf16.gmra.mxu1 %vm9663_vm4, %v6790_v56  ;;  %2562 = vmatpush.bf16.msra.mxu3 %v5782_v59  ;;  %v1233_v60 = vpack.c.bf16 %v1197_v62, %v1197_v62  ;;  %vm9679_vm4 = vmmov %vm9673_vm2 }
 0x113   : > { %5442 = vmatmul.msk.bf16.gmra.mxu0 %vm9673_vm2, %v6058_v25  ;;  %v1758_v34 = vunpack.c.l.b16 %v1232_v58  ;;  %v9676_v25 = vmov 0  ;;  %v911_v58 = vld [vmem:[#allocation2 + $0x9a] sm:$0xff] }
 0x114   : > { %5417 = vmatmul.msk.bf16.gmra.mxu3 %vm9671_vm13, %v6600_v27  ;;  %v1476_v61 = vpop.f32.mrf.mxu2  ;;  %2703 = vmatpush.bf16.msra.mxu0 %v5784_v30 }
 0x117   : > { %v1700_v42 = vpop.f32.mrf.mxu3  ;;  %v1662_v16 = vpop.f32.mrf.mxu1 }
 0x118   : > { %v6807_v37 = vadd.f32 %v1700_v42, %v1471_v35  ;;  %v6811_v45 = vadd.f32 %v1662_v16, %v1433_v48  ;;  %v1438_v59 = vpop.f32.mrf.mxu0  ;;  %v1759_v35 = vunpack.c.l.b16 %v1233_v60 }
 0x11a   : > { %9672 = vst [vmem:[#allocation94_spill] sm:$0xff] %v6807_v37  ;;  %v344_v37 = vand.u32 15, %v190_v10  ;;  %v6821_v54 = vpack.c.b16 %v1759_v35, %v1758_v34  ;;  %v5861_v35 = vld [vmem:[#allocation2 + $0x92] sm:$0xff] }
 0x11c   : > { %9675 = vst [vmem:[#allocation96_spill] sm:$0xff] %v6821_v54  ;;  %v1478_v62 = vpop.f32.mrf.mxu2  ;;  %vm6825_vm13 = vcmp.eq.s32.totalorder %v344_v37, 15 }
 0x11d   : > { %v9677_v25 = vsel %vm6825_vm13, 4294967295, %v9676_v25 }
 0x11e   : > { %9678 = vst [vmem:[#allocation97_spill] sm:$0xff] %v9677_v25 }
 0x11f   : > { %v1702_v42 = vpop.f32.mrf.mxu3  ;;  %v1665_v48 = vpop.f32.mrf.mxu1 }
 0x120   : > { %v6817_v56 = vadd.f32 %v1702_v42, %v1473_v20  ;;  %v6819_v16 = vadd.f32 %v1665_v48, %v1436_v29  ;;  %v2141_v60 = vpop.f32.mrf.mxu0  ;;  %v5860_v20 = vld [vmem:[#allocation2 + $0x98] sm:$0xff]  ;;  %v1234_v42 = vpack.c.bf16 %v5861_v35, %v5861_v35 }
 0x121   : > { %v1199_v10 = vsel %vm6825_vm13, %v5860_v20, %v911_v58  ;;  %5395 = vmatmul.msk.bf16.gmra.mxu2 %vm9680_vm15, %v6821_v54  ;;  %v192_v58 = vadd.s32 168, %v6017_v6  ;;  %vm9684_vm15 = vmmov %vm9673_vm2 }
 0x122   : > { %9674 = vst [vmem:[#allocation95_spill] sm:$0xff] %v6817_v56  ;;  %5466 = vmatmul.msk.bf16.gmra.mxu1 %vm9673_vm2, %v6821_v54  ;;  %v1235_v48 = vpack.c.bf16 %v1199_v10, %v1199_v10  ;;  %v1760_v25 = vunpack.c.l.b16 %v1234_v42  ;;  %vm9688_vm13 = vmmov %vm9673_vm2 }
 0x123   : > { %5443 = vmatmul.msk.bf16.gmra.mxu0 %vm9673_vm2, %v6142_v12 }
 0x124   : > { %5418 = vmatmul.msk.bf16.gmra.mxu3 %vm9679_vm4, %v6135_v5  ;;  %v1859_v56 = vpop.f32.mrf.mxu2  ;;  %v1761_v27 = vunpack.c.l.b16 %v1235_v48 }
 0x125   : > { %v1939_v5 = vadd.f32 %v1859_v56, %v6621_v50  ;;  %v9685_v56 = vmov 0  ;;  %v913_v50 = vld [vmem:[#allocation2 + $0xaa] sm:$0xff] }
 0x126   : > { %v6845_v2 = vpack.c.b16 %v1761_v27, %v1760_v25 }
 0x127   : > { %v1705_v29 = vpop.f32.mrf.mxu3  ;;  %v1667_v34 = vpop.f32.mrf.mxu1 }
 0x128   : > { %v6835_v30 = vadd.f32 %v1705_v29, %v1476_v61  ;;  %v6839_v37 = vadd.f32 %v1667_v34, %v1438_v59  ;;  %v2143_v20 = vpop.f32.mrf.mxu0  ;;  %v358_v61 = vand.u32 15, %v192_v58  ;;  %9683 = vst [vmem:[#allocation100_spill] sm:$0xff] %v6845_v2 }
 0x12a   : > { %9681 = vst [vmem:[#allocation98_spill] sm:$0xff] %v6835_v30  ;;  %vm6850_vm4 = vcmp.eq.s32.totalorder %v358_v61, 15 }
 0x12b   : > { %v9686_v56 = vsel %vm6850_vm4, 4294967295, %v9685_v56  ;;  %v1201_v25 = vsel %vm6850_vm4, %v6227_v19, %v913_v50 }
 0x12c   : > { %v1861_v59 = vpop.f32.mrf.mxu2  ;;  %9687 = vst [vmem:[#allocation101_spill] sm:$0xff] %v9686_v56  ;;  %v1237_v42 = vpack.c.bf16 %v1201_v25, %v1201_v25 }
 0x12d   : > { %v1940_v34 = vadd.f32 %v1861_v59, %v6638_v39  ;;  %v194_v59 = vadd.s32 184, %v6017_v6 }
 0x12e   : > { %v1763_v12 = vunpack.c.l.b16 %v1237_v42 }
 0x12f   : > { %v1707_v54 = vpop.f32.mrf.mxu3  ;;  %v2282_v30 = vpop.f32.mrf.mxu1 }
 0x130   : > { %v6843_v29 = vadd.f32 %v1707_v54, %v1478_v62  ;;  %v2146_v10 = vpop.f32.mrf.mxu0  ;;  %v5862_v62 = vld [vmem:[#allocation2 + $0xa2] sm:$0xff] }
 0x131   : > { %5396 = vmatmul.msk.bf16.gmra.mxu2 %vm9688_vm13, %v6845_v2  ;;  %v1236_v35 = vpack.c.bf16 %v5862_v62, %v5862_v62  ;;  %vm9690_vm13 = vmmov %vm9673_vm2 }
 0x132   : > { %9682 = vst [vmem:[#allocation99_spill] sm:$0xff] %v6843_v29  ;;  %5467 = vmatmul.msk.bf16.gmra.mxu1 %vm9684_vm15, %v6845_v2  ;;  %vm9689_vm15 = vmmov %vm9673_vm2 }
 0x133   : > { %5444 = vmatmul.msk.bf16.gmra.mxu0 %vm9689_vm15, %v6207_v0  ;;  %v1762_v50 = vunpack.c.l.b16 %v1236_v35  ;;  %vm9694_vm15 = vmmov %vm9690_vm13 }
 0x134   : > { %5419 = vmatmul.msk.bf16.gmra.mxu3 %vm9673_vm2, %v6193_v55  ;;  %v1864_v58 = vpop.f32.mrf.mxu2  ;;  %vm9695_vm4 = vmmov %vm9690_vm13 }
 0x135   : > { %v1941_v61 = vadd.f32 %v1864_v58, %v6645_v4  ;;  %v6867_v55 = vpack.c.b16 %v1763_v12, %v1762_v50  ;;  %v9691_v4 = vmov 0 }
 0x137   : > { %v2000_v27 = vpop.f32.mrf.mxu3  ;;  %v2284_v54 = vpop.f32.mrf.mxu1 }
 0x138   : > { %v2080_v39 = vadd.f32 %v2000_v27, %v1939_v5  ;;  %v2148_v19 = vpop.f32.mrf.mxu0  ;;  %v372_v5 = vand.u32 15, %v194_v59 }
 0x13a   : > { %v2221_v48 = vadd.f32 %v2141_v60, %v2080_v39  ;;  %vm6872_vm2 = vcmp.eq.s32.totalorder %v372_v5, 15 }
 0x13b   : > { %v9692_v4 = vsel %vm6872_vm2, 4294967295, %v9691_v4 }
 0x13c   : > { %v6865_v56 = vadd.f32 %v2282_v30, %v2221_v48  ;;  %v1866_v62 = vpop.f32.mrf.mxu2  ;;  %9693 = vst [vmem:[#allocation102_spill] sm:$0xff] %v9692_v4  ;;  %v915_v30 = vld [vmem:[#allocation2 + $0xba] sm:$0xff]  ;;  %v196_v48 = vadd.s32 200, %v6017_v6 }
 0x13d   : > { %v1942_v60 = vadd.f32 %v1866_v62, %v6666_v47  ;;  %v1203_v12 = vsel %vm6872_vm2, %v6301_v51, %v915_v30  ;;  %vm9701_vm2 = vmmov %vm9695_vm4 }
 0x13e   : > { %v1239_v39 = vpack.c.bf16 %v1203_v12, %v1203_v12  ;;  %v386_v5 = vand.u32 15, %v196_v48 }
 0x13f   : > { %v2002_v29 = vpop.f32.mrf.mxu3  ;;  %v2287_v2 = vpop.f32.mrf.mxu1 }
 0x140   : > { %v2081_v27 = vadd.f32 %v2002_v29, %v1940_v34  ;;  %v2151_v29 = vpop.f32.mrf.mxu0  ;;  %v1765_v50 = vunpack.c.l.b16 %v1239_v39 }
 0x141   : > { %5397 = vmatmul.msk.bf16.gmra.mxu2 %vm9695_vm4, %v6867_v55 }
 0x142   : > { %v2222_v0 = vadd.f32 %v2143_v20, %v2081_v27  ;;  %5468 = vmatmul.msk.bf16.gmra.mxu1 %vm9690_vm13, %v6867_v55  ;;  %vm9696_vm13 = vmmov %vm9695_vm4 }
 0x143   : > { %5445 = vmatmul.msk.bf16.gmra.mxu0 %vm9696_vm13, %v6281_v41  ;;  %vm9700_vm13 = vmmov %vm9695_vm4 }
 0x144   : > { %v6876_v25 = vadd.f32 %v2284_v54, %v2222_v0  ;;  %5420 = vmatmul.msk.bf16.gmra.mxu3 %vm9694_vm15, %v6265_v63  ;;  %v1238_v0 = vpack.c.bf16 %v6277_v40, %v6277_v40  ;;  %v1869_v35 = vpop.f32.mrf.mxu2  ;;  %vm6898_vm15 = vcmp.eq.s32.totalorder %v386_v5, 15 }
 0x145   : > { %v1943_v42 = vadd.f32 %v1869_v35, %v6673_v44  ;;  %v9697_v44 = vmov 0 }
 0x146   : > { %v1764_v59 = vunpack.c.l.b16 %v1238_v0  ;;  %v9698_v44 = vsel %vm6898_vm15, 4294967295, %v9697_v44 }
 0x147   : > { %v2005_v20 = vpop.f32.mrf.mxu3  ;;  %v2289_v34 = vpop.f32.mrf.mxu1  ;;  %9699 = vst [vmem:[#allocation103_spill] sm:$0xff] %v9698_v44 }
 0x148   : > { %v2082_v47 = vadd.f32 %v2005_v20, %v1941_v61  ;;  %v2153_v58 = vpop.f32.mrf.mxu0  ;;  %v6893_v30 = vpack.c.b16 %v1765_v50, %v1764_v59  ;;  %v198_v59 = vadd.s32 216, %v6017_v6 }
 0x14a   : > { %v2223_v54 = vadd.f32 %v2146_v10, %v2082_v47 }
 0x14c   : > { %v6891_v51 = vadd.f32 %v2287_v2, %v2223_v54  ;;  %v1871_v40 = vpop.f32.mrf.mxu2  ;;  %v917_v2 = vld [vmem:[#allocation2 + $0xca] sm:$0xff] }
 0x14d   : > { %v1944_v10 = vadd.f32 %v1871_v40, %v6694_v13 }
 0x14f   : > { %v2007_v61 = vpop.f32.mrf.mxu3  ;;  %v2292_v62 = vpop.f32.mrf.mxu1 }
 0x150   : > { %v2083_v27 = vadd.f32 %v2007_v61, %v1942_v60  ;;  %v2156_v60 = vpop.f32.mrf.mxu0 }
 0x151   : > { %5398 = vmatmul.msk.bf16.gmra.mxu2 %vm9701_vm2, %v6893_v30 }
 0x152   : > { %v2224_v20 = vadd.f32 %v2148_v19, %v2083_v27  ;;  %5469 = vmatmul.msk.bf16.gmra.mxu1 %vm9695_vm4, %v6893_v30  ;;  %v1205_v19 = vsel %vm6898_vm15, %v6379_v53, %v917_v2  ;;  %vm9702_vm4 = vmmov %vm9701_vm2  ;;  %v400_v27 = vand.u32 15, %v198_v59 }
 0x153   : > { %5446 = vmatmul.msk.bf16.gmra.mxu0 %vm9702_vm4, %v6359_v24  ;;  %v1241_v39 = vpack.c.bf16 %v1205_v19, %v1205_v19  ;;  %vm9706_vm4 = vmmov %vm9701_vm2 }
 0x154   : > { %v6902_v12 = vadd.f32 %v2289_v34, %v2224_v20  ;;  %5421 = vmatmul.msk.bf16.gmra.mxu3 %vm9700_vm13, %v6343_v23  ;;  %v1240_v34 = vpack.c.bf16 %v6355_v17, %v6355_v17  ;;  %v1874_v35 = vpop.f32.mrf.mxu2  ;;  %vm6924_vm13 = vcmp.eq.s32.totalorder %v400_v27, 15  ;;  %vm9708_vm15 = vmmov %vm9701_vm2  ;;  %v200_v27 = vadd.s32 232, %v6017_v6 }
 0x155   : > { %v1945_v48 = vadd.f32 %v1874_v35, %v6701_v18  ;;  %v1767_v5 = vunpack.c.l.b16 %v1241_v39  ;;  %v9703_v18 = vmov 0  ;;  %v9710_v35 = vld [vmem:[#allocation53_spill] sm:$0xff] }
 0x156   : > { %v1766_v61 = vunpack.c.l.b16 %v1240_v34  ;;  %v9704_v18 = vsel %vm6924_vm13, 4294967295, %v9703_v18 }
 0x157   : > { %v2010_v47 = vpop.f32.mrf.mxu3  ;;  %v2294_v0 = vpop.f32.mrf.mxu1  ;;  %9705 = vst [vmem:[#allocation104_spill] sm:$0xff] %v9704_v18 }
 0x158   : > { %v2084_v13 = vadd.f32 %v2010_v47, %v1943_v42  ;;  %v2158_v50 = vpop.f32.mrf.mxu0  ;;  %v6919_v2 = vpack.c.b16 %v1767_v5, %v1766_v61 }
 0x15a   : > { %v2225_v54 = vadd.f32 %v2151_v29, %v2084_v13  ;;  %v9707_v13 = vld [vmem:[#allocation59_spill] sm:$0xff] }
 0x15c   : > { %v6917_v53 = vadd.f32 %v2292_v62, %v2225_v54  ;;  %v1876_v17 = vpop.f32.mrf.mxu2  ;;  %v919_v62 = vld [vmem:[#allocation2 + $0xda] sm:$0xff]  ;;  %v9709_v54 = vld [vmem:[#allocation54_spill] sm:$0xff] }
 0x15d   : > { %v1946_v29 = vadd.f32 %v1876_v17, %v6722_v8 }
 0x15f   : > { %v2012_v42 = vpop.f32.mrf.mxu3  ;;  %v2297_v40 = vpop.f32.mrf.mxu1 }
 0x160   : > { %v2085_v20 = vadd.f32 %v2012_v42, %v1944_v10  ;;  %v2161_v10 = vpop.f32.mrf.mxu0 }
 0x161   : > { %5399 = vmatmul.msk.bf16.gmra.mxu2 %vm9708_vm15, %v6919_v2  ;;  %vm9712_vm15 = vmmov %vm9701_vm2 }
 0x162   : > { %v2226_v47 = vadd.f32 %v2153_v58, %v2085_v20  ;;  %5470 = vmatmul.msk.bf16.gmra.mxu1 %vm9701_vm2, %v6919_v2  ;;  %v1207_v58 = vsel %vm6924_vm13, %v9707_v13, %v919_v62  ;;  %v6944_v20 = vld [vmem:[%s6028_s24 + $0x100] sm:$0xff] }
 0x163   : > { %5447 = vmatmul.msk.bf16.gmra.mxu0 %vm9701_vm2, %v9709_v54  ;;  %v1243_v59 = vpack.c.bf16 %v1207_v58, %v1207_v58  ;;  %9711 = vst [vmem:[#allocation59_spill] sm:$0xff] %v6944_v20 }
 0x164   : > { %v6928_v19 = vadd.f32 %v2294_v0, %v2226_v47  ;;  %5422 = vmatmul.msk.bf16.gmra.mxu3 %vm9706_vm4, %v6415_v38  ;;  %v1242_v0 = vpack.c.bf16 %v9710_v35, %v9710_v35  ;;  %v1879_v5 = vpop.f32.mrf.mxu2  ;;  %852 = vst.msk [vmem:[#allocation2 + $0x101] sm:$0xff] %vm9712_vm15, %v6944_v20  ;;  %vm9713_vm4 = vmmov %vm9701_vm2 }
 0x165   : > { %v1947_v42 = vadd.f32 %v1879_v5, %v6729_v52  ;;  %v1769_v62 = vunpack.c.l.b16 %v1243_v59  ;;  %v9717_v59 = vld [vmem:[#allocation60_spill] sm:$0xff]  ;;  %vm9718_vm15 = vmmov %vm9713_vm4 }
 0x166   : > { %v1768_v17 = vunpack.c.l.b16 %v1242_v0  ;;  %vm9720_vm13 = vmmov %vm9713_vm4 }
 0x167   : > { %v2015_v8 = vpop.f32.mrf.mxu3  ;;  %v2299_v39 = vpop.f32.mrf.mxu1 }
 0x168   : > { %v2086_v34 = vadd.f32 %v2015_v8, %v1945_v48  ;;  %v2163_v48 = vpop.f32.mrf.mxu0  ;;  %v414_v8 = vand.u32 15, %v200_v27 }
 0x16a   : > { %v2227_v61 = vadd.f32 %v2156_v60, %v2086_v34  ;;  %v6950_v34 = vpack.c.b16 %v1769_v62, %v1768_v17  ;;  %vm6955_vm2 = vcmp.eq.s32.totalorder %v414_v8, 15  ;;  %v9725_v8 = vld [vmem:[#allocation63_spill] sm:$0xff] }
 0x16c   : > { %v6946_v47 = vadd.f32 %v2297_v40, %v2227_v61  ;;  %v1881_v35 = vpop.f32.mrf.mxu2  ;;  %v9714_v40 = vmov 0  ;;  %v921_v61 = vld [vmem:[#allocation2 + $0xea] sm:$0xff] }
 0x16d   : > { %v1948_v5 = vadd.f32 %v1881_v35, %v6750_v11  ;;  %v9715_v40 = vsel %vm6955_vm2, 4294967295, %v9714_v40  ;;  %v9721_v11 = vld [vmem:[#allocation66_spill] sm:$0xff] }
 0x16e   : > { %9716 = vst [vmem:[#allocation53_spill] sm:$0xff] %v9715_v40 }
 0x16f   : > { %v2017_v13 = vpop.f32.mrf.mxu3  ;;  %v2302_v60 = vpop.f32.mrf.mxu1 }
 0x170   : > { %v2087_v58 = vadd.f32 %v2017_v13, %v1946_v29  ;;  %v6964_v29 = vld [vmem:[%s6028_s24 + $0x108] sm:$0xff]  ;;  %v2166_v27 = vpop.f32.mrf.mxu0  ;;  %v9723_v13 = vld [vmem:[#allocation64_spill] sm:$0xff] }
 0x171   : > { %9719 = vst [vmem:[#allocation60_spill] sm:$0xff] %v6964_v29  ;;  %5400 = vmatmul.msk.bf16.gmra.mxu2 %vm9713_vm4, %v6950_v34 }
 0x172   : > { %v2228_v52 = vadd.f32 %v2158_v50, %v2087_v58  ;;  %5471 = vmatmul.msk.bf16.gmra.mxu1 %vm9713_vm4, %v6950_v34  ;;  %853 = vst.msk [vmem:[#allocation2 + $0x109] sm:$0xff] %vm9720_vm13, %v6964_v29  ;;  %v1209_v50 = vsel %vm6955_vm2, %v9721_v11, %v921_v61  ;;  %v1244_v58 = vpack.c.bf16 %v9725_v8, %v9725_v8  ;;  %v202_v61 = vadd.s32 248, %v6017_v6  ;;  %vm9728_vm13 = vmmov %vm9713_vm4 }
 0x173   : > { %vm9734_vm2 = vmmov %vm9713_vm4 }
 0x174   : > { %v6959_v0 = vadd.f32 %v2299_v39, %v2228_v52  ;;  %5423 = vmatmul.msk.bf16.gmra.mxu3 %vm9718_vm15, %v9717_v59  ;;  %vm9724_vm15 = vmmov %vm9713_vm4  ;;  %v1245_v52 = vpack.c.bf16 %v1209_v50, %v1209_v50  ;;  %v1884_v18 = vpop.f32.mrf.mxu2  ;;  %v1770_v4 = vunpack.c.l.b16 %v1244_v58  ;;  %v428_v54 = vand.u32 15, %v202_v61  ;;  %v923_v58 = vld [vmem:[#allocation2 + $0xfa] sm:$0xff] }
 0x175   : > { %5448 = vmatmul.msk.bf16.gmra.mxu0 %vm9724_vm15, %v9723_v13  ;;  %v1949_v40 = vadd.f32 %v1884_v18, %v6757_v1 }
 0x176   : > { %vm6995_vm15 = vcmp.eq.s32.totalorder %v428_v54, 15  ;;  %v9738_v54 = vld [vmem:[#allocation70_spill] sm:$0xff] }
 0x177   : > { %v2020_v17 = vpop.f32.mrf.mxu3  ;;  %v6973_v62 = vpop.f32.mrf.mxu1 }
 0x178   : > { %v2088_v39 = vadd.f32 %v2020_v17, %v1947_v42  ;;  %9722 = vst [vmem:[#allocation66_spill] sm:$0xff] %v6973_v62  ;;  %v2168_v44 = vpop.f32.mrf.mxu0  ;;  %v1771_v42 = vunpack.c.l.b16 %v1245_v52  ;;  %v6984_v17 = vld [vmem:[%s6028_s24 + $0x110] sm:$0xff] }
 0x179   : > { %9727 = vst [vmem:[#allocation105_spill] sm:$0xff] %v6984_v17 }
 0x17a   : > { %v2229_v35 = vadd.f32 %v2161_v10, %v2088_v39  ;;  %854 = vst.msk [vmem:[#allocation2 + $0x111] sm:$0xff] %vm9728_vm13, %v6984_v17  ;;  %v6988_v10 = vpack.c.b16 %v1771_v42, %v1770_v4  ;;  %vm9736_vm13 = vmmov %vm9734_vm2 }
 0x17c   : > { %v6981_v11 = vadd.f32 %v2302_v60, %v2229_v35  ;;  %9729 = vst [vmem:[#allocation106_spill] sm:$0xff] %v6988_v10  ;;  %v1886_v1 = vpop.f32.mrf.mxu2  ;;  %v9731_v60 = vmov 0  ;;  %v9740_v35 = vld [vmem:[#allocation69_spill] sm:$0xff] }
 0x17d   : > { %v1950_v18 = vadd.f32 %v1886_v1, %v6778_v14  ;;  %v9732_v60 = vsel %vm6995_vm15, 4294967295, %v9731_v60  ;;  %v1246_v61 = vpack.c.bf16 %v9740_v35, %v9740_v35 }
 0x17e   : > { %9726 = vst [vmem:[#allocation63_spill] sm:$0xff] %v6981_v11 }
 0x17f   : > { %v2022_v62 = vpop.f32.mrf.mxu3  ;;  %v2307_v50 = vpop.f32.mrf.mxu1  ;;  %9733 = vst [vmem:[#allocation108_spill] sm:$0xff] %v9732_v60  ;;  %v1772_v17 = vunpack.c.l.b16 %v1246_v61  ;;  %v9744_v61 = vmov 0 }
 0x180   : > { %v2089_v8 = vadd.f32 %v2022_v62, %v1948_v5  ;;  %v2171_v5 = vpop.f32.mrf.mxu0  ;;  %v9735_v62 = vld [vmem:[#allocation72_spill] sm:$0xff] }
 0x181   : > { %v1211_v4 = vsel %vm6995_vm15, %v9735_v62, %v923_v58  ;;  %5401 = vmatmul.msk.bf16.gmra.mxu2 %vm9736_vm13, %v6988_v10  ;;  %v203_v58 = vadd.s32 256, %v6017_v6 }
 0x182   : > { %v6990_v39 = vadd.f32 %v2163_v48, %v2089_v8  ;;  %5472 = vmatmul.msk.bf16.gmra.mxu1 %vm9713_vm4, %v6988_v10  ;;  %vm9739_vm4 = vmmov %vm9734_vm2  ;;  %v1247_v42 = vpack.c.bf16 %v1211_v4, %v1211_v4  ;;  %v204_v8 = vadd.s32 264, %v6017_v6 }
 0x183   : > { %vm9747_vm15 = vmmov %vm9739_vm4 }
 0x184   : > { %9730 = vst [vmem:[#allocation107_spill] sm:$0xff] %v6990_v39  ;;  %5424 = vmatmul.msk.bf16.gmra.mxu3 %vm9734_vm2, %v6535_v28  ;;  %v1889_v39 = vpop.f32.mrf.mxu2  ;;  %v1773_v35 = vunpack.c.l.b16 %v1247_v42  ;;  %v442_v4 = vand.u32 15, %v204_v8  ;;  %v888_v42 = vld [vmem:[#allocation2 + $0x100] sm:$0xff]  ;;  %vm9748_vm6 = vmmov %vm9739_vm4 }
 0x185   : > { %5449 = vmatmul.msk.bf16.gmra.mxu0 %vm9739_vm4, %v9738_v54  ;;  %v1951_v62 = vadd.f32 %v1889_v39, %v6788_v43  ;;  %v435_v54 = vand.u32 15, %v203_v58  ;;  %v9741_v43 = vmov 0  ;;  %v924_v8 = vld [vmem:[#allocation2 + $0x102] sm:$0xff] }
 0x186   : > { %v7021_v10 = vpack.c.b16 %v1773_v35, %v1772_v17  ;;  %vm7023_vm2 = vcmp.eq.s32.totalorder %v442_v4, 15  ;;  %v889_v17 = vld [vmem:[#allocation2 + $0x108] sm:$0xff] }
 0x187   : > { %v2025_v48 = vpop.f32.mrf.mxu3  ;;  %v7006_v52 = vpop.f32.mrf.mxu1  ;;  %v9742_v43 = vsel %vm7023_vm2, 4294967295, %v9741_v43  ;;  %vm7029_vm13 = vcmp.eq.s32.totalorder %v435_v54, 0 }
 0x188   : > { %v2090_v14 = vadd.f32 %v2025_v48, %v1949_v40  ;;  %9737 = vst [vmem:[#allocation72_spill] sm:$0xff] %v7006_v52  ;;  %v1104_v40 = vpack.c.bf16 %v6944_v20, %v6944_v20  ;;  %v1105_v48 = vpack.c.bf16 %v6964_v29, %v6964_v29  ;;  %v2173_v52 = vpop.f32.mrf.mxu0  ;;  %v9745_v61 = vsel %vm7029_vm13, 4294967295, %v9744_v61 }
 0x189   : > { %9743 = vst [vmem:[#allocation69_spill] sm:$0xff] %v9742_v43  ;;  %v1032_v58 = vsel %vm7029_vm13, %v924_v8, %v888_v42  ;;  %vm9753_vm13 = vmmov %vm9739_vm4 }
 0x18a   : > { %v2231_v1 = vadd.f32 %v2166_v27, %v2090_v14  ;;  %v2114_v11 = vunpack.c.l.b16 %v1104_v40  ;;  %v2115_v6 = vunpack.c.l.b16 %v1105_v48  ;;  %9746 = vst [vmem:[#allocation109_spill] sm:$0xff] %v9745_v61 }
 0x18c   : > { %v7015_v60 = vadd.f32 %v2307_v50, %v2231_v1  ;;  %v925_v50 = vld [vmem:[#allocation2 + $0x10a] sm:$0xff]  ;;  %v1891_v1 = vpop.f32.mrf.mxu2 }
 0x18f   : > { %v2027_v13 = vpop.f32.mrf.mxu3  ;;  %v2312_v14 = vpop.f32.mrf.mxu1 }
 0x190   : > { %v2091_v27 = vadd.f32 %v2027_v13, %v1950_v18  ;;  %v1952_v13 = vadd.f32 %v1891_v1, %v6811_v45  ;;  %v7038_v18 = vpack.c.b16 %v2115_v6, %v2114_v11  ;;  %v2176_v54 = vpop.f32.mrf.mxu0  ;;  %v1248_v45 = vpack.c.bf16 %v924_v8, %v924_v8 }
 0x191   : > { %5402 = vmatmul.msk.bf16.gmra.mxu2 %vm9748_vm6, %v7021_v10  ;;  %v1069_v1 = vpack.c.bf16 %v889_v17, %v889_v17  ;;  %vm9751_vm6 = vmmov %vm9739_vm4 }
 0x192   : > { %v7027_v39 = vadd.f32 %v2168_v44, %v2091_v27  ;;  %5473 = vmatmul.msk.bf16.gmra.mxu1 %vm9739_vm4, %v7021_v10  ;;  %v1213_v44 = vsel %vm7023_vm2, %v889_v17, %v925_v50  ;;  %v1068_v27 = vpack.c.bf16 %v1032_v58, %v1032_v58  ;;  %v2255_v20 = vunpack.c.l.b16 %v1248_v45 }
 0x193   : > { %v1249_v48 = vpack.c.bf16 %v1213_v44, %v1213_v44  ;;  %v1974_v43 = vunpack.c.l.b16 %v1069_v1 }
 0x194   : > { %5425 = vmatmul.msk.bf16.gmra.mxu3 %vm9747_vm15, %v6602_v15  ;;  %vm9750_vm15 = vmmov %vm9739_vm4  ;;  %v1894_v11 = vpop.f32.mrf.mxu2  ;;  %v1973_v61 = vunpack.c.l.b16 %v1068_v27 }
 0x195   : > { %5450 = vmatmul.msk.bf16.gmra.mxu0 %vm9750_vm15, %v7038_v18  ;;  %v1953_v50 = vadd.f32 %v1894_v11, %v6819_v16  ;;  %v2256_v42 = vunpack.c.l.b16 %v1249_v48  ;;  %vm9752_vm15 = vmmov %vm9739_vm4 }
 0x196   : > { %v7055_v58 = vpack.c.b16 %v1974_v43, %v1973_v61 }
 0x197   : > { %v2030_v40 = vpop.f32.mrf.mxu3  ;;  %v7046_v4 = vpop.f32.mrf.mxu1 }
 0x198   : > { %v2092_v35 = vadd.f32 %v2030_v40, %v1951_v62  ;;  %9749 = vst [vmem:[#allocation110_spill] sm:$0xff] %v7046_v4  ;;  %v2178_v8 = vpop.f32.mrf.mxu0  ;;  %v7053_v62 = vpack.c.b16 %v2256_v42, %v2255_v20 }
 0x19a   : > { %v2233_v6 = vadd.f32 %v2171_v5, %v2092_v35 }
 0x19c   : > { %v7051_v29 = vadd.f32 %v2312_v14, %v2233_v6  ;;  %v1896_v5 = vpop.f32.mrf.mxu2 }
 0x19d   : > { %v1954_v35 = vadd.f32 %v1896_v5, %v6839_v37 }
 0x19f   : > { %v2032_v44 = vpop.f32.mrf.mxu3  ;;  %v2317_v17 = vpop.f32.mrf.mxu1 }
 0x1a0   : > { %v2093_v40 = vadd.f32 %v2032_v44, %v1952_v13  ;;  %v2181_v16 = vpop.f32.mrf.mxu0 }
 0x1a1   : > { %5483 = vmatmul.msk.bf16.vlgmr.msra.gmra.mxu2 %vm9752_vm15, %v6263_v57  ;;  %vm9758_vm15 = vmmov %vm9739_vm4 }
 0x1a2   : > { %v7057_v4 = vadd.f32 %v2173_v52, %v2093_v40  ;;  %5474 = vmatmul.msk.bf16.gmra.mxu1 %vm9751_vm6, %v7053_v62  ;;  %vm9754_vm6 = vmmov %vm9739_vm4 }
 0x1a4   : > { %5426 = vmatmul.msk.bf16.gmra.mxu3 %vm9739_vm4, %v7055_v58  ;;  %v1899_v61 = vpop.f32.mrf.mxu2 }
 0x1a5   : > { %5531 = vmatmul.msk.bf16.vlgmr.msra.gmra.mxu0 %vm9753_vm13, %v6647_v33  ;;  %v1955_v37 = vadd.f32 %v1899_v61, %v6634_v26  ;;  %vm9755_vm13 = vmmov %vm9739_vm4 }
 0x1a7   : > { %v2035_v14 = vpop.f32.mrf.mxu3  ;;  %v7066_v43 = vpop.f32.mrf.mxu1 }
 0x1a8   : > { %v2094_v20 = vadd.f32 %v2035_v14, %v1953_v50  ;;  %v2183_v45 = vpop.f32.mrf.mxu0  ;;  %v9756_v14 = vld [vmem:[#allocation78_spill] sm:$0xff] }
 0x1aa   : > { %v2235_v52 = vadd.f32 %v2176_v54, %v2094_v20  ;;  %v9757_v20 = vld [vmem:[#allocation39_spill] sm:$0xff] }
 0x1ac   : > { %v7071_v13 = vadd.f32 %v2317_v17, %v2235_v52  ;;  %v1901_v11 = vpop.f32.mrf.mxu2 }
 0x1ad   : > { %v1956_v57 = vadd.f32 %v1901_v11, %v6643_v49 }
 0x1af   : > { %v2037_v48 = vpop.f32.mrf.mxu3  ;;  %v2322_v1 = vpop.f32.mrf.mxu1 }
 0x1b0   : > { %v2095_v27 = vadd.f32 %v2037_v48, %v1954_v35  ;;  %v2186_v50 = vpop.f32.mrf.mxu0 }
 0x1b1   : > { %5484 = vmatmul.msk.bf16.gmra.mxu2 %vm9755_vm13, %v6341_v9  ;;  %vm9760_vm13 = vmmov %vm9739_vm4 }
 0x1b2   : > { %v7073_v6 = vadd.f32 %v2178_v8, %v2095_v27 }
 0x1b4   : > { %5507 = vmatmul.msk.bf16.vlgmr.msra.gmra.mxu3 %vm9754_vm6, %v6213_v3  ;;  %v1904_v42 = vpop.f32.mrf.mxu2  ;;  %vm9759_vm6 = vmmov %vm9739_vm4 }
 0x1b5   : > { %5532 = vmatmul.msk.bf16.gmra.mxu0 %vm9739_vm4, %v6675_v46  ;;  %v1957_v8 = vadd.f32 %v1904_v42, %v6662_v31  ;;  %v9762_v42 = vld [vmem:[#allocation81_spill] sm:$0xff] }
 0x1b7   : > { %v2040_v33 = vpop.f32.mrf.mxu3  ;;  %v7083_v44 = vpop.f32.mrf.mxu1 }
 0x1b8   : > { %v2096_v26 = vadd.f32 %v2040_v33, %v1955_v37  ;;  %v2188_v49 = vpop.f32.mrf.mxu0 }
 0x1ba   : > { %v2237_v54 = vadd.f32 %v2181_v16, %v2096_v26 }
 0x1bc   : > { %v7085_v40 = vadd.f32 %v2322_v1, %v2237_v54  ;;  %v1906_v35 = vpop.f32.mrf.mxu2 }
 0x1bd   : > { %v1958_v9 = vadd.f32 %v1906_v35, %v9756_v14 }
 0x1bf   : > { %v2042_v17 = vpop.f32.mrf.mxu3  ;;  %v2327_v46 = vpop.f32.mrf.mxu1 }
 0x1c0   : > { %v2097_v3 = vadd.f32 %v2042_v17, %v1956_v57  ;;  %v2191_v16 = vpop.f32.mrf.mxu0 }
 0x1c1   : > { %5485 = vmatmul.msk.bf16.gmra.mxu2 %vm9759_vm6, %v6413_v7  ;;  %vm9765_vm6 = vmmov %vm9739_vm4 }
 0x1c2   : > { %v7087_v5 = vadd.f32 %v2183_v45, %v2097_v3  ;;  %v9761_v45 = vld [vmem:[#allocation80_spill] sm:$0xff] }
 0x1c4   : > { %5508 = vmatmul.msk.bf16.gmra.mxu3 %vm9758_vm15, %v9757_v20  ;;  %v1909_v37 = vpop.f32.mrf.mxu2  ;;  %vm9764_vm15 = vmmov %vm9739_vm4 }
 0x1c5   : > { %5533 = vmatmul.msk.bf16.gmra.mxu0 %vm9760_vm13, %v6703_v22  ;;  %v1959_v48 = vadd.f32 %v1909_v37, %v9761_v45  ;;  %v9767_v45 = vld [vmem:[#allocation84_spill] sm:$0xff]  ;;  %vm9769_vm13 = vmmov %vm9739_vm4 }
 0x1c7   : > { %v2045_v52 = vpop.f32.mrf.mxu3  ;;  %v7099_v57 = vpop.f32.mrf.mxu1 }
 0x1c8   : > { %v2098_v31 = vadd.f32 %v2045_v52, %v1957_v8  ;;  %v2193_v1 = vpop.f32.mrf.mxu0  ;;  %v9763_v8 = vld [vmem:[#allocation46_spill] sm:$0xff] }
 0x1ca   : > { %v2239_v61 = vadd.f32 %v2186_v50, %v2098_v31 }
 0x1cc   : > { %v7097_v27 = vadd.f32 %v2327_v46, %v2239_v61  ;;  %v1911_v54 = vpop.f32.mrf.mxu2 }
 0x1cd   : > { %v1960_v7 = vadd.f32 %v1911_v54, %v9762_v42 }
 0x1cf   : > { %v2047_v11 = vpop.f32.mrf.mxu3  ;;  %v2332_v3 = vpop.f32.mrf.mxu1 }
 0x1d0   : > { %v2099_v33 = vadd.f32 %v2047_v11, %v1958_v9  ;;  %v2196_v22 = vpop.f32.mrf.mxu0 }
 0x1d1   : > { %5486 = vmatmul.msk.bf16.gmra.mxu2 %vm9764_vm15, %v6480_v36  ;;  %v9768_v36 = vld [vmem:[#allocation55_spill] sm:$0xff]  ;;  %vm9771_vm15 = vmmov %vm9739_vm4 }
 0x1d2   : > { %v7101_v26 = vadd.f32 %v2188_v49, %v2099_v33  ;;  %v9766_v49 = vld [vmem:[#allocation83_spill] sm:$0xff]  ;;  %v9770_v33 = vld [vmem:[#allocation88_spill] sm:$0xff] }
 0x1d4   : > { %5509 = vmatmul.msk.bf16.gmra.mxu3 %vm9739_vm4, %v9763_v8  ;;  %v1914_v14 = vpop.f32.mrf.mxu2 }
 0x1d5   : > { %5534 = vmatmul.msk.bf16.gmra.mxu0 %vm9765_vm6, %v6731_v21  ;;  %v1961_v9 = vadd.f32 %v1914_v14, %v9766_v49  ;;  %v9773_v14 = vld [vmem:[#allocation87_spill] sm:$0xff]  ;;  %vm9775_vm6 = vmmov %vm9739_vm4 }
 0x1d7   : > { %v2050_v50 = vpop.f32.mrf.mxu3 }
 0x1d8   : > { %v2100_v17 = vadd.f32 %v2050_v50, %v1959_v48  ;;  %v2198_v46 = vpop.f32.mrf.mxu0 }
 0x1da   : > { %v2241_v35 = vadd.f32 %v2191_v16, %v2100_v17 }
 0x1dc   : > { %v7111_v20 = vadd.f32 %v2332_v3, %v2241_v35  ;;  %v1916_v37 = vpop.f32.mrf.mxu2 }
 0x1dd   : > { %v1962_v11 = vadd.f32 %v1916_v37, %v9767_v45  ;;  %v9778_v37 = vld [vmem:[#allocation92_spill] sm:$0xff] }
 0x1df   : > { %v2052_v52 = vpop.f32.mrf.mxu3 }
 0x1e0   : > { %v2101_v31 = vadd.f32 %v2052_v52, %v1960_v7  ;;  %v2201_v48 = vpop.f32.mrf.mxu0  ;;  %v9774_v52 = vld [vmem:[#allocation65_spill] sm:$0xff] }
 0x1e1   : > { %5487 = vmatmul.msk.bf16.gmra.mxu2 %vm9739_vm4, %v6533_v32 }
 0x1e2   : > { %v7113_v61 = vadd.f32 %v2193_v1, %v2101_v31  ;;  %v9772_v1 = vld [vmem:[#allocation86_spill] sm:$0xff] }
 0x1e3   : > { %v9776_v31 = vld [vmem:[#allocation74_spill] sm:$0xff] }
 0x1e4   : > { %5510 = vmatmul.msk.bf16.gmra.mxu3 %vm9769_vm13, %v9768_v36  ;;  %v1919_v42 = vpop.f32.mrf.mxu2  ;;  %vm9777_vm13 = vmmov %vm9739_vm4 }
 0x1e5   : > { %5535 = vmatmul.msk.bf16.gmra.mxu0 %vm9771_vm15, %v9770_v33  ;;  %v1963_v7 = vadd.f32 %v1919_v42, %v9772_v1  ;;  %vm9782_vm15 = vmmov %vm9739_vm4 }
 0x1e7   : > { %v2055_v21 = vpop.f32.mrf.mxu3 }
 0x1e8   : > { %v2102_v16 = vadd.f32 %v2055_v21, %v1961_v9  ;;  %v2203_v8 = vpop.f32.mrf.mxu0 }
 0x1ea   : > { %v7122_v54 = vadd.f32 %v2196_v22, %v2102_v16 }
 0x1ec   : > { %v1921_v35 = vpop.f32.mrf.mxu2 }
 0x1ed   : > { %v1964_v49 = vadd.f32 %v1921_v35, %v9773_v14  ;;  %v9781_v35 = vld [vmem:[#allocation71_spill] sm:$0xff] }
 0x1ef   : > { %v2057_v50 = vpop.f32.mrf.mxu3 }
 0x1f0   : > { %v2103_v17 = vadd.f32 %v2057_v50, %v1962_v11  ;;  %v9780_v50 = vld [vmem:[#allocation91_spill] sm:$0xff] }
 0x1f1   : > { %5488 = vmatmul.msk.bf16.gmra.mxu2 %vm9777_vm13, %v9776_v31  ;;  %vm9786_vm13 = vmmov %vm9739_vm4 }
 0x1f2   : > { %v7125_v3 = vadd.f32 %v2198_v46, %v2103_v17  ;;  %v2206_v32 = vpop.f32.mrf.mxu0  ;;  %v9779_v46 = vld [vmem:[#allocation90_spill] sm:$0xff] }
 0x1f4   : > { %5511 = vmatmul.msk.bf16.gmra.mxu3 %vm9775_vm6, %v9774_v52  ;;  %v1924_v11 = vpop.f32.mrf.mxu2  ;;  %v9783_v52 = vld [vmem:[#allocation22_spill] sm:$0xff]  ;;  %vm9784_vm6 = vmmov %vm9739_vm4 }
 0x1f5   : > { %5536 = vmatmul.msk.bf16.gmra.mxu0 %vm9739_vm4, %v9778_v37  ;;  %v1965_v36 = vadd.f32 %v1924_v11, %v9779_v46 }
 0x1f7   : > { %v2060_v9 = vpop.f32.mrf.mxu3 }
 0x1f8   : > { %v2104_v22 = vadd.f32 %v2060_v9, %v1963_v7  ;;  %v9785_v9 = vld [vmem:[#allocation96_spill] sm:$0xff] }
 0x1fa   : > { %v7134_v45 = vadd.f32 %v2201_v48, %v2104_v22  ;;  %v2208_v21 = vpop.f32.mrf.mxu0 }
 0x1fc   : > { %v1926_v1 = vpop.f32.mrf.mxu2 }
 0x1fd   : > { %v1966_v17 = vadd.f32 %v1926_v1, %v9780_v50  ;;  %v9790_v1 = vld [vmem:[#allocation95_spill] sm:$0xff] }
 0x1ff   : > { %v2062_v16 = vpop.f32.mrf.mxu3 }
 0x200   : > { %v2105_v33 = vadd.f32 %v2062_v16, %v1964_v49 }
 0x201   : > { %5489 = vmatmul.msk.bf16.gmra.mxu2 %vm9784_vm6, %v9783_v52  ;;  %v9792_v52 = vld [vmem:[#allocation29_spill] sm:$0xff]  ;;  %vm9795_vm6 = vmmov %vm9739_vm4 }
 0x202   : > { %v7137_v42 = vadd.f32 %v2203_v8, %v2105_v33  ;;  %v2211_v7 = vpop.f32.mrf.mxu0  ;;  %v9788_v8 = vld [vmem:[#allocation94_spill] sm:$0xff] }
 0x204   : > { %5512 = vmatmul.msk.bf16.gmra.mxu3 %vm9782_vm15, %v9781_v35  ;;  %v1929_v49 = vpop.f32.mrf.mxu2  ;;  %v9791_v35 = vld [vmem:[#allocation12_spill] sm:$0xff]  ;;  %vm9793_vm15 = vmmov %vm9739_vm4 }
 0x205   : > { %5537 = vmatmul.msk.bf16.gmra.mxu0 %vm9786_vm13, %v9785_v9  ;;  %v1967_v22 = vadd.f32 %v1929_v49, %v9788_v8  ;;  %vm9801_vm13 = vmmov %vm9739_vm4 }
 0x207   : > { %v2065_v14 = vpop.f32.mrf.mxu3 }
 0x208   : > { %v2106_v48 = vadd.f32 %v2065_v14, %v1965_v36 }
 0x20a   : > { %v7146_v31 = vadd.f32 %v2206_v32, %v2106_v48  ;;  %v2213_v37 = vpop.f32.mrf.mxu0  ;;  %v9794_v48 = vld [vmem:[#allocation100_spill] sm:$0xff] }
 0x20c   : > { %9787 = vst [vmem:[#allocation78_spill] sm:$0xff] %v7146_v31  ;;  %v1931_v33 = vpop.f32.mrf.mxu2  ;;  %v9800_v31 = vld [vmem:[#allocation24_spill] sm:$0xff] }
 0x20d   : > { %v1968_v50 = vadd.f32 %v1931_v33, %v9790_v1 }
 0x20f   : > { %v2067_v11 = vpop.f32.mrf.mxu3 }
 0x210   : > { %v2107_v46 = vadd.f32 %v2067_v11, %v1966_v17 }
 0x211   : > { %5490 = vmatmul.msk.bf16.gmra.mxu2 %vm9793_vm15, %v9792_v52  ;;  %vm9802_vm15 = vmmov %vm9739_vm4 }
 0x212   : > { %v7149_v16 = vadd.f32 %v2208_v21, %v2107_v46  ;;  %v2216_v36 = vpop.f32.mrf.mxu0  ;;  %v9797_v21 = vld [vmem:[#allocation98_spill] sm:$0xff] }
 0x214   : > { %9789 = vst [vmem:[#allocation39_spill] sm:$0xff] %v7149_v16  ;;  %5513 = vmatmul.msk.bf16.gmra.mxu3 %vm9739_vm4, %v9791_v35  ;;  %v1934_v17 = vpop.f32.mrf.mxu2  ;;  %v9799_v35 = vld [vmem:[#allocation99_spill] sm:$0xff] }
 0x215   : > { %5538 = vmatmul.msk.bf16.gmra.mxu0 %vm9795_vm6, %v9794_v48  ;;  %v1969_v49 = vadd.f32 %v1934_v17, %v9797_v21  ;;  %vm9806_vm6 = vmmov %vm9739_vm4 }
 0x217   : > { %v2070_v14 = vpop.f32.mrf.mxu3 }
 0x218   : > { %v2108_v32 = vadd.f32 %v2070_v14, %v1967_v22 }
 0x21a   : > { %v7158_v9 = vadd.f32 %v2211_v7, %v2108_v32  ;;  %v2218_v8 = vpop.f32.mrf.mxu0 }
 0x21c   : > { %9796 = vst [vmem:[#allocation80_spill] sm:$0xff] %v7158_v9  ;;  %v1936_v1 = vpop.f32.mrf.mxu2 }
 0x21d   : > { %v1970_v16 = vadd.f32 %v1936_v1, %v9799_v35 }
 0x21f   : > { %v2072_v11 = vpop.f32.mrf.mxu3 }
 0x220   : > { %v2109_v46 = vadd.f32 %v2072_v11, %v1968_v50 }
 0x221   : > { %5491 = vmatmul.msk.bf16.gmra.mxu2 %vm9739_vm4, %v6265_v63 }
 0x222   : > { %v7161_v33 = vadd.f32 %v2213_v37, %v2109_v46  ;;  %v2705_v22 = vpop.f32.mrf.mxu0  ;;  %v9805_v46 = vld [vmem:[#allocation32_spill] sm:$0xff] }
 0x224   : > { %9798 = vst [vmem:[#allocation81_spill] sm:$0xff] %v7161_v33  ;;  %5514 = vmatmul.msk.bf16.gmra.mxu3 %vm9801_vm13, %v9800_v31  ;;  %v2423_v50 = vpop.f32.mrf.mxu2  ;;  %vm9807_vm13 = vmmov %vm9739_vm4 }
 0x225   : > { %5539 = vmatmul.msk.bf16.gmra.mxu0 %vm9802_vm15, %v6867_v55  ;;  %v2503_v37 = vadd.f32 %v2423_v50, %v6865_v56  ;;  %vm9810_vm15 = vmmov %vm9739_vm4 }
 0x227   : > { %v2075_v14 = vpop.f32.mrf.mxu3 }
 0x228   : > { %v2110_v7 = vadd.f32 %v2075_v14, %v1969_v49 }
 0x22a   : > { %v7170_v52 = vadd.f32 %v2216_v36, %v2110_v7  ;;  %v2707_v32 = vpop.f32.mrf.mxu0 }
 0x22c   : > { %9803 = vst [vmem:[#allocation46_spill] sm:$0xff] %v7170_v52  ;;  %v2425_v31 = vpop.f32.mrf.mxu2 }
 0x22d   : > { %v2504_v11 = vadd.f32 %v2425_v31, %v6876_v25 }
 0x22f   : > { %v2077_v48 = vpop.f32.mrf.mxu3 }
 0x230   : > { %v2111_v17 = vadd.f32 %v2077_v48, %v1970_v16 }
 0x231   : > { %5492 = vmatmul.msk.bf16.gmra.mxu2 %vm9807_vm13, %v6343_v23  ;;  %vm9812_vm13 = vmmov %vm9739_vm4 }
 0x232   : > { %v7173_v21 = vadd.f32 %v2218_v8, %v2111_v17  ;;  %v2710_v63 = vpop.f32.mrf.mxu0 }
 0x234   : > { %9804 = vst [vmem:[#allocation83_spill] sm:$0xff] %v7173_v21  ;;  %5515 = vmatmul.msk.bf16.gmra.mxu3 %vm9806_vm6, %v9805_v46  ;;  %v2428_v16 = vpop.f32.mrf.mxu2  ;;  %vm9811_vm6 = vmmov %vm9739_vm4 }
 0x235   : > { %5540 = vmatmul.msk.bf16.gmra.mxu0 %vm9739_vm4, %v6893_v30  ;;  %v2505_v36 = vadd.f32 %v2428_v16, %v6891_v51 }
 0x237   : > { %v2564_v49 = vpop.f32.mrf.mxu3 }
 0x238   : > { %v2644_v55 = vadd.f32 %v2564_v49, %v2503_v37 }
 0x23a   : > { %v7182_v56 = vadd.f32 %v2705_v22, %v2644_v55  ;;  %v2712_v8 = vpop.f32.mrf.mxu0 }
 0x23c   : > { %9808 = vst [vmem:[#allocation84_spill] sm:$0xff] %v7182_v56  ;;  %v2430_v14 = vpop.f32.mrf.mxu2 }
 0x23d   : > { %v2506_v7 = vadd.f32 %v2430_v14, %v6902_v12 }
 0x23f   : > { %v2566_v1 = vpop.f32.mrf.mxu3 }
 0x240   : > { %v2645_v25 = vadd.f32 %v2566_v1, %v2504_v11 }
 0x241   : > { %5493 = vmatmul.msk.bf16.gmra.mxu2 %vm9811_vm6, %v6415_v38  ;;  %vm9816_vm6 = vmmov %vm9739_vm4 }
 0x242   : > { %v7185_v35 = vadd.f32 %v2707_v32, %v2645_v25  ;;  %v2715_v23 = vpop.f32.mrf.mxu0  ;;  %v9820_v25 = vld [vmem:[#allocation106_spill] sm:$0xff] }
 0x244   : > { %9809 = vst [vmem:[#allocation55_spill] sm:$0xff] %v7185_v35  ;;  %5516 = vmatmul.msk.bf16.gmra.mxu3 %vm9810_vm15, %v6281_v41  ;;  %v2433_v22 = vpop.f32.mrf.mxu2  ;;  %vm9815_vm15 = vmmov %vm9739_vm4 }
 0x245   : > { %5541 = vmatmul.msk.bf16.gmra.mxu0 %vm9812_vm13, %v6919_v2  ;;  %v2507_v37 = vadd.f32 %v2433_v22, %v6917_v53  ;;  %vm9819_vm13 = vmmov %vm9739_vm4 }
 0x247   : > { %v2569_v50 = vpop.f32.mrf.mxu3 }
 0x248   : > { %v2646_v30 = vadd.f32 %v2569_v50, %v2505_v36  ;;  %v7222_v50 = vld [vmem:[%s6028_s24 + $0x118] sm:$0xff] }
 0x24a   : > { %v7194_v51 = vadd.f32 %v2710_v63, %v2646_v30  ;;  %v2717_v32 = vpop.f32.mrf.mxu0 }
 0x24c   : > { %9813 = vst [vmem:[#allocation88_spill] sm:$0xff] %v7194_v51  ;;  %v2435_v41 = vpop.f32.mrf.mxu2 }
 0x24d   : > { %v2508_v31 = vadd.f32 %v2435_v41, %v6928_v19 }
 0x24f   : > { %v2571_v48 = vpop.f32.mrf.mxu3 }
 0x250   : > { %v2647_v12 = vadd.f32 %v2571_v48, %v2506_v7  ;;  %v9822_v7 = vld [vmem:[#allocation63_spill] sm:$0xff] }
 0x251   : > { %5494 = vmatmul.msk.bf16.gmra.mxu2 %vm9815_vm15, %v9717_v59  ;;  %vm9821_vm15 = vmmov %vm9739_vm4 }
 0x252   : > { %v7197_v17 = vadd.f32 %v2712_v8, %v2647_v12  ;;  %v2720_v38 = vpop.f32.mrf.mxu0  ;;  %v9818_v8 = vld [vmem:[#allocation54_spill] sm:$0xff] }
 0x254   : > { %9814 = vst [vmem:[#allocation86_spill] sm:$0xff] %v7197_v17  ;;  %5517 = vmatmul.msk.bf16.gmra.mxu3 %vm9739_vm4, %v6359_v24  ;;  %v2438_v46 = vpop.f32.mrf.mxu2 }
 0x255   : > { %5542 = vmatmul.msk.bf16.gmra.mxu0 %vm9816_vm6, %v6950_v34  ;;  %v2509_v63 = vadd.f32 %v2438_v46, %v6946_v47  ;;  %vm9823_vm6 = vmmov %vm9739_vm4  ;;  %v9827_v46 = vld [vmem:[#allocation6_spill] sm:$0xff] }
 0x256   : > { %855 = vst.msk [vmem:[#allocation2 + $0x119] sm:$0xff] %vm9823_vm6, %v7222_v50  ;;  %vm9829_vm6 = vmmov %vm9739_vm4 }
 0x257   : > { %v2574_v11 = vpop.f32.mrf.mxu3  ;;  %vm9837_vm2 = vmmov %vm9829_vm6 }
 0x258   : > { %v2648_v2 = vadd.f32 %v2574_v11, %v2507_v37 }
 0x25a   : > { %v7206_v53 = vadd.f32 %v2715_v23, %v2648_v2  ;;  %v2722_v49 = vpop.f32.mrf.mxu0 }
 0x25c   : > { %9817 = vst [vmem:[#allocation87_spill] sm:$0xff] %v7206_v53  ;;  %v2440_v24 = vpop.f32.mrf.mxu2 }
 0x25d   : > { %v2510_v36 = vadd.f32 %v2440_v24, %v6959_v0 }
 0x25f   : > { %v2576_v19 = vpop.f32.mrf.mxu3 }
 0x260   : > { %v2649_v55 = vadd.f32 %v2576_v19, %v2508_v31 }
 0x261   : > { %5495 = vmatmul.msk.bf16.gmra.mxu2 %vm9739_vm4, %v6535_v28 }
 0x262   : > { %v7209_v16 = vadd.f32 %v2717_v32, %v2649_v55  ;;  %v2725_v59 = vpop.f32.mrf.mxu0  ;;  %v9824_v32 = vld [vmem:[#allocation64_spill] sm:$0xff] }
 0x264   : > { %5518 = vmatmul.msk.bf16.gmra.mxu3 %vm9819_vm13, %v9818_v8  ;;  %v2443_v14 = vpop.f32.mrf.mxu2  ;;  %vm9825_vm13 = vmmov %vm9739_vm4  ;;  %v9830_v8 = vmov 0 }
 0x265   : > { %5543 = vmatmul.msk.bf16.gmra.mxu0 %vm9821_vm15, %v9820_v25  ;;  %v2511_v23 = vadd.f32 %v2443_v14, %v9822_v7  ;;  %vm9826_vm15 = vmmov %vm9739_vm4  ;;  %v891_v7 = vld [vmem:[#allocation2 + $0x118] sm:$0xff] }
 0x267   : > { %v2579_v1 = vpop.f32.mrf.mxu3 }
 0x268   : > { %v2650_v34 = vadd.f32 %v2579_v1, %v2509_v63  ;;  %v205_v63 = vadd.s32 272, %v9827_v46  ;;  %v9833_v1 = vmov 0 }
 0x26a   : > { %v7218_v47 = vadd.f32 %v2720_v38, %v2650_v34  ;;  %v7226_v0 = vpop.f32.mrf.mxu0  ;;  %v449_v55 = vand.u32 15, %v205_v63  ;;  %v927_v34 = vld [vmem:[#allocation2 + $0x11a] sm:$0xff] }
 0x26c   : > { %v7230_v28 = vpop.f32.mrf.mxu2 }
 0x26f   : > { %v2581_v30 = vpop.f32.mrf.mxu3 }
 0x270   : > { %v2651_v22 = vadd.f32 %v2581_v30, %v2510_v36  ;;  %v9828_v36 = vld [vmem:[#allocation70_spill] sm:$0xff] }
 0x271   : > { %5496 = vmatmul.msk.bf16.gmra.mxu2 %vm9739_vm4, %v6602_v15 }
 0x272   : > { %v7228_v37 = vadd.f32 %v2722_v49, %v2651_v22  ;;  %v2730_v48 = vpop.f32.mrf.mxu0  ;;  %v206_v49 = vadd.s32 280, %v9827_v46 }
 0x274   : > { %5519 = vmatmul.msk.bf16.gmra.mxu3 %vm9825_vm13, %v9824_v32  ;;  %v2448_v38 = vpop.f32.mrf.mxu2  ;;  %v456_v15 = vand.u32 15, %v206_v49  ;;  %vm7251_vm13 = vcmp.eq.s32.totalorder %v449_v55, 0 }
 0x275   : > { %5544 = vmatmul.msk.bf16.gmra.mxu0 %vm9826_vm15, %v7021_v10  ;;  %v2513_v11 = vadd.f32 %v2448_v38, %v7015_v60  ;;  %v9831_v8 = vsel %vm7251_vm13, 4294967295, %v9830_v8  ;;  %v890_v60 = vld [vmem:[#allocation2 + $0x110] sm:$0xff]  ;;  %vm9836_vm15 = vmmov %vm9829_vm6  ;;  %v1071_v38 = vpack.c.bf16 %v891_v7, %v891_v7 }
 0x276   : > { %9832 = vst [vmem:[#allocation65_spill] sm:$0xff] %v9831_v8  ;;  %vm7255_vm4 = vcmp.eq.s32.totalorder %v456_v15, 15 }
 0x277   : > { %v2584_v12 = vpop.f32.mrf.mxu3  ;;  %v9834_v1 = vsel %vm7255_vm4, 4294967295, %v9833_v1  ;;  %v1215_v30 = vsel %vm7255_vm4, %v891_v7, %v927_v34  ;;  %v2397_v49 = vunpack.c.l.b16 %v1071_v38  ;;  %vm9910_vm4 = vmmov %vm9837_vm2 }
 0x278   : > { %v2652_v41 = vadd.f32 %v2584_v12, %v2511_v23  ;;  %9835 = vst [vmem:[#allocation74_spill] sm:$0xff] %v9834_v1 }
 0x27a   : > { %v7238_v31 = vadd.f32 %v2725_v59, %v2652_v41  ;;  %v7241_v2 = vpop.f32.mrf.mxu0  ;;  %v926_v59 = vld [vmem:[#allocation2 + $0x112] sm:$0xff] }
 0x27b   : > { %v1034_v23 = vsel %vm7251_vm13, %v926_v59, %v890_v60  ;;  %v1250_v46 = vpack.c.bf16 %v926_v59, %v926_v59  ;;  %v5789_v59 = vld [vmem:[%s9329_s2 + $0x18] sm:$0xff]  ;;  %vm9848_vm13 = vmmov %vm9837_vm2 }
 0x27c   : > { %v7247_v24 = vpop.f32.mrf.mxu2  ;;  %v1070_v41 = vpack.c.bf16 %v1034_v23, %v1034_v23  ;;  %3525 = vmatpush.bf16.msra.mxu1 %v5789_v59  ;;  %v1107_v23 = vpack.c.bf16 %v7222_v50, %v7222_v50 }
 0x27d   : > { %v2678_v55 = vunpack.c.l.b16 %v1250_v46 }
 0x27e   : > { %v2538_v38 = vunpack.c.l.b16 %v1107_v23 }
 0x27f   : > { %v7245_v19 = vpop.f32.mrf.mxu3 }
 0x281   : > { %5497 = vmatmul.msk.bf16.gmra.mxu2 %vm9836_vm15, %v7055_v58  ;;  %v1251_v58 = vpack.c.bf16 %v1215_v30, %v1215_v30  ;;  %vm9840_vm15 = vmmov %vm9837_vm2 }
 0x282   : > { %v2735_v10 = vpop.f32.mrf.mxu0 }
 0x283   : > { %v2679_v15 = vunpack.c.l.b16 %v1251_v58 }
 0x284   : > { %5520 = vmatmul.msk.bf16.gmra.mxu3 %vm9829_vm6, %v9828_v36  ;;  %v2453_v32 = vpop.f32.mrf.mxu2  ;;  %vm9838_vm6 = vmmov %vm9837_vm2 }
 0x285   : > { %5545 = vmatmul.msk.bf16.gmra.mxu0 %vm9837_vm2, %v7053_v62  ;;  %v2515_v12 = vadd.f32 %v2453_v32, %v7051_v29  ;;  %v2396_v62 = vunpack.c.l.b16 %v1070_v41 }
 0x287   : > { %v2589_v25 = vpop.f32.mrf.mxu3  ;;  %v2398_v60 = vpack.c.b16 %v2397_v49, %v2396_v62 }
 0x288   : > { %v2654_v14 = vadd.f32 %v2589_v25, %v2513_v11 }
 0x28a   : > { %v7267_v22 = vadd.f32 %v2730_v48, %v2654_v14  ;;  %v7270_v11 = vpop.f32.mrf.mxu0  ;;  %v2680_v48 = vpack.c.b16 %v2679_v15, %v2678_v55  ;;  %v9839_v14 = vld [vmem:[#allocation105_spill] sm:$0xff] }
 0x28b   : > { %v1106_v7 = vpack.c.bf16 %v9839_v14, %v9839_v14 }
 0x28c   : > { %v7274_v36 = vpop.f32.mrf.mxu2 }
 0x28d   : > { %v2537_v41 = vunpack.c.l.b16 %v1106_v7 }
 0x28f   : > { %v7272_v63 = vpop.f32.mrf.mxu3 }
 0x291   : > { %5498 = vmatmul.msk.bf16.gmra.mxu2 %vm9838_vm6, %v2398_v60  ;;  %vm9843_vm6 = vmmov %vm9837_vm2 }
 0x292   : > { %v2740_v29 = vpop.f32.mrf.mxu0 }
 0x294   : > { %5521 = vmatmul.msk.bf16.gmra.mxu3 %vm9837_vm2, %v7038_v18  ;;  %v2458_v30 = vpop.f32.mrf.mxu2 }
 0x295   : > { %5546 = vmatmul.msk.bf16.gmra.mxu0 %vm9840_vm15, %v2680_v48  ;;  %v2517_v32 = vadd.f32 %v2458_v30, %v7071_v13  ;;  %vm9844_vm15 = vmmov %vm9837_vm2 }
 0x297   : > { %v2594_v34 = vpop.f32.mrf.mxu3 }
 0x298   : > { %v2656_v25 = vadd.f32 %v2594_v34, %v2515_v12  ;;  %v2539_v12 = vpack.c.b16 %v2538_v38, %v2537_v41 }
 0x29a   : > { %v7287_v18 = vadd.f32 %v2735_v10, %v2656_v25  ;;  %v7290_v46 = vpop.f32.mrf.mxu0 }
 0x29c   : > { %v7294_v62 = vpop.f32.mrf.mxu2 }
 0x29f   : > { %v7292_v58 = vpop.f32.mrf.mxu3 }
 0x2a2   : > { %v2745_v49 = vpop.f32.mrf.mxu0 }
 0x2a4   : > { %5522 = vmatmul.msk.bf16.gmra.mxu3 %vm9837_vm2, %v2539_v12  ;;  %v2463_v10 = vpop.f32.mrf.mxu2 }
 0x2a5   : > { %v2519_v60 = vadd.f32 %v2463_v10, %v7085_v40  ;;  %v7315_v40 = vpop.f32.mrf.mxu1 }
 0x2a7   : > { %v2599_v50 = vpop.f32.mrf.mxu3 }
 0x2a8   : > { %v2658_v55 = vadd.f32 %v2599_v50, %v2517_v32 }
 0x2aa   : > { %v7297_v15 = vadd.f32 %v2740_v29, %v2658_v55  ;;  %v7300_v13 = vpop.f32.mrf.mxu0 }
 0x2ac   : > { %v7304_v59 = vpop.f32.mrf.mxu2 }
 0x2af   : > { %v7302_v48 = vpop.f32.mrf.mxu3 }
 0x2b2   : > { %v2750_v34 = vpop.f32.mrf.mxu0 }
 0x2b4   : > { %v2468_v23 = vpop.f32.mrf.mxu2 }
 0x2b5   : > { %v2521_v30 = vadd.f32 %v2468_v23, %v7097_v27 }
 0x2b7   : > { %v2604_v25 = vpop.f32.mrf.mxu3 }
 0x2b8   : > { %v2660_v14 = vadd.f32 %v2604_v25, %v2519_v60  ;;  %v7322_v25 = vpop.f32.mrf.mxu1 }
 0x2ba   : > { %v7306_v7 = vadd.f32 %v2745_v49, %v2660_v14  ;;  %v7309_v32 = vpop.f32.mrf.mxu0 }
 0x2bc   : > { %v7313_v41 = vpop.f32.mrf.mxu2 }
 0x2bf   : > { %v7311_v29 = vpop.f32.mrf.mxu3 }
 0x2c0   : > { %v7330_v21 = vpop.f32.mrf.mxu1 }
 0x2c2   : > { %v2755_v38 = vpop.f32.mrf.mxu0 }
 0x2c4   : > { %v2473_v10 = vpop.f32.mrf.mxu2 }
 0x2c5   : > { %v2523_v49 = vadd.f32 %v2473_v10, %v7111_v20  ;;  %v2818_v20 = vsel %vm9843_vm6, %v7185_v35, 0.0  ;;  %v2820_v10 = vsel %vm9837_vm2, %v7194_v51, 0.0  ;;  %vm9849_vm6 = vmmov %vm9837_vm2 }
 0x2c7   : > { %v2609_v12 = vpop.f32.mrf.mxu3 }
 0x2c8   : > { %v2662_v50 = vadd.f32 %v2609_v12, %v2521_v30  ;;  %v7352_v35 = vpop.f32.mrf.mxu1 }
 0x2ca   : > { %v7317_v55 = vadd.f32 %v2750_v34, %v2662_v50  ;;  %v7320_v60 = vpop.f32.mrf.mxu0  ;;  %v2817_v50 = vsel %vm9844_vm15, %v7182_v56, 0.0  ;;  %v2824_v56 = vsel %vm9849_vm6, %v7206_v53, 0.0  ;;  %vm9851_vm15 = vmmov %vm9837_vm2 }
 0x2cb   : > { %v2819_v52 = vadd.f32 %v2818_v20, %v2817_v50  ;;  %v9850_v20 = vld [vmem:[#allocation72_spill] sm:$0xff]  ;;  %vm9854_vm6 = vmmov %vm9837_vm2 }
 0x2cc   : > { %v7326_v14 = vpop.f32.mrf.mxu2  ;;  %v2373_v50 = vadd.f32 %v9850_v20, %v7027_v39  ;;  %v2830_v39 = vsel %vm9837_vm2, %v7228_v37, 0.0  ;;  %v2377_v20 = vadd.f32 %v7066_v43, %v7073_v6 }
 0x2cf   : > { %v7324_v27 = vpop.f32.mrf.mxu3 }
 0x2d2   : > { %v7328_v8 = vpop.f32.mrf.mxu0 }
 0x2d3   : > { %9841 = vst [vmem:[#allocation92_spill] sm:$0xff] %v7328_v8  ;;  %v2821_v8 = vadd.f32 %v2820_v10, %v2819_v52  ;;  %v2514_v10 = vadd.f32 %v7247_v24, %v2373_v50  ;;  %v2832_v24 = vsel %vm9854_vm6, %v7238_v31, 0.0  ;;  %vm9857_vm6 = vmmov %vm9837_vm2 }
 0x2d4   : > { %v7334_v34 = vpop.f32.mrf.mxu2 }
 0x2d7   : > { %v2614_v23 = vpop.f32.mrf.mxu3 }
 0x2d8   : > { %v2664_v1 = vadd.f32 %v2614_v23, %v2523_v49  ;;  %v9846_v49 = vld [vmem:[#allocation107_spill] sm:$0xff]  ;;  %v9847_v23 = vld [vmem:[#allocation66_spill] sm:$0xff] }
 0x2da   : > { %v7332_v30 = vadd.f32 %v2755_v38, %v2664_v1  ;;  %v7344_v33 = vpop.f32.mrf.mxu0  ;;  %v2371_v1 = vadd.f32 %v9847_v23, %v9846_v49  ;;  %v2822_v38 = vsel %vm9848_vm13, %v7197_v17, 0.0  ;;  %v2826_v49 = vsel %vm9851_vm15, %v7209_v16, 0.0  ;;  %vm9852_vm13 = vmmov %vm9837_vm2 }
 0x2db   : > { %9845 = vst [vmem:[#allocation91_spill] sm:$0xff] %v7344_v33  ;;  %v2823_v51 = vadd.f32 %v2822_v38, %v2821_v8  ;;  %v2828_v52 = vsel %vm9852_vm13, %v7218_v47, 0.0  ;;  %v2344_v38 = vpop.f32.mrf.mxu1  ;;  %vm9855_vm15 = vmmov %vm9837_vm2 }
 0x2dc   : > { %9842 = vst [vmem:[#allocation90_spill] sm:$0xff] %v7332_v30  ;;  %v7350_v9 = vpop.f32.mrf.mxu2  ;;  %v2512_v30 = vadd.f32 %v7230_v28, %v2371_v1  ;;  %v9853_v28 = vld [vmem:[#allocation110_spill] sm:$0xff]  ;;  %vm9856_vm13 = vmmov %vm9837_vm2 }
 0x2dd   : > { %v2825_v17 = vadd.f32 %v2824_v56, %v2823_v51  ;;  %v2375_v8 = vadd.f32 %v9853_v28, %v7057_v4 }
 0x2de   : > { %v2653_v23 = vadd.f32 %v7245_v19, %v2512_v30  ;;  %v2655_v19 = vadd.f32 %v7272_v63, %v2514_v10  ;;  %v2379_v10 = vadd.f32 %v7083_v44, %v7087_v5  ;;  %v2381_v44 = vadd.f32 %v7099_v57, %v7101_v26 }
 0x2df   : > { %v7338_v12 = vpop.f32.mrf.mxu3  ;;  %v2827_v53 = vadd.f32 %v2826_v49, %v2825_v17  ;;  %v2516_v17 = vadd.f32 %v7274_v36, %v2375_v8  ;;  %v2518_v36 = vadd.f32 %v7294_v62, %v2377_v20  ;;  %v2840_v8 = vsel %vm9857_vm6, %v7287_v18, 0.0  ;;  %vm9860_vm6 = vmmov %vm9837_vm2 }
 0x2e0   : > { %v7372_v1 = vadd.f32 %v7226_v0, %v2653_v23  ;;  %v7387_v63 = vadd.f32 %v7241_v2, %v2655_v19  ;;  %v2836_v23 = vsel %vm9856_vm13, %v7267_v22, 0.0  ;;  %vm9859_vm13 = vmmov %vm9837_vm2  ;;  %v2383_v57 = vadd.f32 %v7315_v40, %v7113_v61 }
 0x2e1   : > { %v2829_v51 = vadd.f32 %v2828_v52, %v2827_v53  ;;  %v2657_v53 = vadd.f32 %v7292_v58, %v2516_v17  ;;  %v2659_v2 = vadd.f32 %v7302_v48, %v2518_v36  ;;  %v2385_v61 = vadd.f32 %v7330_v21, %v7125_v3 }
 0x2e2   : > { %v7377_v30 = vpop.f32.mrf.mxu0  ;;  %v2834_v0 = vsel %vm9855_vm15, %v7372_v1, 0.0  ;;  %v2838_v43 = vsel %vm9837_vm2, %v7387_v63, 0.0  ;;  %vm9858_vm15 = vmmov %vm9837_vm2 }
 0x2e3   : > { %v2831_v4 = vadd.f32 %v2830_v39, %v2829_v51  ;;  %v7398_v6 = vadd.f32 %v7270_v11, %v2657_v53  ;;  %v2520_v39 = vadd.f32 %v7304_v59, %v2379_v10  ;;  %v7409_v11 = vadd.f32 %v7290_v46, %v2659_v2  ;;  %v2347_v51 = vpop.f32.mrf.mxu1 }
 0x2e4   : > { %v7375_v56 = vpop.f32.mrf.mxu2  ;;  %v2522_v59 = vadd.f32 %v7313_v41, %v2381_v44  ;;  %v2848_v41 = vsel %vm9860_vm6, %v7306_v7, 0.0  ;;  %v2526_v21 = vadd.f32 %v7350_v9, %v2385_v61  ;;  %v9864_v9 = vld [vmem:[#allocation90_spill] sm:$0xff]  ;;  %vm9865_vm6 = vmmov %vm9837_vm2 }
 0x2e5   : > { %v2833_v50 = vadd.f32 %v2832_v24, %v2831_v4  ;;  %v2842_v5 = vsel %vm9858_vm15, %v7398_v6, 0.0  ;;  %v2661_v48 = vadd.f32 %v7311_v29, %v2520_v39  ;;  %v2844_v4 = vsel %vm9859_vm13, %v7297_v15, 0.0  ;;  %vm9861_vm15 = vmmov %vm9837_vm2 }
 0x2e6   : > { %v2846_v26 = vsel %vm9837_vm2, %v7409_v11, 0.0  ;;  %v2663_v29 = vadd.f32 %v7324_v27, %v2522_v59  ;;  %vm9862_vm13 = vmmov %vm9837_vm2 }
 0x2e7   : > { %v7362_v33 = vpop.f32.mrf.mxu3  ;;  %v2835_v52 = vadd.f32 %v2834_v0, %v2833_v50  ;;  %v7420_v46 = vadd.f32 %v7300_v13, %v2661_v48  ;;  %v2384_v50 = vadd.f32 %v7322_v25, %v7122_v54  ;;  %v2852_v3 = vsel %vm9862_vm13, %v7317_v55, 0.0  ;;  %vm9869_vm13 = vmmov %vm9837_vm2 }
 0x2e8   : > { %v7433_v36 = vadd.f32 %v7309_v32, %v2663_v29  ;;  %v2387_v32 = vadd.f32 %v2344_v38, %v7137_v42 }
 0x2e9   : > { %v2837_v28 = vadd.f32 %v2836_v23, %v2835_v52  ;;  %v2524_v23 = vadd.f32 %v7326_v14, %v2383_v57  ;;  %v2850_v13 = vsel %vm9861_vm15, %v7420_v46, 0.0  ;;  %v2525_v27 = vadd.f32 %v7334_v34, %v2384_v50  ;;  %vm9867_vm15 = vmmov %vm9837_vm2 }
 0x2ea   : > { %v2767_v19 = vpop.f32.mrf.mxu0  ;;  %v2386_v14 = vadd.f32 %v7352_v35, %v7134_v45  ;;  %v2854_v34 = vsel %vm9837_vm2, %v7433_v36, 0.0  ;;  %v9863_v35 = vld [vmem:[#allocation78_spill] sm:$0xff] }
 0x2eb   : > { %v2839_v62 = vadd.f32 %v2838_v43, %v2837_v28  ;;  %v2665_v52 = vadd.f32 %v7338_v12, %v2524_v23  ;;  %v2666_v43 = vadd.f32 %v7362_v33, %v2525_v27  ;;  %v2349_v2 = vpop.f32.mrf.mxu1  ;;  %v2388_v39 = vadd.f32 %v2347_v51, %v9863_v35 }
 0x2ec   : > { %v2485_v58 = vpop.f32.mrf.mxu2  ;;  %v2856_v33 = vsel %vm9865_vm6, %v9864_v9, 0.0  ;;  %vm9871_vm6 = vmmov %vm9837_vm2 }
 0x2ed   : > { %v2841_v24 = vadd.f32 %v2840_v8, %v2839_v62  ;;  %v7447_v12 = vadd.f32 %v7320_v60, %v2665_v52  ;;  %v2527_v8 = vadd.f32 %v7375_v56, %v2386_v14  ;;  %v2528_v38 = vadd.f32 %v2485_v58, %v2387_v32 }
 0x2ef   : > { %v2621_v49 = vpop.f32.mrf.mxu3  ;;  %v2843_v20 = vadd.f32 %v2842_v5, %v2841_v24  ;;  %v9866_v5 = vld [vmem:[#allocation92_spill] sm:$0xff]  ;;  %v2858_v60 = vsel %vm9867_vm15, %v7447_v12, 0.0  ;;  %vm9872_vm15 = vmmov %vm9837_vm2 }
 0x2f0   : > { %v2667_v45 = vadd.f32 %v2621_v49, %v2526_v21  ;;  %v7454_v42 = vadd.f32 %v9866_v5, %v2666_v43  ;;  %v9875_v5 = vld [vmem:[#allocation81_spill] sm:$0xff] }
 0x2f1   : > { %v2845_v53 = vadd.f32 %v2844_v4, %v2843_v20  ;;  %v9868_v4 = vld [vmem:[#allocation91_spill] sm:$0xff] }
 0x2f2   : > { %v2770_v10 = vpop.f32.mrf.mxu0  ;;  %v7459_v59 = vadd.f32 %v9868_v4, %v2667_v45  ;;  %v2860_v57 = vsel %vm9869_vm13, %v7454_v42, 0.0  ;;  %vm9873_vm13 = vmmov %vm9837_vm2 }
 0x2f3   : > { %v2847_v40 = vadd.f32 %v2846_v26, %v2845_v53 }
 0x2f4   : > { %v2488_v0 = vpop.f32.mrf.mxu2  ;;  %v2862_v53 = vsel %vm9837_vm2, %v7459_v59, 0.0 }
 0x2f5   : > { %v2849_v54 = vadd.f32 %v2848_v41, %v2847_v40  ;;  %v2529_v56 = vadd.f32 %v2488_v0, %v2388_v39  ;;  %v2352_v41 = vpop.f32.mrf.mxu1  ;;  %v9870_v0 = vld [vmem:[#allocation39_spill] sm:$0xff] }
 0x2f6   : > { %v2389_v61 = vadd.f32 %v2349_v2, %v9870_v0 }
 0x2f7   : > { %v2624_v17 = vpop.f32.mrf.mxu3  ;;  %v2851_v28 = vadd.f32 %v2850_v13, %v2849_v54 }
 0x2f8   : > { %v2668_v48 = vadd.f32 %v2624_v17, %v2527_v8 }
 0x2f9   : > { %v2853_v62 = vadd.f32 %v2852_v3, %v2851_v28  ;;  %v9874_v28 = vld [vmem:[#allocation80_spill] sm:$0xff] }
 0x2fa   : > { %v7464_v26 = vadd.f32 %v7377_v30, %v2668_v48  ;;  %v2772_v17 = vpop.f32.mrf.mxu0 }
 0x2fb   : > { %v2855_v24 = vadd.f32 %v2854_v34, %v2853_v62  ;;  %v2390_v34 = vadd.f32 %v2352_v41, %v9874_v28 }
 0x2fc   : > { %v2490_v44 = vpop.f32.mrf.mxu2  ;;  %v2864_v40 = vsel %vm9871_vm6, %v7464_v26, 0.0  ;;  %vm9876_vm6 = vmmov %vm9837_vm2 }
 0x2fd   : > { %v2857_v51 = vadd.f32 %v2856_v33, %v2855_v24  ;;  %v2530_v54 = vadd.f32 %v2490_v44, %v2389_v61  ;;  %v2354_v8 = vpop.f32.mrf.mxu1 }
 0x2ff   : > { %v2626_v25 = vpop.f32.mrf.mxu3  ;;  %v2859_v58 = vadd.f32 %v2858_v60, %v2857_v51 }
 0x300   : > { %v2669_v49 = vadd.f32 %v2626_v25, %v2528_v38  ;;  %v2391_v38 = vadd.f32 %v2354_v8, %v9875_v5 }
 0x301   : > { %v2861_v23 = vadd.f32 %v2860_v57, %v2859_v58 }
 0x302   : > { %v7468_v50 = vadd.f32 %v2767_v19, %v2669_v49  ;;  %v2775_v2 = vpop.f32.mrf.mxu0 }
 0x303   : > { %v2863_v27 = vadd.f32 %v2862_v53, %v2861_v23 }
 0x304   : > { %v2493_v30 = vpop.f32.mrf.mxu2  ;;  %v2866_v52 = vsel %vm9872_vm15, %v7468_v50, 0.0  ;;  %vm9878_vm15 = vmmov %vm9837_vm2 }
 0x305   : > { %v2865_v25 = vadd.f32 %v2864_v40, %v2863_v27  ;;  %v2531_v35 = vadd.f32 %v2493_v30, %v2390_v34 }
 0x307   : > { %v2629_v20 = vpop.f32.mrf.mxu3  ;;  %v2867_v21 = vadd.f32 %v2866_v52, %v2865_v25  ;;  %v5929_v52 = vmov 256.0  }
 0x308   : > { %v2670_v29 = vadd.f32 %v2629_v20, %v2529_v56  ;;  %v2357_v56 = vpop.f32.mrf.mxu1  ;;  %5852 = vrcp.f32 %v5929_v52 }
 0x30a   : > { %v7473_v13 = vadd.f32 %v2770_v10, %v2670_v29  ;;  %v2777_v60 = vpop.f32.mrf.mxu0  ;;  %v9877_v29 = vld [vmem:[#allocation46_spill] sm:$0xff] }
 0x30b   : > { %v2392_v58 = vadd.f32 %v2357_v56, %v9877_v29 }
 0x30c   : > { %v2868_v19 = vsel %vm9873_vm13, %v7473_v13, 0.0  ;;  %v2495_v39 = vpop.f32.mrf.mxu2  ;;  %vm9880_vm13 = vmmov %vm9837_vm2 }
 0x30d   : > { %v2869_v32 = vadd.f32 %v2868_v19, %v2867_v21  ;;  %v2532_v4 = vadd.f32 %v2495_v39, %v2391_v38 }
 0x30f   : > { %v2631_v14 = vpop.f32.mrf.mxu3 }
 0x310   : > { %v2671_v3 = vadd.f32 %v2631_v14, %v2530_v54  ;;  %v2359_v40 = vpop.f32.mrf.mxu1  ;;  %v9879_v54 = vld [vmem:[#allocation83_spill] sm:$0xff] }
 0x311   : > { %v2393_v25 = vadd.f32 %v2359_v40, %v9879_v54 }
 0x312   : > { %v2812_v43 = vadd.f32 %v2772_v17, %v2671_v3  ;;  %v2780_v23 = vpop.f32.mrf.mxu0 }
 0x314   : > { %v2870_v10 = vsel %vm9837_vm2, %v2812_v43, 0.0  ;;  %v2498_v20 = vpop.f32.mrf.mxu2 }
 0x315   : > { %v2871_v45 = vadd.f32 %v2870_v10, %v2869_v32  ;;  %v2533_v41 = vadd.f32 %v2498_v20, %v2392_v58 }
 0x317   : > { %v2634_v62 = vpop.f32.mrf.mxu3 }
 0x318   : > { %v2672_v44 = vadd.f32 %v2634_v62, %v2531_v35 }
 0x31a   : > { %v2813_v33 = vadd.f32 %v2775_v2, %v2672_v44  ;;  %v5853_v2 = vpop.eup %5852  ;;  %v2782_v28 = vpop.f32.mrf.mxu0 }
 0x31b   : > { %v2887_v8 = vmul.f32 256.0, %v5853_v2 }
 0x31c   : > { %v2872_v48 = vsel %vm9876_vm6, %v2813_v33, 0.0  ;;  %v2500_v30 = vpop.f32.mrf.mxu2  ;;  %vm2891_vm6 = vweird.f32 %v5853_v2 }
 0x31d   : > { %v2873_v24 = vadd.f32 %v2872_v48, %v2871_v45  ;;  %v2534_v3 = vadd.f32 %v2500_v30, %v2393_v25  ;;  %v2888_v39 = vsub.f32 1.0, %v2887_v8 }
 0x31f   : > { %v2636_v49 = vpop.f32.mrf.mxu3  ;;  %v2889_v5 = vmul.f32 %v5853_v2, %v2888_v39 }
 0x320   : > { %v2673_v51 = vadd.f32 %v2636_v49, %v2532_v4 }
 0x322   : > { %v2814_v57 = vadd.f32 %v2777_v60, %v2673_v51 }
 0x324   : > { %v2874_v17 = vsel %vm9878_vm15, %v2814_v57, 0.0  ;;  %vm9887_vm15 = vmmov %vm9837_vm2 }
 0x325   : > { %v2875_v53 = vadd.f32 %v2874_v17, %v2873_v24  ;;  %v2890_v24 = vadd.f32 %v5853_v2, %v2889_v5 }
 0x327   : > { %v2639_v0 = vpop.f32.mrf.mxu3  ;;  %v7488_v4 = vsel %vm2891_vm6, %v5853_v2, %v2890_v24  ;;  %vm9889_vm6 = vmmov %vm9837_vm2 }
 0x328   : > { %v2674_v61 = vadd.f32 %v2639_v0, %v2533_v41  ;;  %9881 = vst [vmem:[#allocation71_spill] sm:$0xff] %v7488_v4 }
 0x32a   : > { %v2815_v27 = vadd.f32 %v2780_v23, %v2674_v61 }
 0x32c   : > { %v2876_v14 = vsel %vm9880_vm13, %v2815_v27, 0.0  ;;  %vm9888_vm13 = vmmov %vm9837_vm2 }
 0x32d   : > { %v2877_v19 = vadd.f32 %v2876_v14, %v2875_v53  ;;  %v9882_v53 = vld [vmem:[#allocation84_spill] sm:$0xff] }
 0x32f   : > { %v2641_v21 = vpop.f32.mrf.mxu3 }
 0x330   : > { %v2675_v32 = vadd.f32 %v2641_v21, %v2534_v3 }
 0x332   : > { %v2816_v34 = vadd.f32 %v2782_v28, %v2675_v32 }
 0x334   : > { %v2878_v10 = vsel %vm9837_vm2, %v2816_v34, 0.0 }
 0x335   : > { %v2879_v45 = vadd.f32 %v2878_v10, %v2877_v19 }
 0x337   : > { %v2880_v35 = vrot.slane %v2879_v45, 4 }
 0x339   : > { %v2881_v62 = vadd.f32 %v2880_v35, %v2879_v45 }
 0x33b   : > { %v2882_v44 = vrot.slane %v2881_v62, 2 }
 0x33d   : > { %v2883_v38 = vadd.f32 %v2882_v44, %v2881_v62 }
 0x33f   : > { %v2884_v48 = vrot.slane %v2883_v38, 1 }
 0x341   : > { %v2885_v60 = vadd.f32 %v2884_v48, %v2883_v38 }
 0x343   : > { %v7491_v56 = vmul.f32 %v7488_v4, %v2885_v60 }
 0x345   : > { %v7495_v49 = vsub.f32 %v7473_v13, %v7491_v56  ;;  %v7498_v51 = vsub.f32 %v2812_v43, %v7491_v56  ;;  %v7501_v20 = vsub.f32 %v2813_v33, %v7491_v56  ;;  %v7504_v29 = vsub.f32 %v2814_v57, %v7491_v56  ;;  %v9883_v13 = vld [vmem:[#allocation55_spill] sm:$0xff]  ;;  %v9884_v33 = vld [vmem:[#allocation88_spill] sm:$0xff]  ;;  %v9885_v57 = vld [vmem:[#allocation86_spill] sm:$0xff] }
 0x346   : > { %v7507_v58 = vsub.f32 %v2815_v27, %v7491_v56  ;;  %v7510_v17 = vsub.f32 %v2816_v34, %v7491_v56  ;;  %v7514_v41 = vsub.f32 %v9882_v53, %v7491_v56  ;;  %v7518_v43 = vsub.f32 %v9883_v13, %v7491_v56  ;;  %v9886_v27 = vld [vmem:[#allocation87_spill] sm:$0xff] }
 0x347   : > { %v7522_v23 = vsub.f32 %v9884_v33, %v7491_v56  ;;  %v7526_v0 = vsub.f32 %v9885_v57, %v7491_v56  ;;  %v7534_v30 = vsub.f32 %v9886_v27, %v7491_v56  ;;  %v7540_v54 = vsub.f32 %v7209_v16, %v7491_v56 }
 0x348   : > { %v2926_v61 = vmul.f32 %v7514_v41, %v7514_v41  ;;  %v2927_v40 = vmul.f32 %v7518_v43, %v7518_v43  ;;  %v7548_v21 = vsub.f32 %v7218_v47, %v7491_v56  ;;  %v7555_v16 = vsub.f32 %v7228_v37, %v7491_v56 }
 0x349   : > { %v2928_v52 = vmul.f32 %v7522_v23, %v7522_v23  ;;  %v2929_v25 = vmul.f32 %v7526_v0, %v7526_v0  ;;  %v2930_v32 = vmul.f32 %v7534_v30, %v7534_v30  ;;  %v2931_v34 = vmul.f32 %v7540_v54, %v7540_v54 }
 0x34a   : > { %v2958_v14 = vsel %vm9887_vm15, %v2926_v61, 0.0  ;;  %v2959_v19 = vsel %vm9888_vm13, %v2927_v40, 0.0  ;;  %v7562_v47 = vsub.f32 %v7238_v31, %v7491_v56  ;;  %v2932_v45 = vmul.f32 %v7548_v21, %v7548_v21  ;;  %vm9890_vm15 = vmmov %vm9837_vm2 }
 0x34b   : > { %v2960_v3 = vadd.f32 %v2959_v19, %v2958_v14  ;;  %v2961_v2 = vsel %vm9837_vm2, %v2928_v52, 0.0  ;;  %v2963_v10 = vsel %vm9889_vm6, %v2929_v25, 0.0  ;;  %v2965_v35 = vsel %vm9890_vm15, %v2930_v32, 0.0  ;;  %vm9891_vm13 = vmmov %vm9837_vm2 }
 0x34c   : > { %v7569_v37 = vsub.f32 %v7372_v1, %v7491_v56  ;;  %v2933_v62 = vmul.f32 %v7555_v16, %v7555_v16  ;;  %v2967_v44 = vsel %vm9891_vm13, %v2931_v34, 0.0  ;;  %v7576_v31 = vsub.f32 %v7267_v22, %v7491_v56  ;;  %vm9892_vm6 = vmmov %vm9837_vm2 }
 0x34d   : > { %v2962_v28 = vadd.f32 %v2961_v2, %v2960_v3  ;;  %v2934_v38 = vmul.f32 %v7562_v47, %v7562_v47  ;;  %v2969_v48 = vsel %vm9837_vm2, %v2932_v45, 0.0  ;;  %v7583_v1 = vsub.f32 %v7387_v63, %v7491_v56  ;;  %vm9893_vm15 = vmmov %vm9837_vm2 }
 0x34e   : > { %v2935_v60 = vmul.f32 %v7569_v37, %v7569_v37  ;;  %v2971_v53 = vsel %vm9892_vm6, %v2933_v62, 0.0  ;;  %v7590_v22 = vsub.f32 %v7287_v18, %v7491_v56  ;;  %v2936_v33 = vmul.f32 %v7576_v31, %v7576_v31  ;;  %vm9894_vm13 = vmmov %vm9837_vm2 }
 0x34f   : > { %v2964_v8 = vadd.f32 %v2963_v10, %v2962_v28  ;;  %v2973_v57 = vsel %vm9893_vm15, %v2934_v38, 0.0  ;;  %v7597_v63 = vsub.f32 %v7398_v6, %v7491_v56  ;;  %v2937_v40 = vmul.f32 %v7583_v1, %v7583_v1  ;;  %vm9895_vm6 = vmmov %vm9837_vm2 }
 0x350   : > { %v2975_v27 = vsel %vm9894_vm13, %v2935_v60, 0.0  ;;  %v7604_v18 = vsub.f32 %v7297_v15, %v7491_v56  ;;  %v2938_v25 = vmul.f32 %v7590_v22, %v7590_v22  ;;  %v2977_v14 = vsel %vm9837_vm2, %v2936_v33, 0.0  ;;  %vm9896_vm15 = vmmov %vm9837_vm2 }
 0x351   : > { %v2966_v39 = vadd.f32 %v2965_v35, %v2964_v8  ;;  %v7611_v6 = vsub.f32 %v7409_v11, %v7491_v56  ;;  %v2939_v3 = vmul.f32 %v7597_v63, %v7597_v63  ;;  %v2979_v32 = vsel %vm9895_vm6, %v2937_v40, 0.0  ;;  %vm9897_vm13 = vmmov %vm9837_vm2 }
 0x352   : > { %v7618_v15 = vsub.f32 %v7306_v7, %v7491_v56  ;;  %v2940_v28 = vmul.f32 %v7604_v18, %v7604_v18  ;;  %v2981_v34 = vsel %vm9896_vm15, %v2938_v25, 0.0  ;;  %v7625_v11 = vsub.f32 %v7420_v46, %v7491_v56  ;;  %vm9898_vm6 = vmmov %vm9837_vm2 }
 0x353   : > { %v2968_v5 = vadd.f32 %v2967_v44, %v2966_v39  ;;  %v2941_v8 = vmul.f32 %v7611_v6, %v7611_v6  ;;  %v2983_v45 = vsel %vm9897_vm13, %v2939_v3, 0.0  ;;  %v7632_v7 = vsub.f32 %v7317_v55, %v7491_v56  ;;  %vm9899_vm15 = vmmov %vm9837_vm2 }
 0x354   : > { %v2942_v39 = vmul.f32 %v7618_v15, %v7618_v15  ;;  %v2985_v62 = vsel %vm9837_vm2, %v2940_v28, 0.0  ;;  %v7639_v46 = vsub.f32 %v7433_v36, %v7491_v56  ;;  %v7646_v55 = vsub.f32 %v9864_v9, %v7491_v56  ;;  %vm9900_vm13 = vmmov %vm9837_vm2 }
 0x355   : > { %v2970_v24 = vadd.f32 %v2969_v48, %v2968_v5  ;;  %v2943_v5 = vmul.f32 %v7625_v11, %v7625_v11  ;;  %v2987_v38 = vsel %vm9898_vm6, %v2941_v8, 0.0  ;;  %v7653_v36 = vsub.f32 %v7447_v12, %v7491_v56  ;;  %vm9901_vm6 = vmmov %vm9837_vm2 }
 0x356   : > { %v2989_v60 = vsel %vm9899_vm15, %v2942_v39, 0.0  ;;  %v7660_v9 = vsub.f32 %v7454_v42, %v7491_v56  ;;  %v7667_v12 = vsub.f32 %v7459_v59, %v7491_v56  ;;  %v7674_v42 = vsub.f32 %v7464_v26, %v7491_v56  ;;  %vm9902_vm15 = vmmov %vm9837_vm2 }
 0x357   : > { %v2972_v13 = vadd.f32 %v2971_v53, %v2970_v24  ;;  %v2944_v24 = vmul.f32 %v7632_v7, %v7632_v7  ;;  %v2991_v33 = vsel %vm9900_vm13, %v2943_v5, 0.0  ;;  %v7681_v59 = vsub.f32 %v7468_v50, %v7491_v56  ;;  %vm9903_vm13 = vmmov %vm9837_vm2 }
 0x358   : > { %v2950_v26 = vmul.f32 %v7674_v42, %v7674_v42  ;;  %v2952_v50 = vmul.f32 %v7495_v49, %v7495_v49 }
 0x359   : > { %v2974_v61 = vadd.f32 %v2973_v57, %v2972_v13  ;;  %v2945_v13 = vmul.f32 %v7639_v46, %v7639_v46  ;;  %v2993_v40 = vsel %vm9837_vm2, %v2944_v24, 0.0 }
 0x35a   : > { %v3009_v24 = vsel %vm9837_vm2, %v2952_v50, 0.0 }
 0x35b   : > { %v2976_v52 = vadd.f32 %v2975_v27, %v2974_v61  ;;  %v2946_v61 = vmul.f32 %v7646_v55, %v7646_v55  ;;  %v2995_v25 = vsel %vm9901_vm6, %v2945_v13, 0.0  ;;  %vm9904_vm6 = vmmov %vm9837_vm2 }
 0x35d   : > { %v2978_v19 = vadd.f32 %v2977_v14, %v2976_v52  ;;  %v2947_v52 = vmul.f32 %v7653_v36, %v7653_v36  ;;  %v2997_v3 = vsel %vm9902_vm15, %v2946_v61, 0.0  ;;  %vm9905_vm15 = vmmov %vm9837_vm2 }
 0x35e   : > { %v3005_v56 = vsel %vm9905_vm15, %v2950_v26, 0.0  ;;  %vm9908_vm15 = vmmov %vm9837_vm2 }
 0x35f   : > { %v2980_v2 = vadd.f32 %v2979_v32, %v2978_v19  ;;  %v2948_v19 = vmul.f32 %v7660_v9, %v7660_v9  ;;  %v2999_v28 = vsel %vm9903_vm13, %v2947_v52, 0.0  ;;  %vm9906_vm13 = vmmov %vm9837_vm2 }
 0x361   : > { %v2982_v10 = vadd.f32 %v2981_v34, %v2980_v2  ;;  %v2949_v2 = vmul.f32 %v7667_v12, %v7667_v12 }
 0x363   : > { %v2984_v35 = vadd.f32 %v2983_v45, %v2982_v10  ;;  %v3001_v10 = vsel %vm9837_vm2, %v2948_v19, 0.0  ;;  %v2951_v45 = vmul.f32 %v7681_v59, %v7681_v59 }
 0x365   : > { %v2986_v44 = vadd.f32 %v2985_v62, %v2984_v35  ;;  %v3003_v35 = vsel %vm9904_vm6, %v2949_v2, 0.0  ;;  %v3007_v5 = vsel %vm9906_vm13, %v2951_v45, 0.0  ;;  %vm9907_vm6 = vmmov %vm9837_vm2 }
 0x366   : > { %vm9909_vm13 = vmmov %vm9837_vm2 }
 0x367   : > { %v2988_v48 = vadd.f32 %v2987_v38, %v2986_v44  ;;  %v2953_v44 = vmul.f32 %v7498_v51, %v7498_v51 }
 0x369   : > { %v2990_v53 = vadd.f32 %v2989_v60, %v2988_v48  ;;  %v2954_v48 = vmul.f32 %v7501_v20, %v7501_v20  ;;  %v3011_v13 = vsel %vm9907_vm6, %v2953_v44, 0.0 }
 0x36b   : > { %v2992_v57 = vadd.f32 %v2991_v33, %v2990_v53  ;;  %v2955_v53 = vmul.f32 %v7504_v29, %v7504_v29  ;;  %v3013_v61 = vsel %vm9908_vm15, %v2954_v48, 0.0 }
 0x36d   : > { %v2994_v27 = vadd.f32 %v2993_v40, %v2992_v57  ;;  %v2956_v57 = vmul.f32 %v7507_v58, %v7507_v58  ;;  %v3015_v52 = vsel %vm9909_vm13, %v2955_v53, 0.0  ;;  %vm9912_vm13 = vmmov %vm9837_vm2 }
 0x36f   : > { %v2996_v14 = vadd.f32 %v2995_v25, %v2994_v27  ;;  %v2957_v27 = vmul.f32 %v7510_v17, %v7510_v17 }
 0x371   : > { %v2998_v32 = vadd.f32 %v2997_v3, %v2996_v14  ;;  %v3017_v14 = vsel %vm9837_vm2, %v2956_v57, 0.0  ;;  %v3019_v3 = vsel %vm9910_vm4, %v2957_v27, 0.0 }
 0x373   : > { %v3000_v34 = vadd.f32 %v2999_v28, %v2998_v32 }
 0x375   : > { %v3002_v8 = vadd.f32 %v3001_v10, %v3000_v34 }
 0x377   : > { %v3004_v39 = vadd.f32 %v3003_v35, %v3002_v8 }
 0x379   : > { %v3006_v62 = vadd.f32 %v3005_v56, %v3004_v39 }
 0x37b   : > { %v3008_v38 = vadd.f32 %v3007_v5, %v3006_v62 }
 0x37d   : > { %v3010_v60 = vadd.f32 %v3009_v24, %v3008_v38 }
 0x37f   : > { %v3012_v33 = vadd.f32 %v3011_v13, %v3010_v60 }
 0x381   : > { %v3014_v40 = vadd.f32 %v3013_v61, %v3012_v33 }
 0x383   : > { %v3016_v25 = vadd.f32 %v3015_v52, %v3014_v40 }
 0x385   : > { %v3018_v19 = vadd.f32 %v3017_v14, %v3016_v25 }
 0x387   : > { %v3020_v32 = vadd.f32 %v3019_v3, %v3018_v19 }
 0x389   : > { %v3021_v2 = vrot.slane %v3020_v32, 4 }
 0x38b   : > { %v3022_v28 = vadd.f32 %v3021_v2, %v3020_v32 }
 0x38d   : > { %v3023_v34 = vrot.slane %v3022_v28, 2 }
 0x38f   : > { %v3024_v26 = vadd.f32 %v3023_v34, %v3022_v28  ;;  %v5786_v28 = vld [vmem:[%s9329_s2] sm:$0xff] }
 0x391   : > { %v3025_v10 = vrot.slane %v3024_v26, 1 }
 0x393   : > { %v3026_v8 = vadd.f32 %v3025_v10, %v3024_v26  ;;  %v5788_v10 = vld [vmem:[%s9329_s2 + $0x10] sm:$0xf0] }
 0x395   : > { %v3027_v45 = vmul.f32 %v3026_v8, %v7488_v4 }
 0x397   : > { %v3028_v35 = vadd.f32 1e-05, %v3027_v45  ;;  %v5790_v45 = vld [vmem:[%s9329_s2 + $0x20] sm:$0xff] }
 0x399   : > { %5854 = vrsqrt.f32 %v3028_v35  ;;  %vm3035_vm15 = vweird.f32 %v3028_v35 }
 0x39f   : > { %v5855_v39 = vpop.eup %5854 }
 0x3a0   : > { %v3030_v50 = vmul.f32 %v5855_v39, %v3028_v35  ;;  %vm3036_vm6 = vweird.f32 %v5855_v39 }
 0x3a1   : > { %vm3037_vm4 = vmor %vm3035_vm15, %vm3036_vm6 }
 0x3a2   : > { %v3031_v56 = vmul.f32 %v5855_v39, %v3030_v50  ;;  %vm9913_vm6 = vmmov %vm9837_vm2 }
 0x3a3   : > { %vm9914_vm15 = vmmov %vm9837_vm2 }
 0x3a4   : > { %v3032_v62 = vmul.f32 0.5, %v3031_v56 }
 0x3a6   : > { %v3033_v44 = vsub.f32 1.5, %v3032_v62 }
 0x3a8   : > { %v3034_v5 = vmul.f32 %v5855_v39, %v3033_v44 }
 0x3aa   : > { %v7713_v38 = vsel %vm3037_vm4, %v5855_v39, %v3034_v5  ;;  %vm9915_vm4 = vmmov %vm9837_vm2 }
 0x3ab   : > { %v3070_v48 = vmul.f32 %v7713_v38, %v7510_v17  ;;  %v3039_v60 = vmul.f32 %v7713_v38, %v7514_v41  ;;  %v3041_v53 = vmul.f32 %v7713_v38, %v7522_v23  ;;  %v3040_v13 = vmul.f32 %v7713_v38, %v7518_v43 }
 0x3ac   : > { %v3042_v33 = vmul.f32 %v7713_v38, %v7526_v0  ;;  %v3043_v17 = vmul.f32 %v7713_v38, %v7534_v30  ;;  %v3044_v40 = vmul.f32 %v7713_v38, %v7540_v54  ;;  %v3045_v23 = vmul.f32 %v7713_v38, %v7548_v21  ;;  %v5787_v54 = vld [vmem:[%s9329_s2 + $0x8] sm:$0xff] }
 0x3ad   : > { %v7717_v24 = vmax.f32 %v3070_v48, 0.0  ;;  %v7731_v57 = vmax.f32 %v3039_v60, 0.0  ;;  %v3073_v61 = vmax.f32 %v3041_v53, 0.0  ;;  %v7735_v27 = vmax.f32 %v3040_v13, 0.0  ;;  %3754 = vmatpush.bf16.msrb.mxu2 %v5787_v54  ;;  %v5792_v48 = vld [vmem:[%s9329_s2 + $0x30] sm:$0xff] }
 0x3ae   : > { %v3074_v41 = vmax.f32 %v3042_v33, 0.0  ;;  %v3046_v43 = vmul.f32 %v7713_v38, %v7555_v16  ;;  %v3047_v0 = vmul.f32 %v7713_v38, %v7562_v47  ;;  %v7745_v30 = vmax.f32 %v3043_v17, 0.0  ;;  %v5791_v16 = vld [vmem:[%s9329_s2 + $0x28] sm:$0xff] }
 0x3af   : > { %9911 = vst [vmem:[#allocation22_spill] sm:$0xff] %v7717_v24  ;;  %v3048_v21 = vmul.f32 %v7713_v38, %v7569_v37  ;;  %v7754_v52 = vmax.f32 %v3044_v40, 0.0  ;;  %v3049_v47 = vmul.f32 %v7713_v38, %v7576_v31  ;;  %v3050_v25 = vmul.f32 %v7713_v38, %v7583_v1  ;;  %3983 = vmatpush.bf16.msrb.mxu3 %v5791_v16  ;;  %v5549_v1 = vld [vmem:[%s9329_s2 + $0x10] sm:$0xf] }
 0x3b0   : > { %3136 = vst.msk [vmem:[#allocation2 + $0x109] sm:$0xff] %vm9912_vm13, %v7717_v24  ;;  %v7765_v14 = vmax.f32 %v3045_v23, 0.0  ;;  %vm9916_vm13 = vmmov %vm9837_vm2  ;;  %v3051_v37 = vmul.f32 %v7713_v38, %v7590_v22  ;;  %v3052_v19 = vmul.f32 %v7713_v38, %v7597_v63  ;;  %v7772_v3 = vmax.f32 %v3046_v43, 0.0  ;;  %v5793_v63 = vld [vmem:[%s9329_s2 + $0x38] sm:$0xff] }
 0x3b1   : > { %3103 = vst.msk [vmem:[#allocation2 + $0x1] sm:$0xff] %vm9837_vm2, %v3073_v61  ;;  %v3053_v31 = vmul.f32 %v7713_v38, %v7604_v18  ;;  %v7780_v32 = vmax.f32 %v3047_v0, 0.0  ;;  %v3283_v22 = vpack.c.bf16 %v3073_v61, %v3073_v61  ;;  %v3284_v2 = vpack.c.bf16 %v3074_v41, %v3074_v41  ;;  %4124 = vmatpush.bf16.msrb.mxu0 %v5793_v63 }
 0x3b2   : > { %3104 = vst.msk [vmem:[#allocation2 + $0x9] sm:$0xff] %vm9913_vm6, %v3074_v41  ;;  %vm9917_vm6 = vmmov %vm9837_vm2  ;;  %v3054_v18 = vmul.f32 %v7713_v38, %v7611_v6  ;;  %v3055_v34 = vmul.f32 %v7713_v38, %v7618_v15  ;;  %v3056_v26 = vmul.f32 %v7713_v38, %v7625_v11  ;;  %v7799_v8 = vmax.f32 %v3048_v21, 0.0  ;;  %3755 = vmatpush.bf16.msrb.mxu2 %v5786_v28 }
 0x3b3   : > { %3105 = vst.msk [vmem:[#allocation2 + $0x11] sm:$0xff] %vm9914_vm15, %v7731_v57  ;;  %vm9918_vm15 = vmmov %vm9837_vm2  ;;  %v3057_v15 = vmul.f32 %v7713_v38, %v7632_v7  ;;  %v3058_v11 = vmul.f32 %v7713_v38, %v7639_v46  ;;  %v7810_v35 = vmax.f32 %v3049_v47, 0.0  ;;  %v7812_v39 = vmax.f32 %v3050_v25, 0.0  ;;  %v5795_v46 = vld [vmem:[%s9329_s2 + $0x48] sm:$0xff]  ;;  %3984 = vmatpush.bf16.msrb.mxu3 %v5790_v45 }
 0x3b4   : > { %3106 = vst.msk [vmem:[#allocation2 + $0x19] sm:$0xff] %vm9915_vm4, %v7735_v27  ;;  %vm9919_vm4 = vmmov %vm9837_vm2  ;;  %v3059_v62 = vmul.f32 %v7713_v38, %v7646_v55  ;;  %v7820_v44 = vmul.f32 %v7713_v38, %v7653_v36  ;;  %v7822_v7 = vmax.f32 %v3051_v37, 0.0  ;;  %v7824_v5 = vmax.f32 %v3052_v19, 0.0 }
 0x3b5   : > { %3107 = vst.msk [vmem:[#allocation2 + $0x21] sm:$0xff] %vm9916_vm13, %v3073_v61  ;;  %vm9920_vm13 = vmmov %vm9837_vm2  ;;  %v3417_v36 = vunpack.c.l.b16 %v3283_v22  ;;  %v3418_v60 = vunpack.c.l.b16 %v3284_v2  ;;  %v5550_v53 = vor.u32 %v5788_v10, %v5549_v1  ;;  %v7846_v21 = vmax.f32 %v3054_v18, 0.0  ;;  %4125 = vmatpush.bf16.msrb.mxu0 %v5792_v48 }
 0x3b6   : > { %3108 = vst.msk [vmem:[#allocation2 + $0x29] sm:$0xff] %vm9837_vm2, %v3074_v41  ;;  %v7840_v41 = vmax.f32 %v3053_v31, 0.0  ;;  %v7857_v2 = vmax.f32 %v3055_v34, 0.0  ;;  %v3061_v10 = vmul.f32 %v7713_v38, %v7660_v9  ;;  %v7863_v45 = vmax.f32 %v3056_v26, 0.0 }
 0x3b7   : > { %3109 = vst.msk [vmem:[#allocation2 + $0x31] sm:$0xff] %vm9917_vm6, %v7745_v30  ;;  %vm9922_vm6 = vmmov %vm9837_vm2  ;;  %v7850_v16 = vpack.c.b16 %v3418_v60, %v3417_v36  ;;  %3526 = vmatpush.bf16.msra.mxu1 %v5550_v53  ;;  %v7875_v26 = vmax.f32 %v3058_v11, 0.0  ;;  %v3063_v48 = vmul.f32 %v7713_v38, %v7674_v42  ;;  %v3064_v11 = vmul.f32 %v7713_v38, %v7681_v59 }
 0x3b8   : > { %3110 = vst.msk [vmem:[#allocation2 + $0x39] sm:$0xff] %vm9918_vm15, %v7754_v52  ;;  %v3139_v6 = vld [vmem:[#allocation2] sm:$0xff]  ;;  %vm9924_vm15 = vmmov %vm9837_vm2  ;;  %v3065_v36 = vmul.f32 %v7713_v38, %v7495_v49  ;;  %v7894_v60 = vmax.f32 %v7820_v44, 0.0  ;;  %v3066_v42 = vmul.f32 %v7713_v38, %v7498_v51  ;;  %v3285_v44 = vpack.c.bf16 %v7731_v57, %v7731_v57 }
 0x3b9   : > { %3111 = vst.msk [vmem:[#allocation2 + $0x41] sm:$0xff] %vm9919_vm4, %v7765_v14  ;;  %v3140_v50 = vld [vmem:[#allocation2 + $0x8] sm:$0xff]  ;;  %v3289_v51 = vpack.c.bf16 %v7765_v14, %v7765_v14  ;;  %v3286_v13 = vpack.c.bf16 %v7735_v27, %v7735_v27  ;;  %v7924_v0 = vmax.f32 %v3063_v48, 0.0  ;;  %v3069_v57 = vmul.f32 %v7713_v38, %v7507_v58 }
 0x3ba   : > { %v3175_v56 = vld [vmem:[#allocation2 + $0x2] sm:$0xff]  ;;  %3112 = vst.msk [vmem:[#allocation2 + $0x49] sm:$0xff] %vm9920_vm13, %v7772_v3  ;;  %v3176_v55 = vld [vmem:[#allocation2 + $0xa] sm:$0xff]  ;;  %v3248_v43 = vpack.c.bf16 %v3140_v50, %v3140_v50  ;;  %v7930_v14 = vmax.f32 %v3064_v11, 0.0  ;;  %v7932_v27 = vmax.f32 %v3065_v36, 0.0  ;;  %v3291_v58 = vpack.c.bf16 %v7780_v32, %v7780_v32 }
 0x3bb   : > { %3113 = vst.msk [vmem:[#allocation2 + $0x51] sm:$0xff] %vm9837_vm2, %v7780_v32  ;;  %v3211_v33 = vsel %vm6084_vm1, %v3175_v56, %v3139_v6  ;;  %v3141_v17 = vld [vmem:[#allocation2 + $0x10] sm:$0xff]  ;;  %v3142_v61 = vld [vmem:[#allocation2 + $0x18] sm:$0xff]  ;;  %v3316_v54 = vsel %vm6573_vm14, %v3140_v50, %v3176_v55  ;;  %v3351_v47 = vpack.c.bf16 %v3175_v56, %v3175_v56  ;;  %vm9925_vm1 = vmmov %vm9837_vm2  ;;  %4265 = vmatpush.bf16.msrb.mxu1 %v5795_v46  ;;  %v7871_v56 = vmax.f32 %v3057_v15, 0.0 }
 0x3bc   : > { %v7838_v40 = vld [vmem:[#allocation2 + $0x12] sm:$0xff]  ;;  %3114 = vst.msk [vmem:[#allocation2 + $0x59] sm:$0xff] %vm9922_vm6, %v7799_v8  ;;  %v3247_v23 = vpack.c.bf16 %v3211_v33, %v3211_v33  ;;  %v3352_v25 = vpack.c.bf16 %v3316_v54, %v3316_v54  ;;  %v3641_v19 = vunpack.c.l.b16 %v3248_v43  ;;  %v3250_v22 = vpack.c.bf16 %v3142_v61, %v3142_v61  ;;  %vm9927_vm14 = vmmov %vm9925_vm1  ;;  %v3178_v15 = vld [vmem:[#allocation2 + $0x1a] sm:$0xff] }
 0x3bd   : > { %3115 = vst.msk [vmem:[#allocation2 + $0x61] sm:$0xff] %vm9924_vm15, %v7810_v35  ;;  %v3213_v1 = vsel %vm6129_vm3, %v7838_v40, %v3141_v17  ;;  %v3869_v63 = vunpack.c.l.b16 %v3351_v47  ;;  %vm9928_vm4 = vmmov %vm9925_vm1  ;;  %v3062_v50 = vmul.f32 %v7713_v38, %v7667_v12  ;;  %v7882_v55 = vmax.f32 %v3059_v62, 0.0  ;;  %v3143_v49 = vld [vmem:[#allocation2 + $0x20] sm:$0xff] }
 0x3be   : > { %3116 = vst.msk [vmem:[#allocation2 + $0x69] sm:$0xff] %vm9925_vm1, %v7812_v39  ;;  %v3640_v37 = vunpack.c.l.b16 %v3247_v23  ;;  %v3870_v28 = vunpack.c.l.b16 %v3352_v25  ;;  %v3249_v18 = vpack.c.bf16 %v3213_v1, %v3213_v1  ;;  %vm9929_vm3 = vmmov %vm9925_vm1  ;;  %v3643_v6 = vunpack.c.l.b16 %v3250_v22  ;;  %v7908_v59 = vld [vmem:[#allocation2 + $0x22] sm:$0xff] }
 0x3bf   : > { %3117 = vst.msk [vmem:[#allocation2 + $0x71] sm:$0xff] %vm9927_vm14, %v7822_v7  ;;  %5555 = vmatmul.msk.bf16.vlgmr.msra.gmra.mxu1 %vm9929_vm3, %v7850_v16  ;;  %vm9930_vm13 = vmmov %vm9925_vm1  ;;  %v7900_v62 = vmax.f32 %v3061_v10, 0.0  ;;  %v7902_v53 = vmax.f32 %v3062_v50, 0.0  ;;  %v3318_v17 = vsel %vm6606_vm12, %v3142_v61, %v3178_v15  ;;  %v3067_v23 = vmul.f32 %v7713_v38, %v7501_v20  ;;  %v3144_v61 = vld [vmem:[#allocation2 + $0x28] sm:$0xff] }
 0x3c0   : > { %3118 = vst.msk [vmem:[#allocation2 + $0x79] sm:$0xff] %vm9928_vm4, %v7824_v5  ;;  %v3672_v34 = vpack.c.b16 %v3641_v19, %v3640_v37  ;;  %v3901_v46 = vpack.c.b16 %v3870_v28, %v3869_v63  ;;  %v3642_v9 = vunpack.c.l.b16 %v3249_v18  ;;  %vm9931_vm2 = vmmov %vm9925_vm1  ;;  %v3068_v43 = vmul.f32 %v7713_v38, %v7504_v29 }
 0x3c1   : > { %3119 = vst.msk [vmem:[#allocation2 + $0x81] sm:$0xff] %vm9930_vm13, %v7840_v41  ;;  %vm9932_vm6 = vmmov %vm9925_vm1  ;;  %v3215_v29 = vsel %vm6195_vm5, %v7908_v59, %v3143_v49  ;;  %v7939_v54 = vmax.f32 %v3066_v42, 0.0  ;;  %v3353_v38 = vpack.c.bf16 %v7838_v40, %v7838_v40  ;;  %v3354_v47 = vpack.c.bf16 %v3318_v17, %v3318_v17 }
 0x3c2   : > { %3120 = vst.msk [vmem:[#allocation2 + $0x89] sm:$0xff] %vm9931_vm2, %v7846_v21  ;;  %5579 = vmatmul.msk.bf16.vlgmr.msrb.gmra.mxu2 %vm9932_vm6, %v3672_v34  ;;  %vm9933_vm15 = vmmov %vm9925_vm1  ;;  %5603 = vmatmul.msk.bf16.vlgmr.msrb.gmra.mxu3 %vm9925_vm1, %v3901_v46  ;;  %v7887_v12 = vpack.c.b16 %v3643_v6, %v3642_v9  ;;  %v3419_v25 = vunpack.c.l.b16 %v3285_v44  ;;  %v3420_v37 = vunpack.c.l.b16 %v3286_v13  ;;  %v3290_v19 = vpack.c.bf16 %v7772_v3, %v7772_v3  ;;  %v3180_v44 = vld [vmem:[#allocation2 + $0x2a] sm:$0xff]  ;;  %v3181_v13 = vld [vmem:[#allocation2 + $0x32] sm:$0xff] }
 0x3c3   : > { %3121 = vst.msk [vmem:[#allocation2 + $0x91] sm:$0xff] %vm9933_vm15, %v7857_v2  ;;  %vm9934_vm14 = vmmov %vm9925_vm1  ;;  %v3423_v31 = vunpack.c.l.b16 %v3289_v51  ;;  %v7951_v1 = vmax.f32 %v3067_v23, 0.0  ;;  %v3251_v22 = vpack.c.bf16 %v3215_v29, %v3215_v29  ;;  %v3252_v32 = vpack.c.bf16 %v3144_v61, %v3144_v61 }
 0x3c4   : > { %3122 = vst.msk [vmem:[#allocation2 + $0x99] sm:$0xff] %vm9934_vm14, %v7863_v45  ;;  %vm9935_vm4 = vmmov %vm9925_vm1  ;;  %v7955_v63 = vmax.f32 %v3068_v43, 0.0  ;;  %v3424_v40 = vunpack.c.l.b16 %v3290_v19  ;;  %v7959_v28 = vmax.f32 %v3069_v57, 0.0  ;;  %v3293_v3 = vpack.c.bf16 %v7810_v35, %v7810_v35  ;;  %v3146_v57 = vld [vmem:[#allocation2 + $0x38] sm:$0xff] }
 0x3c5   : > { %3123 = vst.msk [vmem:[#allocation2 + $0xa1] sm:$0xff] %vm9935_vm4, %v7871_v56  ;;  %vm9936_vm3 = vmmov %vm9925_vm1  ;;  %v3871_v18 = vunpack.c.l.b16 %v3353_v38  ;;  %v3872_v10 = vunpack.c.l.b16 %v3354_v47  ;;  %v7967_v34 = vpack.c.b16 %v3420_v37, %v3419_v25  ;;  %v3292_v50 = vpack.c.bf16 %v7799_v8, %v7799_v8 }
 0x3c6   : > { %5627 = vmatmul.msk.bf16.vlgmr.msrb.gmra.mxu0 %vm9936_vm3, %v7887_v12  ;;  %vm9937_vm13 = vmmov %vm9925_vm1  ;;  %3130 = vst.msk [vmem:[#allocation2 + $0xd9] sm:$0xff] %vm9925_vm1, %v7930_v14  ;;  %v7969_v6 = vpack.c.b16 %v3424_v40, %v3423_v31  ;;  %v3425_v46 = vunpack.c.l.b16 %v3291_v58  ;;  %v3644_v9 = vunpack.c.l.b16 %v3251_v22  ;;  %v3645_v48 = vunpack.c.l.b16 %v3252_v32 }
 0x3c7   : > { %3124 = vst.msk [vmem:[#allocation2 + $0xa9] sm:$0xff] %vm9937_vm13, %v7875_v26  ;;  %vm9939_vm2 = vmmov %vm9925_vm1  ;;  %v3426_v35 = vunpack.c.l.b16 %v3292_v50  ;;  %v7981_v15 = vpack.c.b16 %v3872_v10, %v3871_v18  ;;  %v3295_v8 = vpack.c.bf16 %v7822_v7, %v7822_v7  ;;  %v3294_v36 = vpack.c.bf16 %v7812_v39, %v7812_v39 }
 0x3c8   : > { %3125 = vst.msk [vmem:[#allocation2 + $0xb1] sm:$0xff] %vm9939_vm2, %v7882_v55  ;;  %vm9940_vm12 = vmmov %vm9925_vm1  ;;  %v3427_v42 = vunpack.c.l.b16 %v3293_v3  ;;  %v7997_v49 = vpack.c.b16 %v3645_v48, %v3644_v9  ;;  %v3297_v7 = vpack.c.bf16 %v7840_v41, %v7840_v41  ;;  %v3320_v33 = vsel %vm6624_vm10, %v3144_v61, %v3180_v44  ;;  %v8049_v44 = vld [vmem:[#allocation2 + $0x42] sm:$0xff] }
 0x3c9   : > { %3126 = vst.msk [vmem:[#allocation2 + $0xb9] sm:$0xff] %vm9940_vm12, %v7894_v60  ;;  %vm9942_vm6 = vmmov %vm9925_vm1  ;;  %v7989_v11 = vpack.c.b16 %v3426_v35, %v3425_v46  ;;  %v3428_v51 = vunpack.c.l.b16 %v3294_v36  ;;  %v3296_v23 = vpack.c.bf16 %v7824_v5, %v7824_v5  ;;  %v3429_v43 = vunpack.c.l.b16 %v3295_v8  ;;  %v3182_v35 = vld [vmem:[#allocation2 + $0x3a] sm:$0xff] }
 0x3ca   : > { %3127 = vst.msk [vmem:[#allocation2 + $0xc1] sm:$0xff] %vm9942_vm6, %v7900_v62  ;;  %vm9943_vm15 = vmmov %vm9925_vm1  ;;  %v3355_v41 = vpack.c.bf16 %v7908_v59, %v7908_v59  ;;  %v3356_v38 = vpack.c.bf16 %v3320_v33, %v3320_v33  ;;  %v3299_v47 = vpack.c.bf16 %v7857_v2, %v7857_v2  ;;  %v3298_v61 = vpack.c.bf16 %v7846_v21, %v7846_v21  ;;  %v3148_v33 = vld [vmem:[#allocation2 + $0x48] sm:$0xff] }
 0x3cb   : > { %3128 = vst.msk [vmem:[#allocation2 + $0xc9] sm:$0xff] %vm9943_vm15, %v7902_v53  ;;  %vm9944_vm5 = vmmov %vm9925_vm1  ;;  %v8005_v17 = vpack.c.b16 %v3428_v51, %v3427_v42  ;;  %v3430_v58 = vunpack.c.l.b16 %v3296_v23  ;;  %v3431_v37 = vunpack.c.l.b16 %v3297_v7  ;;  %v3254_v19 = vpack.c.bf16 %v3146_v57, %v3146_v57  ;;  %v3147_v42 = vld [vmem:[#allocation2 + $0x40] sm:$0xff] }
 0x3cc   : > { %3129 = vst.msk [vmem:[#allocation2 + $0xd1] sm:$0xff] %vm9944_vm5, %v7924_v0  ;;  %vm9946_vm14 = vmmov %vm9925_vm1  ;;  %v3432_v31 = vunpack.c.l.b16 %v3298_v61  ;;  %v3873_v22 = vunpack.c.l.b16 %v3355_v41  ;;  %v3874_v32 = vunpack.c.l.b16 %v3356_v38  ;;  %v3301_v40 = vpack.c.bf16 %v7871_v56, %v7871_v56 }
 0x3cd   : > { %9945 = vst [vmem:[#allocation96_spill] sm:$0xff] %v7959_v28  ;;  %vm9947_vm4 = vmmov %vm9925_vm1  ;;  %v8015_v25 = vpack.c.b16 %v3430_v58, %v3429_v43  ;;  %v3300_v59 = vpack.c.bf16 %v7863_v45, %v7863_v45  ;;  %v3433_v2 = vunpack.c.l.b16 %v3299_v47  ;;  %v3647_v10 = vunpack.c.l.b16 %v3254_v19 }
 0x3ce   : > { %3131 = vst.msk [vmem:[#allocation2 + $0xe1] sm:$0xff] %vm9946_vm14, %v7932_v27  ;;  %vm9948_vm3 = vmmov %vm9925_vm1  ;;  %v8021_v3 = vpack.c.b16 %v3432_v31, %v3431_v37  ;;  %v8027_v50 = vpack.c.b16 %v3874_v32, %v3873_v22  ;;  %v3303_v46 = vpack.c.bf16 %v7882_v55, %v7882_v55  ;;  %v3302_v45 = vpack.c.bf16 %v7875_v26, %v7875_v26 }
 0x3cf   : > { %3132 = vst.msk [vmem:[#allocation2 + $0xe9] sm:$0xff] %vm9947_vm4, %v7939_v54  ;;  %vm9949_vm13 = vmmov %vm9925_vm1  ;;  %v3434_v21 = vunpack.c.l.b16 %v3300_v59  ;;  %v3435_v9 = vunpack.c.l.b16 %v3301_v40  ;;  %v3287_v36 = vpack.c.bf16 %v7745_v30, %v7745_v30  ;;  %v3305_v55 = vpack.c.bf16 %v7900_v62, %v7900_v62 }
 0x3d0   : > { %3133 = vst.msk [vmem:[#allocation2 + $0xf1] sm:$0xff] %vm9948_vm3, %v7951_v1  ;;  %vm9950_vm2 = vmmov %vm9925_vm1  ;;  %v3436_v8 = vunpack.c.l.b16 %v3302_v45  ;;  %v3288_v26 = vpack.c.bf16 %v7754_v52, %v7754_v52  ;;  %v3322_v7 = vsel %vm6651_vm0, %v3146_v57, %v3182_v35  ;;  %v3304_v30 = vpack.c.bf16 %v7894_v60, %v7894_v60  ;;  %v3149_v45 = vld [vmem:[#allocation2 + $0x50] sm:$0xff] }
 0x3d1   : > { %3134 = vst.msk [vmem:[#allocation2 + $0xf9] sm:$0xff] %vm9949_vm13, %v7955_v63  ;;  %5556 = vmatmul.msk.bf16.gmra.mxu1 %vm9950_vm2, %v7967_v34  ;;  %vm9951_vm12 = vmmov %vm9925_vm1  ;;  %v8033_v56 = vpack.c.b16 %v3434_v21, %v3433_v2  ;;  %v3437_v39 = vunpack.c.l.b16 %v3303_v46  ;;  %v3219_v23 = vsel %vm6345_vm9, %v8049_v44, %v3147_v42  ;;  %v3307_v52 = vpack.c.bf16 %v7924_v0, %v7924_v0  ;;  %v3184_v21 = vld [vmem:[#allocation2 + $0x4a] sm:$0xff] }
 0x3d2   : > { %3135 = vst.msk [vmem:[#allocation2 + $0x101] sm:$0xff] %vm9951_vm12, %v7959_v28  ;;  %vm9952_vm6 = vmmov %vm9925_vm1  ;;  %5604 = vmatmul.msk.bf16.gmra.mxu3 %vm9925_vm1, %v7981_v15  ;;  %v3438_v43 = vunpack.c.l.b16 %v3304_v30  ;;  %v3421_v20 = vunpack.c.l.b16 %v3287_v36  ;;  %v3358_v58 = vpack.c.bf16 %v3322_v7, %v3322_v7  ;;  %v3422_v41 = vunpack.c.l.b16 %v3288_v26  ;;  %v3150_v26 = vld [vmem:[#allocation2 + $0x58] sm:$0xff] }
 0x3d3   : > { %3137 = vst.msk [vmem:[#allocation2 + $0x111] sm:$0xff] %vm9952_vm6, %v7951_v1  ;;  %vm9953_vm15 = vmmov %vm9925_vm1  ;;  %v3306_v38 = vpack.c.bf16 %v7902_v53, %v7902_v53  ;;  %v3439_v60 = vunpack.c.l.b16 %v3305_v55  ;;  %v3255_v47 = vpack.c.bf16 %v3219_v23, %v3219_v23  ;;  %v3256_v61 = vpack.c.bf16 %v3148_v33, %v3148_v33 }
 0x3d4   : > { %5580 = vmatmul.msk.bf16.gmra.mxu2 %vm9953_vm15, %v7887_v12  ;;  %vm9954_vm5 = vmmov %vm9925_vm1  ;;  %v3145_v12 = vld [vmem:[#allocation2 + $0x30] sm:$0xff]  ;;  %9960 = vst [vmem:[#allocation94_spill] sm:$0xff] %v8033_v56  ;;  %v8062_v57 = vpack.c.b16 %v3438_v43, %v3437_v39  ;;  %v3876_v31 = vunpack.c.l.b16 %v3358_v58  ;;  %v8068_v22 = vpack.c.b16 %v3422_v41, %v3421_v20  ;;  %v3441_v32 = vunpack.c.l.b16 %v3307_v52  ;;  %v9976_v58 = vld [vmem:[#allocation69_spill] sm:$0xff] }
 0x3d5   : > { %3138 = vst.msk [vmem:[#allocation2 + $0x119] sm:$0xff] %vm9954_vm5, %v7955_v63  ;;  %vm9955_vm14 = vmmov %vm9925_vm1  ;;  %v3217_v29 = vsel %vm6267_vm7, %v3181_v13, %v3145_v12  ;;  %v8053_v12 = vpack.c.b16 %v3436_v8, %v3435_v9  ;;  %v3440_v37 = vunpack.c.l.b16 %v3306_v38  ;;  %v3648_v40 = vunpack.c.l.b16 %v3255_v47  ;;  %v3185_v9 = vld [vmem:[#allocation2 + $0x52] sm:$0xff] }
 0x3d6   : > { %5628 = vmatmul.msk.bf16.gmra.mxu0 %vm9955_vm14, %v7997_v49  ;;  %v3253_v5 = vpack.c.bf16 %v3217_v29, %v3217_v29  ;;  %vm9958_vm7 = vmmov %vm9925_vm1  ;;  %v3357_v29 = vpack.c.bf16 %v3181_v13, %v3181_v13  ;;  %9966 = vst [vmem:[#allocation12_spill] sm:$0xff] %v8062_v57  ;;  %v3308_v13 = vpack.c.bf16 %v7930_v14, %v7930_v14  ;;  %v3649_v59 = vunpack.c.l.b16 %v3256_v61 }
 0x3d7   : > { %vm9959_vm10 = vmmov %vm9925_vm1  ;;  %9964 = vst [vmem:[#allocation95_spill] sm:$0xff] %v8053_v12  ;;  %v8070_v0 = vpack.c.b16 %v3440_v37, %v3439_v60  ;;  %v3324_v8 = vsel %vm6679_vm8, %v3148_v33, %v3184_v21  ;;  %v3312_v55 = vpack.c.bf16 %v7955_v63, %v7955_v63  ;;  %v3221_v51 = vsel %vm6417_vm11, %v3185_v9, %v3149_v45  ;;  %v3186_v45 = vld [vmem:[#allocation2 + $0x5a] sm:$0xff] }
 0x3d8   : > { %v3646_v18 = vunpack.c.l.b16 %v3253_v5  ;;  %vm9961_vm4 = vmmov %vm9925_vm1  ;;  %v3309_v5 = vpack.c.bf16 %v7932_v27, %v7932_v27  ;;  %v3875_v19 = vunpack.c.l.b16 %v3357_v29  ;;  %v3442_v53 = vunpack.c.l.b16 %v3308_v13 }
 0x3d9   : > { %vm9962_vm3 = vmmov %vm9925_vm1  ;;  %9967 = vst [vmem:[#allocation29_spill] sm:$0xff] %v8070_v0  ;;  %v8086_v14 = vpack.c.b16 %v3649_v59, %v3648_v40  ;;  %v3446_v30 = vunpack.c.l.b16 %v3312_v55  ;;  %v8100_v39 = vld [vmem:[#allocation2 + $0x108] sm:$0xff]  ;;  %v3359_v33 = vpack.c.bf16 %v8049_v44, %v8049_v44  ;;  %v3360_v43 = vpack.c.bf16 %v3324_v8, %v3324_v8  ;;  %v3151_v8 = vld [vmem:[#allocation2 + $0x60] sm:$0xff] }
 0x3da   : > { %v8039_v48 = vpack.c.b16 %v3647_v10, %v3646_v18  ;;  %vm9968_vm9 = vmmov %vm9925_vm1  ;;  %v8076_v2 = vpack.c.b16 %v3876_v31, %v3875_v19  ;;  %v8080_v27 = vpack.c.b16 %v3442_v53, %v3441_v32  ;;  %v3310_v18 = vpack.c.bf16 %v7939_v54, %v7939_v54  ;;  %v8102_v62 = vld [vmem:[#allocation2 + $0x102] sm:$0xff]  ;;  %v3208_v23 = vld [vmem:[#allocation2 + $0x10a] sm:$0xff] }
 0x3db   : > { %vm9969_vm0 = vmmov %vm9925_vm1  ;;  %v3443_v10 = vunpack.c.l.b16 %v3309_v5  ;;  %v3311_v54 = vpack.c.bf16 %v7951_v1, %v7951_v1  ;;  %v3257_v63 = vpack.c.bf16 %v3221_v51, %v3221_v51  ;;  %v3258_v29 = vpack.c.bf16 %v3150_v26, %v3150_v26  ;;  %v9978_v44 = vld [vmem:[#allocation74_spill] sm:$0xff] }
 0x3dc   : > { %9970 = vst [vmem:[#allocation100_spill] sm:$0xff] %v8080_v27  ;;  %vm9971_vm13 = vmmov %vm9969_vm0  ;;  %v3444_v46 = vunpack.c.l.b16 %v3310_v18  ;;  %v3174_v1 = vld [vmem:[#allocation2 + $0x118] sm:$0xff]  ;;  %vm9977_vm11 = vnez %v9976_v58  ;;  %v3383_v38 = vpack.c.bf16 %v8102_v62, %v8102_v62  ;;  %v3877_v61 = vunpack.c.l.b16 %v3359_v33  ;;  %v9987_v55 = vld [vmem:[#allocation82_spill] sm:$0xff] }
 0x3dd   : > { %vm9972_vm2 = vmmov %vm9969_vm0  ;;  %v3445_v7 = vunpack.c.l.b16 %v3311_v54  ;;  %v3210_v20 = vld [vmem:[#allocation2 + $0x11a] sm:$0xff]  ;;  %v3348_v41 = vsel %vm9977_vm11, %v8100_v39, %v3208_v23  ;;  %v3209_v47 = vld [vmem:[#allocation2 + $0x112] sm:$0xff]  ;;  %v3878_v37 = vunpack.c.l.b16 %v3360_v43  ;;  %vm9979_vm8 = vnez %v9978_v44 }
 0x3de   : > { %v8092_v36 = vpack.c.b16 %v3444_v46, %v3443_v10  ;;  %v3384_v60 = vpack.c.bf16 %v3348_v41, %v3348_v41  ;;  %v4382_v5 = vunpack.c.l.b16 %v3383_v38  ;;  %v3350_v19 = vsel %vm9979_vm8, %v3174_v1, %v3210_v20  ;;  %vm9980_vm12 = vmmov %vm9969_vm0  ;;  %v3187_v54 = vld [vmem:[#allocation2 + $0x62] sm:$0xff]  ;;  %v3153_v38 = vld [vmem:[#allocation2 + $0x70] sm:$0xff] }
 0x3df   : > { %v8106_v52 = vpack.c.b16 %v3446_v30, %v3445_v7  ;;  %v3650_v13 = vunpack.c.l.b16 %v3257_v63  ;;  %v3651_v32 = vunpack.c.l.b16 %v3258_v29  ;;  %v3385_v40 = vpack.c.bf16 %v3209_v47, %v3209_v47  ;;  %vm9984_vm6 = vmmov %vm9969_vm0  ;;  %v3152_v51 = vld [vmem:[#allocation2 + $0x68] sm:$0xff]  ;;  %v9989_v7 = vld [vmem:[#allocation61_spill] sm:$0xff] }
 0x3e0   : > { %9974 = vst [vmem:[#allocation98_spill] sm:$0xff] %v8092_v36  ;;  %v4383_v31 = vunpack.c.l.b16 %v3384_v60  ;;  %v3386_v59 = vpack.c.bf16 %v3350_v19, %v3350_v19  ;;  %v8119_v18 = vpack.c.b16 %v3878_v37, %v3877_v61  ;;  %vm9985_vm15 = vmmov %vm9969_vm0  ;;  %vm9988_vm1 = vnez %v9987_v55  ;;  %v3189_v60 = vld [vmem:[#allocation2 + $0x72] sm:$0xff]  ;;  %v9995_v47 = vld [vmem:[#allocation85_spill] sm:$0xff] }
 0x3e1   : > { %5557 = vmatmul.msk.bf16.gmra.mxu1 %vm9958_vm7, %v7850_v16  ;;  %v8121_v10 = vunpack.c.l.b16 %v3385_v40  ;;  %v8129_v46 = vpack.c.b16 %v3651_v32, %v3650_v13  ;;  %vm9986_vm5 = vmmov %vm9969_vm0  ;;  %v3326_v42 = vsel %vm9988_vm1, %v3150_v26, %v3186_v45  ;;  %vm9990_vm14 = vnez %v9989_v7  ;;  %v3154_v37 = vld [vmem:[#allocation2 + $0x78] sm:$0xff]  ;;  %v5794_v55 = vld [vmem:[%s9329_s2 + $0x40] sm:$0xff] }
 0x3e2   : > { %5605 = vmatmul.msk.bf16.gmra.mxu3 %vm9961_vm4, %v8027_v50  ;;  %v8117_v53 = vpack.c.b16 %v4383_v31, %v4382_v5  ;;  %v8123_v21 = vunpack.c.l.b16 %v3386_v59  ;;  %v3223_v30 = vsel %vm9990_vm14, %v3187_v54, %v3151_v8  ;;  %v3361_v23 = vpack.c.bf16 %v3185_v9, %v3185_v9  ;;  %vm9991_vm7 = vmmov %vm9969_vm0  ;;  %v3188_v9 = vld [vmem:[#allocation2 + $0x6a] sm:$0xff]  ;;  %4266 = vmatpush.bf16.msrb.mxu1 %v5794_v55  ;;  %v3155_v7 = vld [vmem:[#allocation2 + $0x80] sm:$0xff] }
 0x3e3   : > { %9982 = vst [vmem:[#allocation24_spill] sm:$0xff] %v8121_v10  ;;  %v3362_v33 = vpack.c.bf16 %v3326_v42, %v3326_v42  ;;  %v3259_v43 = vpack.c.bf16 %v3223_v30, %v3223_v30  ;;  %v3260_v1 = vpack.c.bf16 %v3152_v51, %v3152_v51  ;;  %vm9993_vm4 = vmmov %vm9969_vm0  ;;  %v9997_v5 = vld [vmem:[#allocation67_spill] sm:$0xff]  ;;  %v3363_v19 = vpack.c.bf16 %v3187_v54, %v3187_v54  ;;  %v3191_v30 = vld [vmem:[#allocation2 + $0x82] sm:$0xff] }
 0x3e4   : > { %5581 = vmatmul.msk.bf16.gmra.mxu2 %vm9959_vm10, %v7997_v49  ;;  %9981 = vst [vmem:[#allocation99_spill] sm:$0xff] %v8117_v53  ;;  %v3879_v20 = vunpack.c.l.b16 %v3361_v23  ;;  %vm9992_vm10 = vmmov %vm9969_vm0  ;;  %v3262_v32 = vpack.c.bf16 %v3154_v37, %v3154_v37  ;;  %v10002_v23 = vld [vmem:[#allocation89_spill] sm:$0xff] }
 0x3e5   : > { %9983 = vst [vmem:[#allocation32_spill] sm:$0xff] %v8123_v21  ;;  %v3880_v63 = vunpack.c.l.b16 %v3362_v33  ;;  %v3652_v29 = vunpack.c.l.b16 %v3259_v43  ;;  %v3653_v58 = vunpack.c.l.b16 %v3260_v1  ;;  %v3881_v40 = vunpack.c.l.b16 %v3363_v19  ;;  %vm10000_vm11 = vmmov %vm9972_vm2  ;;  %v3156_v43 = vld [vmem:[#allocation2 + $0x88] sm:$0xff]  ;;  %v10004_v1 = vld [vmem:[#allocation19_spill] sm:$0xff] }
 0x3e6   : > { %5629 = vmatmul.msk.bf16.gmra.mxu0 %vm9962_vm3, %v8039_v48  ;;  %vm9994_vm3 = vmmov %vm9969_vm0  ;;  %v3655_v8 = vunpack.c.l.b16 %v3262_v32  ;;  %v3157_v19 = vld [vmem:[#allocation2 + $0x90] sm:$0xff] }
 0x3e7   : > { %v8141_v41 = vpack.c.b16 %v3880_v63, %v3879_v20  ;;  %v8147_v26 = vpack.c.b16 %v3653_v58, %v3652_v29  ;;  %vm10001_vm8 = vmmov %vm9972_vm2  ;;  %v3365_v63 = vpack.c.bf16 %v3189_v60, %v3189_v60 }
 0x3e8   : > { %vm10008_vm1 = vmmov %vm9972_vm2 }
 0x3e9   : > { %vm10009_vm14 = vmmov %vm10008_vm1 }
 0x3f1   : > { %5558 = vmatmul.msk.bf16.gmra.mxu1 %vm9968_vm9, %v8068_v22  ;;  %vm9996_vm9 = vnez %v9995_v47 }
 0x3f2   : > { %5606 = vmatmul.msk.bf16.gmra.mxu3 %vm9971_vm13, %v8076_v2  ;;  %v3328_v61 = vsel %vm9996_vm9, %v3152_v51, %v3188_v9  ;;  %vm9999_vm13 = vmmov %vm9972_vm2  ;;  %v3190_v51 = vld [vmem:[#allocation2 + $0x7a] sm:$0xff]  ;;  %v3264_v9 = vpack.c.bf16 %v3156_v43, %v3156_v43 }
 0x3f3   : > { %v3364_v31 = vpack.c.bf16 %v3328_v61, %v3328_v61  ;;  %vm10017_vm9 = vmmov %vm10008_vm1 }
 0x3f4   : > { %5582 = vmatmul.msk.bf16.gmra.mxu2 %vm9969_vm0, %v8039_v48  ;;  %vm9998_vm0 = vnez %v9997_v5  ;;  %v3657_v5 = vunpack.c.l.b16 %v3264_v9 }
 0x3f5   : > { %v3225_v44 = vsel %vm9998_vm0, %v3189_v60, %v3153_v38  ;;  %v3882_v59 = vunpack.c.l.b16 %v3364_v31  ;;  %v3883_v38 = vunpack.c.l.b16 %v3365_v63  ;;  %v3192_v60 = vld [vmem:[#allocation2 + $0x8a] sm:$0xff]  ;;  %v3193_v31 = vld [vmem:[#allocation2 + $0x92] sm:$0xff]  ;;  %vm10019_vm0 = vmmov %vm10008_vm1 }
 0x3f6   : > { %5630 = vmatmul.msk.bf16.gmra.mxu0 %vm9972_vm2, %v8086_v14  ;;  %v3261_v13 = vpack.c.bf16 %v3225_v44, %v3225_v44 }
 0x3f7   : > { %v8160_v42 = vpack.c.b16 %v3882_v59, %v3881_v40  ;;  %v3158_v40 = vld [vmem:[#allocation2 + $0x98] sm:$0xff]  ;;  %v10012_v59 = vld [vmem:[#allocation23_spill] sm:$0xff] }
 0x3f8   : > { %v3654_v45 = vunpack.c.l.b16 %v3261_v13  ;;  %v10010_v13 = vld [vmem:[#allocation93_spill] sm:$0xff] }
 0x3fa   : > { %v8166_v54 = vpack.c.b16 %v3655_v8, %v3654_v45  ;;  %v3367_v8 = vpack.c.bf16 %v3191_v30, %v3191_v30 }
 0x401   : > { %5559 = vmatmul.msk.bf16.gmra.mxu1 %vm9980_vm12, %v7969_v6  ;;  %vm10003_vm12 = vnez %v10002_v23 }
 0x402   : > { %5607 = vmatmul.msk.bf16.gmra.mxu3 %vm9985_vm15, %v8119_v18  ;;  %v3330_v33 = vsel %vm10003_vm12, %v3154_v37, %v3190_v51  ;;  %vm10006_vm15 = vmmov %vm9972_vm2 }
 0x403   : > { %v3366_v29 = vpack.c.bf16 %v3330_v33, %v3330_v33  ;;  %v3885_v33 = vunpack.c.l.b16 %v3367_v8  ;;  %vm10027_vm12 = vmmov %vm10019_vm0 }
 0x404   : > { %5583 = vmatmul.msk.bf16.gmra.mxu2 %vm9984_vm6, %v8086_v14  ;;  %vm10005_vm6 = vnez %v10004_v1 }
 0x405   : > { %v3227_v20 = vsel %vm10005_vm6, %v3191_v30, %v3155_v7  ;;  %v3884_v47 = vunpack.c.l.b16 %v3366_v29  ;;  %v3266_v7 = vpack.c.bf16 %v3158_v40, %v3158_v40  ;;  %vm10029_vm6 = vmmov %vm10019_vm0 }
 0x406   : > { %5631 = vmatmul.msk.bf16.gmra.mxu0 %vm9986_vm5, %v8129_v46  ;;  %v3263_v58 = vpack.c.bf16 %v3227_v20, %v3227_v20  ;;  %vm10007_vm5 = vmmov %vm9972_vm2 }
 0x407   : > { %v8176_v44 = vpack.c.b16 %v3884_v47, %v3883_v38  ;;  %v3659_v63 = vunpack.c.l.b16 %v3266_v7  ;;  %v3159_v47 = vld [vmem:[#allocation2 + $0xa0] sm:$0xff] }
 0x408   : > { %v3656_v61 = vunpack.c.l.b16 %v3263_v58 }
 0x40a   : > { %v8182_v37 = vpack.c.b16 %v3657_v5, %v3656_v61  ;;  %v3195_v61 = vld [vmem:[#allocation2 + $0xa2] sm:$0xff] }
 0x411   : > { %5560 = vmatmul.msk.bf16.gmra.mxu1 %vm9991_vm7, %v7989_v11  ;;  %vm10011_vm7 = vnez %v10010_v13 }
 0x412   : > { %5608 = vmatmul.msk.bf16.gmra.mxu3 %vm9993_vm4, %v8141_v41  ;;  %v3332_v32 = vsel %vm10011_vm7, %v3156_v43, %v3192_v60  ;;  %vm10014_vm4 = vmmov %vm10008_vm1  ;;  %v3194_v43 = vld [vmem:[#allocation2 + $0x9a] sm:$0xff] }
 0x413   : > { %v3368_v55 = vpack.c.bf16 %v3332_v32, %v3332_v32  ;;  %vm10037_vm7 = vmmov %vm10019_vm0 }
 0x414   : > { %5584 = vmatmul.msk.bf16.gmra.mxu2 %vm9992_vm10, %v8129_v46  ;;  %vm10013_vm10 = vnez %v10012_v59  ;;  %v3160_v59 = vld [vmem:[#allocation2 + $0xa8] sm:$0xff] }
 0x415   : > { %v3229_v45 = vsel %vm10013_vm10, %v3193_v31, %v3157_v19  ;;  %v3886_v1 = vunpack.c.l.b16 %v3368_v55  ;;  %v10020_v19 = vld [vmem:[#allocation97_spill] sm:$0xff]  ;;  %v3369_v55 = vpack.c.bf16 %v3193_v31, %v3193_v31  ;;  %vm10039_vm10 = vmmov %vm10019_vm0 }
 0x416   : > { %5632 = vmatmul.msk.bf16.gmra.mxu0 %vm9994_vm3, %v8147_v26  ;;  %v3265_v51 = vpack.c.bf16 %v3229_v45, %v3229_v45  ;;  %vm10016_vm3 = vmmov %vm10008_vm1  ;;  %v10022_v45 = vld [vmem:[#allocation31_spill] sm:$0xff] }
 0x417   : > { %v8192_v29 = vpack.c.b16 %v3886_v1, %v3885_v33  ;;  %v3268_v1 = vpack.c.bf16 %v3160_v59, %v3160_v59  ;;  %v3887_v35 = vunpack.c.l.b16 %v3369_v55  ;;  %v10030_v55 = vld [vmem:[#allocation101_spill] sm:$0xff] }
 0x418   : > { %v3658_v20 = vunpack.c.l.b16 %v3265_v51 }
 0x419   : > { %10015 = vst [vmem:[#allocation54_spill] sm:$0xff] %v8192_v29 }
 0x41a   : > { %v8200_v30 = vpack.c.b16 %v3659_v63, %v3658_v20 }
 0x41c   : > { %10018 = vst [vmem:[#allocation106_spill] sm:$0xff] %v8200_v30 }
 0x421   : > { %5561 = vmatmul.msk.bf16.gmra.mxu1 %vm9999_vm13, %v8005_v17  ;;  %vm10021_vm13 = vnez %v10020_v19 }
 0x422   : > { %5609 = vmatmul.msk.bf16.gmra.mxu3 %vm10000_vm11, %v8160_v42  ;;  %v3334_v13 = vsel %vm10021_vm13, %v3158_v40, %v3194_v43  ;;  %v3661_v40 = vunpack.c.l.b16 %v3268_v1  ;;  %vm10024_vm11 = vmmov %vm10019_vm0  ;;  %v3162_v1 = vld [vmem:[#allocation2 + $0xb8] sm:$0xff] }
 0x423   : > { %v3370_v51 = vpack.c.bf16 %v3334_v13, %v3334_v13  ;;  %v3270_v21 = vpack.c.bf16 %v3162_v1, %v3162_v1  ;;  %vm10047_vm13 = vmmov %vm10019_vm0 }
 0x424   : > { %5585 = vmatmul.msk.bf16.gmra.mxu2 %vm9972_vm2, %v8147_v26  ;;  %vm10023_vm2 = vnez %v10022_v45  ;;  %v3197_v45 = vld [vmem:[#allocation2 + $0xb2] sm:$0xff] }
 0x425   : > { %v3231_v8 = vsel %vm10023_vm2, %v3195_v61, %v3159_v47  ;;  %vm10049_vm2 = vmmov %vm10019_vm0 }
 0x426   : > { %5633 = vmatmul.msk.bf16.gmra.mxu0 %vm10001_vm8, %v8166_v54  ;;  %v3267_v33 = vpack.c.bf16 %v3231_v8, %v3231_v8  ;;  %vm10026_vm8 = vmmov %vm10019_vm0 }
 0x428   : > { %v3660_v19 = vunpack.c.l.b16 %v3267_v33 }
 0x431   : > { %5562 = vmatmul.msk.bf16.gmra.mxu1 %vm10006_vm15, %v8015_v25  ;;  %vm10031_vm15 = vnez %v10030_v55 }
 0x432   : > { %5610 = vmatmul.msk.bf16.gmra.mxu3 %vm10008_vm1, %v8176_v44  ;;  %vm10034_vm1 = vmmov %vm10019_vm0 }
 0x434   : > { %5586 = vmatmul.msk.bf16.gmra.mxu2 %vm10007_vm5, %v8166_v54 }
 0x436   : > { %5634 = vmatmul.msk.bf16.gmra.mxu0 %vm10009_vm14, %v8182_v37  ;;  %vm10036_vm14 = vmmov %vm10019_vm0 }
 0x43c   : > { %v3528_v23 = vpop.f32.mrf.mxu1 }
 0x441   : > { %5563 = vmatmul.msk.bf16.gmra.mxu1 %vm10014_vm4, %v8021_v3 }
 0x442   : > { %5611 = vmatmul.msk.bf16.gmra.mxu3 %vm10017_vm9, %v8192_v29  ;;  %vm10045_vm9 = vmmov %vm10019_vm0 }
 0x443   : > { %v8194_v58 = vpop.f32.mrf.mxu0 }
 0x444   : > { %5587 = vmatmul.msk.bf16.gmra.mxu2 %vm10016_vm3, %v8182_v37  ;;  %v3530_v9 = vpop.f32.mrf.mxu1 }
 0x445   : > { %v3757_v38 = vpop.f32.mrf.mxu2  ;;  %v3986_v60 = vpop.f32.mrf.mxu3 }
 0x446   : > { %5635 = vmatmul.msk.bf16.gmra.mxu0 %vm10019_vm0, %v8200_v30  ;;  %v3758_v5 = vadd.f32 %v3757_v38, %v3528_v23  ;;  %v3888_v23 = vunpack.c.l.b16 %v3370_v51 }
 0x448   : > { %v8206_v32 = vadd.f32 %v3986_v60, %v3758_v5  ;;  %v8216_v47 = vpack.c.b16 %v3888_v23, %v3887_v35  ;;  %v8224_v5 = vpack.c.b16 %v3661_v40, %v3660_v19 }
 0x44a   : > { %10025 = vst [vmem:[#allocation63_spill] sm:$0xff] %v8216_v47 }
 0x44b   : > { %v8210_v7 = vpop.f32.mrf.mxu0  ;;  %10028 = vst [vmem:[#allocation64_spill] sm:$0xff] %v8224_v5 }
 0x44d   : > { %v3759_v63 = vpop.f32.mrf.mxu2  ;;  %v3988_v4 = vpop.f32.mrf.mxu3 }
 0x44e   : > { %v3533_v20 = vpop.f32.mrf.mxu1  ;;  %v3760_v38 = vadd.f32 %v3759_v63, %v3530_v9  ;;  %v3196_v9 = vld [vmem:[#allocation2 + $0xaa] sm:$0xff] }
 0x44f   : > { %v3336_v51 = vsel %vm10031_vm15, %v3160_v59, %v3196_v9  ;;  %v10032_v63 = vld [vmem:[#allocation38_spill] sm:$0xff]  ;;  %v3663_v59 = vunpack.c.l.b16 %v3270_v21  ;;  %vm10058_vm15 = vmmov %vm10019_vm0 }
 0x450   : > { %v8214_v43 = vadd.f32 %v3988_v4, %v3760_v38  ;;  %v3161_v4 = vld [vmem:[#allocation2 + $0xb0] sm:$0xff]  ;;  %vm10033_vm5 = vnez %v10032_v63  ;;  %v3371_v38 = vpack.c.bf16 %v3195_v61, %v3195_v61  ;;  %v3372_v19 = vpack.c.bf16 %v3336_v51, %v3336_v51  ;;  %v10040_v51 = vld [vmem:[#allocation102_spill] sm:$0xff] }
 0x451   : > { %5564 = vmatmul.msk.bf16.gmra.mxu1 %vm10024_vm11, %v8033_v56  ;;  %v3233_v23 = vsel %vm10033_vm5, %v3197_v45, %v3161_v4  ;;  %vm10041_vm4 = vnez %v10040_v51  ;;  %vm10060_vm5 = vmmov %vm10019_vm0 }
 0x452   : > { %5612 = vmatmul.msk.bf16.gmra.mxu3 %vm10027_vm12, %v8216_v47  ;;  %v3269_v10 = vpack.c.bf16 %v3233_v23, %v3233_v23  ;;  %v3889_v28 = vunpack.c.l.b16 %v3371_v38  ;;  %v3164_v38 = vld [vmem:[#allocation2 + $0xc8] sm:$0xff]  ;;  %vm10055_vm12 = vmmov %vm10019_vm0 }
 0x453   : > { %v8218_v31 = vpop.f32.mrf.mxu0 }
 0x454   : > { %5588 = vmatmul.msk.bf16.gmra.mxu2 %vm10026_vm8, %v8200_v30  ;;  %v3662_v55 = vunpack.c.l.b16 %v3269_v10 }
 0x455   : > { %v3991_v8 = vpop.f32.mrf.mxu3 }
 0x456   : > { %v3535_v60 = vpop.f32.mrf.mxu1  ;;  %5636 = vmatmul.msk.bf16.gmra.mxu0 %vm10029_vm6, %v8224_v5  ;;  %vm10057_vm6 = vmmov %vm10019_vm0 }
 0x457   : > { %v3762_v13 = vpop.f32.mrf.mxu2 }
 0x458   : > { %v3763_v35 = vadd.f32 %v3762_v13, %v3533_v20  ;;  %v3890_v20 = vunpack.c.l.b16 %v3372_v19  ;;  %v10042_v19 = vld [vmem:[#allocation45_spill] sm:$0xff] }
 0x459   : > { %vm10043_vm3 = vnez %v10042_v19 }
 0x45a   : > { %v8230_v33 = vadd.f32 %v3991_v8, %v3763_v35  ;;  %v8240_v4 = vpack.c.b16 %v3890_v20, %v3889_v28  ;;  %v8248_v35 = vpack.c.b16 %v3663_v59, %v3662_v55 }
 0x45b   : > { %v8234_v40 = vpop.f32.mrf.mxu0 }
 0x45c   : > { %10035 = vst [vmem:[#allocation6_spill] sm:$0xff] %v8240_v4 }
 0x45d   : > { %v3993_v47 = vpop.f32.mrf.mxu3  ;;  %10038 = vst [vmem:[#allocation70_spill] sm:$0xff] %v8248_v35 }
 0x45e   : > { %v3538_v53 = vpop.f32.mrf.mxu1 }
 0x45f   : > { %v3764_v24 = vpop.f32.mrf.mxu2 }
 0x460   : > { %v3765_v13 = vadd.f32 %v3764_v24, %v3535_v60  ;;  %v3198_v24 = vld [vmem:[#allocation2 + $0xba] sm:$0xff]  ;;  %v3199_v60 = vld [vmem:[#allocation2 + $0xc2] sm:$0xff] }
 0x461   : > { %5565 = vmatmul.msk.bf16.gmra.mxu1 %vm10034_vm1, %v8053_v12  ;;  %v3338_v63 = vsel %vm10041_vm4, %v3162_v1, %v3198_v24  ;;  %v3272_v12 = vpack.c.bf16 %v3164_v38, %v3164_v38  ;;  %vm10069_vm4 = vmmov %vm10019_vm0 }
 0x462   : > { %v8238_v9 = vadd.f32 %v3993_v47, %v3765_v13  ;;  %5613 = vmatmul.msk.bf16.gmra.mxu3 %vm10037_vm7, %v8240_v4  ;;  %v3163_v47 = vld [vmem:[#allocation2 + $0xc0] sm:$0xff]  ;;  %v3373_v13 = vpack.c.bf16 %v3197_v45, %v3197_v45  ;;  %v3374_v55 = vpack.c.bf16 %v3338_v63, %v3338_v63  ;;  %vm10066_vm7 = vmmov %vm10019_vm0 }
 0x463   : > { %v8242_v61 = vpop.f32.mrf.mxu0  ;;  %v3235_v20 = vsel %vm10043_vm3, %v3199_v60, %v3163_v47  ;;  %vm10071_vm3 = vmmov %vm10019_vm0 }
 0x464   : > { %5589 = vmatmul.msk.bf16.gmra.mxu2 %vm10036_vm14, %v8224_v5  ;;  %v3271_v4 = vpack.c.bf16 %v3235_v20, %v3235_v20  ;;  %v3891_v30 = vunpack.c.l.b16 %v3373_v13  ;;  %v10050_v20 = vld [vmem:[#allocation103_spill] sm:$0xff] }
 0x465   : > { %v3996_v8 = vpop.f32.mrf.mxu3  ;;  %vm10051_vm11 = vnez %v10050_v20 }
 0x466   : > { %v3540_v10 = vpop.f32.mrf.mxu1  ;;  %5637 = vmatmul.msk.bf16.gmra.mxu0 %vm10039_vm10, %v8248_v35  ;;  %vm10068_vm10 = vmmov %vm10019_vm0 }
 0x467   : > { %v3767_v21 = vpop.f32.mrf.mxu2 }
 0x468   : > { %v3768_v28 = vadd.f32 %v3767_v21, %v3538_v53  ;;  %v3892_v53 = vunpack.c.l.b16 %v3374_v55  ;;  %v8262_v21 = vadd.f32 %v8194_v58, %v8206_v32 }
 0x46a   : > { %v8254_v23 = vadd.f32 %v3996_v8, %v3768_v28  ;;  %10044 = vst [vmem:[#allocation105_spill] sm:$0xff] %v8262_v21  ;;  %v3664_v28 = vunpack.c.l.b16 %v3271_v4  ;;  %v3665_v8 = vunpack.c.l.b16 %v3272_v12  ;;  %v8268_v47 = vpack.c.b16 %v3892_v53, %v3891_v30  ;;  %v3165_v4 = vld [vmem:[#allocation2 + $0xd0] sm:$0xff]  ;;  %v3166_v53 = vld [vmem:[#allocation2 + $0xd8] sm:$0xff] }
 0x46b   : > { %v8258_v59 = vpop.f32.mrf.mxu0  ;;  %v8282_v30 = vadd.f32 %v8210_v7, %v8214_v43 }
 0x46c   : > { %10046 = vst [vmem:[#allocation107_spill] sm:$0xff] %v8268_v47  ;;  %v8276_v58 = vpack.c.b16 %v3665_v8, %v3664_v28  ;;  %v3375_v28 = vpack.c.bf16 %v3199_v60, %v3199_v60 }
 0x46d   : > { %v3998_v24 = vpop.f32.mrf.mxu3 }
 0x46e   : > { %v3543_v5 = vpop.f32.mrf.mxu1  ;;  %10048 = vst [vmem:[#allocation66_spill] sm:$0xff] %v8276_v58  ;;  %v3893_v43 = vunpack.c.l.b16 %v3375_v28 }
 0x46f   : > { %v3769_v56 = vpop.f32.mrf.mxu2 }
 0x470   : > { %v3770_v1 = vadd.f32 %v3769_v56, %v3540_v10  ;;  %v3200_v56 = vld [vmem:[#allocation2 + $0xca] sm:$0xff]  ;;  %v3201_v10 = vld [vmem:[#allocation2 + $0xd2] sm:$0xff] }
 0x471   : > { %5566 = vmatmul.msk.bf16.gmra.mxu1 %vm10045_vm9, %v8062_v57  ;;  %v3340_v13 = vsel %vm10051_vm11, %v3164_v38, %v3200_v56  ;;  %vm10078_vm11 = vmmov %vm10049_vm2 }
 0x472   : > { %v8266_v45 = vadd.f32 %v3998_v24, %v3770_v1  ;;  %5614 = vmatmul.msk.bf16.gmra.mxu3 %vm10047_vm13, %v8268_v47  ;;  %v10052_v1 = vld [vmem:[#allocation52_spill] sm:$0xff]  ;;  %v3376_v8 = vpack.c.bf16 %v3340_v13, %v3340_v13  ;;  %v3203_v13 = vld [vmem:[#allocation2 + $0xe2] sm:$0xff]  ;;  %vm10076_vm13 = vmmov %vm10049_vm2 }
 0x473   : > { %v8270_v51 = vpop.f32.mrf.mxu0  ;;  %vm10053_vm8 = vnez %v10052_v1  ;;  %v8314_v1 = vadd.f32 %v8234_v40, %v8238_v9 }
 0x474   : > { %5590 = vmatmul.msk.bf16.gmra.mxu2 %vm10019_vm0, %v8248_v35  ;;  %v3237_v24 = vsel %vm10053_vm8, %v3201_v10, %v3165_v4  ;;  %v3274_v35 = vpack.c.bf16 %v3166_v53, %v3166_v53  ;;  %vm10079_vm8 = vmmov %vm10049_vm2 }
 0x475   : > { %v4001_v19 = vpop.f32.mrf.mxu3  ;;  %v3273_v57 = vpack.c.bf16 %v3237_v24, %v3237_v24 }
 0x476   : > { %v3545_v32 = vpop.f32.mrf.mxu1  ;;  %5638 = vmatmul.msk.bf16.gmra.mxu0 %vm10049_vm2, %v8276_v58 }
 0x477   : > { %v3772_v12 = vpop.f32.mrf.mxu2 }
 0x478   : > { %v3773_v63 = vadd.f32 %v3772_v12, %v3543_v5  ;;  %v3894_v5 = vunpack.c.l.b16 %v3376_v8  ;;  %v8294_v12 = vadd.f32 %v8218_v31, %v8230_v33  ;;  %v3202_v33 = vld [vmem:[#allocation2 + $0xda] sm:$0xff] }
 0x479   : > { %v10061_v8 = vld [vmem:[#allocation104_spill] sm:$0xff] }
 0x47a   : > { %v8286_v55 = vadd.f32 %v4001_v19, %v3773_v63  ;;  %10054 = vst [vmem:[#allocation72_spill] sm:$0xff] %v8294_v12  ;;  %v3666_v63 = vunpack.c.l.b16 %v3273_v57  ;;  %v3667_v19 = vunpack.c.l.b16 %v3274_v35  ;;  %v8300_v4 = vpack.c.b16 %v3894_v5, %v3893_v43  ;;  %v3168_v5 = vld [vmem:[#allocation2 + $0xe8] sm:$0xff] }
 0x47b   : > { %v8290_v47 = vpop.f32.mrf.mxu0  ;;  %vm10062_vm1 = vnez %v10061_v8 }
 0x47c   : > { %10056 = vst [vmem:[#allocation110_spill] sm:$0xff] %v8300_v4  ;;  %v8308_v31 = vpack.c.b16 %v3667_v19, %v3666_v63  ;;  %v3377_v63 = vpack.c.bf16 %v3201_v10, %v3201_v10 }
 0x47d   : > { %v4003_v56 = vpop.f32.mrf.mxu3 }
 0x47e   : > { %v3548_v21 = vpop.f32.mrf.mxu1  ;;  %10059 = vst [vmem:[#allocation78_spill] sm:$0xff] %v8308_v31  ;;  %v3895_v9 = vunpack.c.l.b16 %v3377_v63  ;;  %v8352_v63 = vadd.f32 %v8258_v59, %v8266_v45 }
 0x47f   : > { %v3774_v7 = vpop.f32.mrf.mxu2 }
 0x480   : > { %v3775_v38 = vadd.f32 %v3774_v7, %v3545_v32  ;;  %v3167_v32 = vld [vmem:[#allocation2 + $0xe0] sm:$0xff]  ;;  %v3342_v7 = vsel %vm10062_vm1, %v3166_v53, %v3202_v33  ;;  %vm10087_vm1 = vmmov %vm10049_vm2 }
 0x481   : > { %5567 = vmatmul.msk.bf16.gmra.mxu1 %vm10055_vm12, %v8070_v0  ;;  %v3378_v19 = vpack.c.bf16 %v3342_v7, %v3342_v7 }
 0x482   : > { %v8298_v60 = vadd.f32 %v4003_v56, %v3775_v38  ;;  %5615 = vmatmul.msk.bf16.gmra.mxu3 %vm10058_vm15, %v8300_v4  ;;  %v10063_v38 = vld [vmem:[#allocation62_spill] sm:$0xff]  ;;  %vm10084_vm15 = vmmov %vm10049_vm2 }
 0x483   : > { %v8302_v20 = vpop.f32.mrf.mxu0  ;;  %vm10064_vm14 = vnez %v10063_v38  ;;  %v3205_v38 = vld [vmem:[#allocation2 + $0xf2] sm:$0xff] }
 0x484   : > { %5591 = vmatmul.msk.bf16.gmra.mxu2 %vm10057_vm6, %v8276_v58  ;;  %v3239_v56 = vsel %vm10064_vm14, %v3203_v13, %v3167_v32  ;;  %v3276_v58 = vpack.c.bf16 %v3168_v5, %v3168_v5  ;;  %v5797_v32 = vld [vmem:[%s9329_s2 + $0x58] sm:$0xff]  ;;  %vm10088_vm14 = vmmov %vm10087_vm1 }
 0x485   : > { %v4006_v28 = vpop.f32.mrf.mxu3  ;;  %v3275_v0 = vpack.c.bf16 %v3239_v56, %v3239_v56  ;;  %4406 = vmatpush.bf16.msra.mxu2 %v5797_v32  ;;  %v5799_v56 = vld [vmem:[%s9329_s2 + $0x68] sm:$0xff]  ;;  %v3379_v32 = vpack.c.bf16 %v3203_v13, %v3203_v13 }
 0x486   : > { %v3550_v57 = vpop.f32.mrf.mxu1  ;;  %5639 = vmatmul.msk.bf16.gmra.mxu0 %vm10060_vm5, %v8308_v31  ;;  %4547 = vmatpush.bf16.msra.mxu3 %v5799_v56  ;;  %vm10086_vm5 = vmmov %vm10049_vm2 }
 0x487   : > { %v3777_v35 = vpop.f32.mrf.mxu2 }
 0x488   : > { %v3778_v24 = vadd.f32 %v3777_v35, %v3548_v21  ;;  %v3896_v21 = vunpack.c.l.b16 %v3378_v19  ;;  %v8326_v35 = vadd.f32 %v8242_v61, %v8254_v23  ;;  %v3204_v61 = vld [vmem:[#allocation2 + $0xea] sm:$0xff] }
 0x48a   : > { %v8318_v43 = vadd.f32 %v4006_v28, %v3778_v24  ;;  %10065 = vst [vmem:[#allocation90_spill] sm:$0xff] %v8326_v35  ;;  %v3668_v24 = vunpack.c.l.b16 %v3275_v0  ;;  %v3669_v28 = vunpack.c.l.b16 %v3276_v58  ;;  %v8335_v8 = vpack.c.b16 %v3896_v21, %v3895_v9  ;;  %v10072_v9 = vld [vmem:[#allocation53_spill] sm:$0xff] }
 0x48b   : > { %v8322_v4 = vpop.f32.mrf.mxu0  ;;  %vm10073_vm9 = vnez %v10072_v9 }
 0x48c   : > { %10067 = vst [vmem:[#allocation92_spill] sm:$0xff] %v8335_v8  ;;  %v8343_v0 = vpack.c.b16 %v3669_v28, %v3668_v24  ;;  %v3344_v21 = vsel %vm10073_vm9, %v3168_v5, %v3204_v61  ;;  %v10074_v24 = vld [vmem:[#allocation68_spill] sm:$0xff]  ;;  %v8367_v61 = vadd.f32 %v8270_v51, %v8286_v55  ;;  %vm10093_vm9 = vmmov %vm10087_vm1 }
 0x48d   : > { %v4008_v33 = vpop.f32.mrf.mxu3  ;;  %vm10075_vm0 = vnez %v10074_v24  ;;  %v5801_v5 = vld [vmem:[%s9329_s2 + $0x78] sm:$0xff]  ;;  %v5796_v24 = vld [vmem:[%s9329_s2 + $0x50] sm:$0xff] }
 0x48e   : > { %v3553_v12 = vpop.f32.mrf.mxu1  ;;  %10070 = vst [vmem:[#allocation91_spill] sm:$0xff] %v8343_v0  ;;  %4680 = vmatpush.bf16.msra.mxu0 %v5801_v5  ;;  %v3206_v55 = vld [vmem:[#allocation2 + $0xfa] sm:$0xff]  ;;  %4407 = vmatpush.bf16.msra.mxu2 %v5796_v24 }
 0x48f   : > { %v3779_v40 = vpop.f32.mrf.mxu2  ;;  %v10080_v5 = vld [vmem:[#allocation108_spill] sm:$0xff] }
 0x490   : > { %v3780_v53 = vadd.f32 %v3779_v40, %v3550_v57  ;;  %v3169_v57 = vld [vmem:[#allocation2 + $0xf0] sm:$0xff]  ;;  %vm10081_vm12 = vnez %v10080_v5 }
 0x491   : > { %5568 = vmatmul.msk.bf16.gmra.mxu1 %vm10066_vm7, %v8080_v27  ;;  %v3241_v28 = vsel %vm10075_vm0, %v3205_v38, %v3169_v57  ;;  %vm10089_vm7 = vmmov %vm10087_vm1 }
 0x492   : > { %v8330_v10 = vadd.f32 %v4008_v33, %v3780_v53  ;;  %5616 = vmatmul.msk.bf16.gmra.mxu3 %vm10069_vm4, %v8335_v8  ;;  %v3170_v33 = vld [vmem:[#allocation2 + $0xf8] sm:$0xff]  ;;  %v3380_v8 = vpack.c.bf16 %v3344_v21, %v3344_v21  ;;  %vm10091_vm4 = vmmov %vm10087_vm1 }
 0x493   : > { %v8337_v7 = vpop.f32.mrf.mxu0  ;;  %v3278_v35 = vpack.c.bf16 %v3170_v33, %v3170_v33  ;;  %vm10094_vm0 = vmmov %vm10087_vm1 }
 0x494   : > { %5592 = vmatmul.msk.bf16.gmra.mxu2 %vm10068_vm10, %v8308_v31  ;;  %v3277_v31 = vpack.c.bf16 %v3241_v28, %v3241_v28  ;;  %v5798_v28 = vld [vmem:[%s9329_s2 + $0x60] sm:$0xff]  ;;  %vm10090_vm10 = vmmov %vm10087_vm1 }
 0x495   : > { %v4011_v40 = vpop.f32.mrf.mxu3  ;;  %4548 = vmatpush.bf16.msra.mxu3 %v5798_v28 }
 0x496   : > { %v3555_v23 = vpop.f32.mrf.mxu1  ;;  %5640 = vmatmul.msk.bf16.gmra.mxu0 %vm10071_vm3, %v8343_v0  ;;  %v3670_v13 = vunpack.c.l.b16 %v3277_v31  ;;  %v3171_v31 = vld [vmem:[#allocation2 + $0x100] sm:$0xff]  ;;  %vm10092_vm3 = vmmov %vm10087_vm1 }
 0x497   : > { %v3782_v58 = vpop.f32.mrf.mxu2 }
 0x498   : > { %v3783_v19 = vadd.f32 %v3782_v58, %v3553_v12  ;;  %v3897_v12 = vunpack.c.l.b16 %v3379_v32  ;;  %v3898_v58 = vunpack.c.l.b16 %v3380_v8  ;;  %v5803_v8 = vld [vmem:[%s9329_s2 + $0x88] sm:$0xff]  ;;  %v5800_v32 = vld [vmem:[%s9329_s2 + $0x70] sm:$0xff] }
 0x499   : > { %4821 = vmatpush.bf16.msra.mxu1 %v5803_v8  ;;  %4681 = vmatpush.bf16.msra.mxu0 %v5800_v32  ;;  %v3381_v8 = vpack.c.bf16 %v3205_v38, %v3205_v38 }
 0x49a   : > { %v8356_v53 = vadd.f32 %v4011_v40, %v3783_v19  ;;  %v3671_v19 = vunpack.c.l.b16 %v3278_v35  ;;  %v8376_v9 = vpack.c.b16 %v3898_v58, %v3897_v12 }
 0x49b   : > { %v8360_v27 = vpop.f32.mrf.mxu0 }
 0x49c   : > { %10077 = vst [vmem:[#allocation39_spill] sm:$0xff] %v8376_v9  ;;  %v8384_v51 = vpack.c.b16 %v3671_v19, %v3670_v13  ;;  %v10082_v13 = vld [vmem:[#allocation109_spill] sm:$0xff] }
 0x49d   : > { %v4013_v57 = vpop.f32.mrf.mxu3  ;;  %vm10083_vm6 = vnez %v10082_v13 }
 0x49e   : > { %v3558_v59 = vpop.f32.mrf.mxu1  ;;  %v3243_v19 = vsel %vm10083_vm6, %v8102_v62, %v3171_v31  ;;  %vm10100_vm6 = vmmov %vm10094_vm0 }
 0x49f   : > { %v3784_v45 = vpop.f32.mrf.mxu2 }
 0x4a0   : > { %v3785_v56 = vadd.f32 %v3784_v45, %v3555_v23  ;;  %v8399_v45 = vadd.f32 %v8290_v47, %v8298_v60  ;;  %v3280_v47 = vpack.c.bf16 %v8100_v39, %v8100_v39 }
 0x4a1   : > { %5569 = vmatmul.msk.bf16.gmra.mxu1 %vm10076_vm13, %v8092_v36  ;;  %vm10095_vm13 = vmmov %vm10094_vm0 }
 0x4a2   : > { %v8371_v40 = vadd.f32 %v4013_v57, %v3785_v56  ;;  %5617 = vmatmul.msk.bf16.gmra.mxu3 %vm10078_vm11, %v8376_v9  ;;  %v3346_v56 = vsel %vm10081_vm12, %v3170_v33, %v3206_v55  ;;  %v8410_v33 = vadd.f32 %v8302_v20, %v8318_v43  ;;  %v4101_v62 = vunpack.c.l.b16 %v3280_v47  ;;  %vm10097_vm11 = vmmov %vm10094_vm0 }
 0x4a3   : > { %v8378_v21 = vpop.f32.mrf.mxu0  ;;  %v3382_v9 = vpack.c.bf16 %v3346_v56, %v3346_v56  ;;  %vm10099_vm12 = vmmov %vm10094_vm0 }
 0x4a4   : > { %5593 = vmatmul.msk.bf16.gmra.mxu2 %vm10049_vm2, %v8343_v0  ;;  %v3279_v0 = vpack.c.bf16 %v3243_v19, %v3243_v19  ;;  %v8430_v19 = vadd.f32 %v8337_v7, %v8356_v53  ;;  %v8442_v7 = vadd.f32 %v8360_v27, %v8371_v40  ;;  %vm10096_vm2 = vmmov %vm10094_vm0 }
 0x4a5   : > { %v4016_v58 = vpop.f32.mrf.mxu3  ;;  %v3900_v5 = vunpack.c.l.b16 %v3382_v9 }
 0x4a6   : > { %v3560_v35 = vpop.f32.mrf.mxu1  ;;  %5641 = vmatmul.msk.bf16.gmra.mxu0 %vm10079_vm8, %v8384_v51  ;;  %v4100_v28 = vunpack.c.l.b16 %v3279_v0  ;;  %v8426_v0 = vadd.f32 %v8322_v4, %v8330_v10  ;;  %vm10098_vm8 = vmmov %vm10094_vm0 }
 0x4a7   : > { %v3787_v23 = vpop.f32.mrf.mxu2 }
 0x4a8   : > { %v3788_v12 = vadd.f32 %v3787_v23, %v3558_v59  ;;  %v3899_v23 = vunpack.c.l.b16 %v3381_v8  ;;  %v8420_v39 = vpack.c.b16 %v4101_v62, %v4100_v28 }
 0x4aa   : > { %v4078_v57 = vadd.f32 %v4016_v58, %v3788_v12  ;;  %v8414_v31 = vpack.c.b16 %v3900_v5, %v3899_v23 }
 0x4ab   : > { %v4159_v36 = vpop.f32.mrf.mxu0 }
 0x4ac   : > { %10085 = vst [vmem:[#allocation80_spill] sm:$0xff] %v8414_v31 }
 0x4ad   : > { %v4018_v24 = vpop.f32.mrf.mxu3 }
 0x4ae   : > { %v3563_v60 = vpop.f32.mrf.mxu1 }
 0x4af   : > { %v3789_v59 = vpop.f32.mrf.mxu2 }
 0x4b0   : > { %v3790_v55 = vadd.f32 %v3789_v59, %v3560_v35 }
 0x4b1   : > { %5570 = vmatmul.msk.bf16.gmra.mxu1 %vm10084_vm15, %v8106_v52  ;;  %vm10101_vm15 = vmmov %vm10094_vm0 }
 0x4b2   : > { %v4079_v38 = vadd.f32 %v4018_v24, %v3790_v55  ;;  %5618 = vmatmul.msk.bf16.gmra.mxu3 %vm10087_vm1, %v8414_v31  ;;  %vm10103_vm1 = vmmov %vm10094_vm0 }
 0x4b3   : > { %v4162_v32 = vpop.f32.mrf.mxu0 }
 0x4b4   : > { %5594 = vmatmul.msk.bf16.gmra.mxu2 %vm10086_vm5, %v8384_v51  ;;  %vm10102_vm5 = vmmov %vm10094_vm0 }
 0x4b5   : > { %v4021_v35 = vpop.f32.mrf.mxu3 }
 0x4b6   : > { %v3565_v20 = vpop.f32.mrf.mxu1  ;;  %5642 = vmatmul.msk.bf16.gmra.mxu0 %vm10088_vm14, %v8420_v39  ;;  %vm10104_vm14 = vmmov %vm10094_vm0 }
 0x4b7   : > { %v3792_v43 = vpop.f32.mrf.mxu2 }
 0x4b8   : > { %v3793_v9 = vadd.f32 %v3792_v43, %v3563_v60 }
 0x4ba   : > { %v4080_v12 = vadd.f32 %v4021_v35, %v3793_v9 }
 0x4bb   : > { %v4164_v58 = vpop.f32.mrf.mxu0 }
 0x4bd   : > { %v4023_v47 = vpop.f32.mrf.mxu3 }
 0x4be   : > { %v3568_v56 = vpop.f32.mrf.mxu1 }
 0x4bf   : > { %v3794_v13 = vpop.f32.mrf.mxu2 }
 0x4c0   : > { %v3795_v8 = vadd.f32 %v3794_v13, %v3565_v20 }
 0x4c1   : > { %5651 = vmatmul.msk.bf16.vlgmr.msrb.gmra.mxu1 %vm10089_vm7, %v7967_v34  ;;  %vm10105_vm7 = vmmov %vm10094_vm0 }
 0x4c2   : > { %v4081_v59 = vadd.f32 %v4023_v47, %v3795_v8  ;;  %5699 = vmatmul.msk.bf16.vlgmr.msra.gmra.mxu3 %vm10091_vm4, %v7997_v49  ;;  %vm10107_vm4 = vmmov %vm10094_vm0 }
 0x4c3   : > { %v4167_v23 = vpop.f32.mrf.mxu0 }
 0x4c4   : > { %5675 = vmatmul.msk.bf16.vlgmr.msra.gmra.mxu2 %vm10090_vm10, %v7981_v15  ;;  %v8445_v15 = vadd.f32 %v8378_v21, %v4078_v57  ;;  %v8455_v21 = vadd.f32 %v4159_v36, %v4079_v38  ;;  %vm10106_vm10 = vmmov %vm10094_vm0 }
 0x4c5   : > { %v4026_v60 = vpop.f32.mrf.mxu3 }
 0x4c6   : > { %v3570_v4 = vpop.f32.mrf.mxu1  ;;  %5723 = vmatmul.msk.bf16.vlgmr.msra.gmra.mxu0 %vm10092_vm3, %v7850_v16  ;;  %vm10108_vm3 = vmmov %vm10094_vm0 }
 0x4c7   : > { %v3797_v10 = vpop.f32.mrf.mxu2 }
 0x4c8   : > { %v3798_v53 = vadd.f32 %v3797_v10, %v3568_v56 }
 0x4ca   : > { %v4082_v34 = vadd.f32 %v4026_v60, %v3798_v53 }
 0x4cb   : > { %v4169_v5 = vpop.f32.mrf.mxu0 }
 0x4cd   : > { %v4028_v49 = vpop.f32.mrf.mxu3 }
 0x4ce   : > { %v3573_v55 = vpop.f32.mrf.mxu1 }
 0x4cf   : > { %v3799_v24 = vpop.f32.mrf.mxu2 }
 0x4d0   : > { %v3800_v28 = vadd.f32 %v3799_v24, %v3570_v4 }
 0x4d1   : > { %5652 = vmatmul.msk.bf16.gmra.mxu1 %vm10093_vm9, %v7850_v16  ;;  %vm10109_vm9 = vmmov %vm10094_vm0 }
 0x4d2   : > { %v4083_v62 = vadd.f32 %v4028_v49, %v3800_v28  ;;  %5700 = vmatmul.msk.bf16.gmra.mxu3 %vm10095_vm13, %v8039_v48  ;;  %v8459_v48 = vadd.f32 %v4162_v32, %v4080_v12  ;;  %vm10110_vm13 = vmmov %vm10094_vm0 }
 0x4d3   : > { %v4172_v20 = vpop.f32.mrf.mxu0 }
 0x4d4   : > { %5676 = vmatmul.msk.bf16.gmra.mxu2 %vm10094_vm0, %v8027_v50 }
 0x4d5   : > { %v4031_v43 = vpop.f32.mrf.mxu3 }
 0x4d6   : > { %v3575_v27 = vpop.f32.mrf.mxu1  ;;  %5724 = vmatmul.msk.bf16.gmra.mxu0 %vm10096_vm2, %v8068_v22  ;;  %vm10111_vm2 = vmmov %vm10094_vm0 }
 0x4d7   : > { %v3802_v40 = vpop.f32.mrf.mxu2 }
 0x4d8   : > { %v3803_v57 = vadd.f32 %v3802_v40, %v3573_v55  ;;  %v8467_v55 = vadd.f32 %v4164_v58, %v4081_v59 }
 0x4da   : > { %v4084_v9 = vadd.f32 %v4031_v43, %v3803_v57 }
 0x4db   : > { %v4174_v35 = vpop.f32.mrf.mxu0 }
 0x4dd   : > { %v4033_v8 = vpop.f32.mrf.mxu3 }
 0x4de   : > { %v3578_v16 = vpop.f32.mrf.mxu1 }
 0x4df   : > { %v3804_v56 = vpop.f32.mrf.mxu2 }
 0x4e0   : > { %v3805_v13 = vadd.f32 %v3804_v56, %v3575_v27 }
 0x4e1   : > { %5653 = vmatmul.msk.bf16.gmra.mxu1 %vm10097_vm11, %v8068_v22  ;;  %vm10112_vm11 = vmmov %vm10094_vm0 }
 0x4e2   : > { %v4085_v47 = vadd.f32 %v4033_v8, %v3805_v13  ;;  %5701 = vmatmul.msk.bf16.gmra.mxu3 %vm10099_vm12, %v8086_v14  ;;  %v8471_v14 = vadd.f32 %v4167_v23, %v4082_v34  ;;  %vm10114_vm12 = vmmov %vm10094_vm0 }
 0x4e3   : > { %v4177_v4 = vpop.f32.mrf.mxu0 }
 0x4e4   : > { %5677 = vmatmul.msk.bf16.gmra.mxu2 %vm10098_vm8, %v8076_v2  ;;  %vm10113_vm8 = vmmov %vm10094_vm0 }
 0x4e5   : > { %v4036_v53 = vpop.f32.mrf.mxu3 }
 0x4e6   : > { %v3580_v36 = vpop.f32.mrf.mxu1  ;;  %5725 = vmatmul.msk.bf16.gmra.mxu0 %vm10100_vm6, %v7969_v6  ;;  %vm10115_vm6 = vmmov %vm10094_vm0 }
 0x4e7   : > { %v3807_v38 = vpop.f32.mrf.mxu2 }
 0x4e8   : > { %v3808_v10 = vadd.f32 %v3807_v38, %v3578_v16  ;;  %v8479_v16 = vadd.f32 %v4169_v5, %v4083_v62 }
 0x4ea   : > { %v4086_v60 = vadd.f32 %v4036_v53, %v3808_v10 }
 0x4eb   : > { %v4179_v22 = vpop.f32.mrf.mxu0 }
 0x4ed   : > { %v4038_v28 = vpop.f32.mrf.mxu3 }
 0x4ee   : > { %v3583_v32 = vpop.f32.mrf.mxu1 }
 0x4ef   : > { %v3809_v12 = vpop.f32.mrf.mxu2 }
 0x4f0   : > { %v3810_v24 = vadd.f32 %v3809_v12, %v3580_v36 }
 0x4f1   : > { %5654 = vmatmul.msk.bf16.gmra.mxu1 %vm10101_vm15, %v7969_v6  ;;  %vm10116_vm15 = vmmov %vm10094_vm0 }
 0x4f2   : > { %v4087_v49 = vadd.f32 %v4038_v28, %v3810_v24  ;;  %5702 = vmatmul.msk.bf16.gmra.mxu3 %vm10103_vm1, %v8129_v46  ;;  %v8483_v46 = vadd.f32 %v4172_v20, %v4084_v9  ;;  %vm10119_vm1 = vmmov %vm10094_vm0 }
 0x4f3   : > { %v4182_v27 = vpop.f32.mrf.mxu0 }
 0x4f4   : > { %5678 = vmatmul.msk.bf16.gmra.mxu2 %vm10102_vm5, %v8119_v18  ;;  %vm10117_vm5 = vmmov %vm10094_vm0 }
 0x4f5   : > { %v4041_v57 = vpop.f32.mrf.mxu3 }
 0x4f6   : > { %v3585_v58 = vpop.f32.mrf.mxu1  ;;  %5726 = vmatmul.msk.bf16.gmra.mxu0 %vm10104_vm14, %v7989_v11  ;;  %vm10121_vm14 = vmmov %vm10094_vm0 }
 0x4f7   : > { %v3812_v59 = vpop.f32.mrf.mxu2 }
 0x4f8   : > { %v3813_v40 = vadd.f32 %v3812_v59, %v3583_v32  ;;  %v8491_v32 = vadd.f32 %v4174_v35, %v4085_v47 }
 0x4fa   : > { %v4088_v43 = vadd.f32 %v4041_v57, %v3813_v40 }
 0x4fb   : > { %v4184_v6 = vpop.f32.mrf.mxu0 }
 0x4fd   : > { %v4043_v13 = vpop.f32.mrf.mxu3 }
 0x4fe   : > { %v3588_v23 = vpop.f32.mrf.mxu1 }
 0x4ff   : > { %v3814_v34 = vpop.f32.mrf.mxu2 }
 0x500   : > { %v3815_v56 = vadd.f32 %v3814_v34, %v3585_v58 }
 0x501   : > { %5655 = vmatmul.msk.bf16.gmra.mxu1 %vm10105_vm7, %v7989_v11  ;;  %vm10123_vm7 = vmmov %vm10094_vm0 }
 0x502   : > { %v4089_v8 = vadd.f32 %v4043_v13, %v3815_v56  ;;  %5703 = vmatmul.msk.bf16.gmra.mxu3 %vm10107_vm4, %v8147_v26  ;;  %v8495_v26 = vadd.f32 %v4177_v4, %v4086_v60  ;;  %vm10127_vm4 = vmmov %vm10094_vm0 }
 0x503   : > { %v4187_v36 = vpop.f32.mrf.mxu0 }
 0x504   : > { %5679 = vmatmul.msk.bf16.gmra.mxu2 %vm10106_vm10, %v8141_v41  ;;  %vm10125_vm10 = vmmov %vm10094_vm0 }
 0x505   : > { %v4046_v10 = vpop.f32.mrf.mxu3 }
 0x506   : > { %v3590_v5 = vpop.f32.mrf.mxu1  ;;  %5727 = vmatmul.msk.bf16.gmra.mxu0 %vm10108_vm3, %v8005_v17  ;;  %vm10129_vm3 = vmmov %vm10094_vm0 }
 0x507   : > { %v3817_v62 = vpop.f32.mrf.mxu2 }
 0x508   : > { %v3818_v38 = vadd.f32 %v3817_v62, %v3588_v23  ;;  %v8503_v23 = vadd.f32 %v4179_v22, %v4087_v49 }
 0x50a   : > { %v4090_v53 = vadd.f32 %v4046_v10, %v3818_v38 }
 0x50b   : > { %v4189_v11 = vpop.f32.mrf.mxu0 }
 0x50d   : > { %v4048_v24 = vpop.f32.mrf.mxu3 }
 0x50e   : > { %v3593_v20 = vpop.f32.mrf.mxu1 }
 0x50f   : > { %v3819_v9 = vpop.f32.mrf.mxu2 }
 0x510   : > { %v3820_v12 = vadd.f32 %v3819_v9, %v3590_v5  ;;  %v8510_v5 = vadd.f32 %v4182_v27, %v4088_v43 }
 0x511   : > { %5656 = vmatmul.msk.bf16.gmra.mxu1 %vm10109_vm9, %v8005_v17  ;;  %vm10131_vm9 = vmmov %vm10094_vm0 }
 0x512   : > { %v4091_v28 = vadd.f32 %v4048_v24, %v3820_v12  ;;  %5704 = vmatmul.msk.bf16.gmra.mxu3 %vm10110_vm13, %v8166_v54  ;;  %v5802_v54 = vld [vmem:[%s9329_s2 + $0x80] sm:$0xff]  ;;  %vm10134_vm13 = vmmov %vm10094_vm0 }
 0x513   : > { %v4192_v58 = vpop.f32.mrf.mxu0  ;;  %4822 = vmatpush.bf16.msra.mxu1 %v5802_v54 }
 0x514   : > { %5680 = vmatmul.msk.bf16.gmra.mxu2 %vm10094_vm0, %v8160_v42 }
 0x515   : > { %v4051_v40 = vpop.f32.mrf.mxu3 }
 0x516   : > { %v3595_v35 = vpop.f32.mrf.mxu1  ;;  %5728 = vmatmul.msk.bf16.gmra.mxu0 %vm10111_vm2, %v8015_v25  ;;  %vm10136_vm2 = vmmov %vm10094_vm0 }
 0x517   : > { %v3822_v47 = vpop.f32.mrf.mxu2 }
 0x518   : > { %v3823_v59 = vadd.f32 %v3822_v47, %v3593_v20  ;;  %v8518_v20 = vadd.f32 %v4184_v6, %v4089_v8  ;;  %v10118_v47 = vld [vmem:[#allocation106_spill] sm:$0xff] }
 0x519   : > { %v10120_v8 = vld [vmem:[#allocation94_spill] sm:$0xff] }
 0x51a   : > { %v4092_v57 = vadd.f32 %v4051_v40, %v3823_v59 }
 0x51b   : > { %v4194_v17 = vpop.f32.mrf.mxu0 }
 0x51d   : > { %v4053_v56 = vpop.f32.mrf.mxu3 }
 0x51e   : > { %v3598_v4 = vpop.f32.mrf.mxu1 }
 0x51f   : > { %v3824_v60 = vpop.f32.mrf.mxu2 }
 0x520   : > { %v3825_v34 = vadd.f32 %v3824_v60, %v3595_v35 }
 0x521   : > { %5657 = vmatmul.msk.bf16.gmra.mxu1 %vm10112_vm11, %v8015_v25  ;;  %vm10138_vm11 = vmmov %vm10094_vm0 }
 0x522   : > { %v4093_v13 = vadd.f32 %v4053_v56, %v3825_v34  ;;  %5705 = vmatmul.msk.bf16.gmra.mxu3 %vm10114_vm12, %v8182_v37  ;;  %v8522_v37 = vadd.f32 %v4187_v36, %v4090_v53  ;;  %v8530_v56 = vadd.f32 %v4189_v11, %v4091_v28  ;;  %v10122_v53 = vld [vmem:[#allocation105_spill] sm:$0xff]  ;;  %v10128_v28 = vld [vmem:[#allocation95_spill] sm:$0xff]  ;;  %vm10142_vm12 = vmmov %vm10094_vm0 }
 0x523   : > { %v4197_v62 = vpop.f32.mrf.mxu0 }
 0x524   : > { %5681 = vmatmul.msk.bf16.gmra.mxu2 %vm10113_vm8, %v8176_v44  ;;  %vm10140_vm8 = vmmov %vm10094_vm0 }
 0x525   : > { %v4056_v38 = vpop.f32.mrf.mxu3 }
 0x526   : > { %v3600_v22 = vpop.f32.mrf.mxu1  ;;  %5729 = vmatmul.msk.bf16.gmra.mxu0 %vm10115_vm6, %v8021_v3  ;;  %vm10144_vm6 = vmmov %vm10094_vm0 }
 0x527   : > { %v3827_v25 = vpop.f32.mrf.mxu2 }
 0x528   : > { %v3828_v49 = vadd.f32 %v3827_v25, %v3598_v4 }
 0x52a   : > { %v4094_v10 = vadd.f32 %v4056_v38, %v3828_v49 }
 0x52b   : > { %v4199_v27 = vpop.f32.mrf.mxu0 }
 0x52d   : > { %v4058_v24 = vpop.f32.mrf.mxu3 }
 0x52e   : > { %v3603_v43 = vpop.f32.mrf.mxu1 }
 0x52f   : > { %v3829_v9 = vpop.f32.mrf.mxu2 }
 0x530   : > { %v3830_v12 = vadd.f32 %v3829_v9, %v3600_v22  ;;  %v8535_v9 = vadd.f32 %v4192_v58, %v4092_v57 }
 0x531   : > { %5658 = vmatmul.msk.bf16.gmra.mxu1 %vm10116_vm15, %v8021_v3  ;;  %vm10145_vm15 = vmmov %vm10094_vm0 }
 0x532   : > { %v4095_v35 = vadd.f32 %v4058_v24, %v3830_v12  ;;  %5706 = vmatmul.msk.bf16.gmra.mxu3 %vm10119_vm1, %v10118_v47  ;;  %v10124_v12 = vld [vmem:[#allocation63_spill] sm:$0xff]  ;;  %vm10149_vm1 = vmmov %vm10094_vm0 }
 0x533   : > { %v4202_v59 = vpop.f32.mrf.mxu0 }
 0x534   : > { %5682 = vmatmul.msk.bf16.gmra.mxu2 %vm10117_vm5, %v8192_v29  ;;  %v10139_v29 = vld [vmem:[#allocation107_spill] sm:$0xff]  ;;  %vm10147_vm5 = vmmov %vm10094_vm0 }
 0x535   : > { %v4061_v60 = vpop.f32.mrf.mxu3 }
 0x536   : > { %v3605_v6 = vpop.f32.mrf.mxu1  ;;  %5730 = vmatmul.msk.bf16.gmra.mxu0 %vm10121_vm14, %v10120_v8  ;;  %vm10151_vm14 = vmmov %vm10094_vm0 }
 0x537   : > { %v3832_v40 = vpop.f32.mrf.mxu2 }
 0x538   : > { %v3833_v4 = vadd.f32 %v3832_v40, %v3603_v43  ;;  %v10126_v43 = vld [vmem:[#allocation64_spill] sm:$0xff] }
 0x53a   : > { %v4096_v34 = vadd.f32 %v4061_v60, %v3833_v4  ;;  %v8544_v60 = vadd.f32 %v4194_v17, %v4093_v13  ;;  %v10135_v13 = vld [vmem:[#allocation12_spill] sm:$0xff] }
 0x53b   : > { %v4204_v22 = vpop.f32.mrf.mxu0 }
 0x53d   : > { %v4063_v49 = vpop.f32.mrf.mxu3 }
 0x53e   : > { %v4268_v3 = vpop.f32.mrf.mxu1 }
 0x53f   : > { %v3834_v36 = vpop.f32.mrf.mxu2  ;;  %v4348_v54 = vadd.f32 %v4268_v3, %v10122_v53  ;;  %v10130_v3 = vld [vmem:[#allocation72_spill] sm:$0xff] }
 0x540   : > { %v3835_v25 = vadd.f32 %v3834_v36, %v3605_v6 }
 0x541   : > { %5659 = vmatmul.msk.bf16.gmra.mxu1 %vm10123_vm7, %v10120_v8  ;;  %vm10152_vm7 = vmmov %vm10094_vm0 }
 0x542   : > { %v4097_v38 = vadd.f32 %v4063_v49, %v3835_v25  ;;  %5707 = vmatmul.msk.bf16.gmra.mxu3 %vm10127_vm4, %v10126_v43  ;;  %v8549_v43 = vadd.f32 %v4197_v62, %v4094_v10  ;;  %vm10156_vm4 = vmmov %vm10094_vm0 }
 0x543   : > { %v4683_v4 = vpop.f32.mrf.mxu0 }
 0x544   : > { %5683 = vmatmul.msk.bf16.gmra.mxu2 %vm10125_vm10, %v10124_v12  ;;  %vm10154_vm10 = vmmov %vm10094_vm0 }
 0x545   : > { %v4550_v40 = vpop.f32.mrf.mxu3 }
 0x546   : > { %v4270_v11 = vpop.f32.mrf.mxu1  ;;  %5731 = vmatmul.msk.bf16.gmra.mxu0 %vm10129_vm3, %v10128_v28  ;;  %vm10158_vm3 = vmmov %vm10094_vm0 }
 0x547   : > { %v4409_v24 = vpop.f32.mrf.mxu2  ;;  %v4349_v47 = vadd.f32 %v4270_v11, %v8282_v30  ;;  %v10132_v30 = vld [vmem:[#allocation6_spill] sm:$0xff] }
 0x548   : > { %v4489_v6 = vadd.f32 %v4409_v24, %v4348_v54  ;;  %v10133_v54 = vld [vmem:[#allocation70_spill] sm:$0xff] }
 0x54a   : > { %v4630_v8 = vadd.f32 %v4550_v40, %v4489_v6  ;;  %v8558_v40 = vadd.f32 %v4199_v27, %v4095_v35  ;;  %v10143_v35 = vld [vmem:[#allocation29_spill] sm:$0xff] }
 0x54b   : > { %v4685_v12 = vpop.f32.mrf.mxu0 }
 0x54d   : > { %v4552_v25 = vpop.f32.mrf.mxu3 }
 0x54e   : > { %v4273_v58 = vpop.f32.mrf.mxu1 }
 0x54f   : > { %v4411_v57 = vpop.f32.mrf.mxu2  ;;  %v4350_v36 = vadd.f32 %v4273_v58, %v10130_v3 }
 0x550   : > { %v4490_v53 = vadd.f32 %v4411_v57, %v4349_v47  ;;  %v10137_v57 = vld [vmem:[#allocation90_spill] sm:$0xff] }
 0x551   : > { %5660 = vmatmul.msk.bf16.gmra.mxu1 %vm10131_vm9, %v10128_v28  ;;  %vm10159_vm9 = vmmov %vm10094_vm0 }
 0x552   : > { %v4631_v49 = vadd.f32 %v4552_v25, %v4490_v53  ;;  %5708 = vmatmul.msk.bf16.gmra.mxu3 %vm10134_vm13, %v10133_v54  ;;  %vm10161_vm13 = vmmov %vm10094_vm0 }
 0x553   : > { %v4688_v62 = vpop.f32.mrf.mxu0 }
 0x554   : > { %5684 = vmatmul.msk.bf16.gmra.mxu2 %vm10094_vm0, %v10132_v30  ;;  %v8563_v30 = vadd.f32 %v4202_v59, %v4096_v34 }
 0x555   : > { %v4555_v6 = vpop.f32.mrf.mxu3 }
 0x556   : > { %v4275_v17 = vpop.f32.mrf.mxu1  ;;  %5732 = vmatmul.msk.bf16.gmra.mxu0 %vm10136_vm2, %v10135_v13  ;;  %vm10162_vm2 = vmmov %vm10094_vm0 }
 0x557   : > { %v4414_v11 = vpop.f32.mrf.mxu2  ;;  %v4351_v24 = vadd.f32 %v4275_v17, %v8314_v1  ;;  %v10141_v1 = vld [vmem:[#allocation66_spill] sm:$0xff] }
 0x558   : > { %v4491_v47 = vadd.f32 %v4414_v11, %v4350_v36 }
 0x55a   : > { %v4632_v28 = vadd.f32 %v4555_v6, %v4491_v47  ;;  %v8572_v6 = vadd.f32 %v4204_v22, %v4097_v38  ;;  %v10150_v38 = vld [vmem:[#allocation100_spill] sm:$0xff] }
 0x55b   : > { %v4690_v17 = vpop.f32.mrf.mxu0 }
 0x55d   : > { %v4557_v25 = vpop.f32.mrf.mxu3 }
 0x55e   : > { %v4278_v10 = vpop.f32.mrf.mxu1 }
 0x55f   : > { %v4416_v58 = vpop.f32.mrf.mxu2  ;;  %v4352_v3 = vadd.f32 %v4278_v10, %v10137_v57 }
 0x560   : > { %v4492_v53 = vadd.f32 %v4416_v58, %v4351_v24 }
 0x561   : > { %5661 = vmatmul.msk.bf16.gmra.mxu1 %vm10138_vm11, %v10135_v13  ;;  %vm10165_vm11 = vmmov %vm10094_vm0 }
 0x562   : > { %v4633_v54 = vadd.f32 %v4557_v25, %v4492_v53  ;;  %5709 = vmatmul.msk.bf16.gmra.mxu3 %vm10142_vm12, %v10141_v1  ;;  %v8577_v1 = vadd.f32 %v4683_v4, %v4630_v8  ;;  %vm10167_vm12 = vmmov %vm10094_vm0 }
 0x563   : > { %v4693_v53 = vpop.f32.mrf.mxu0 }
 0x564   : > { %5685 = vmatmul.msk.bf16.gmra.mxu2 %vm10140_vm8, %v10139_v29  ;;  %v10146_v29 = vld [vmem:[#allocation110_spill] sm:$0xff]  ;;  %vm10166_vm8 = vmmov %vm10094_vm0 }
 0x565   : > { %v4560_v47 = vpop.f32.mrf.mxu3 }
 0x566   : > { %v4280_v27 = vpop.f32.mrf.mxu1  ;;  %5733 = vmatmul.msk.bf16.gmra.mxu0 %vm10144_vm6, %v10143_v35  ;;  %vm10168_vm6 = vmmov %vm10094_vm0 }
 0x567   : > { %v4419_v36 = vpop.f32.mrf.mxu2  ;;  %v4353_v11 = vadd.f32 %v4280_v27, %v8352_v63  ;;  %v10148_v63 = vld [vmem:[#allocation78_spill] sm:$0xff] }
 0x568   : > { %v4493_v24 = vadd.f32 %v4419_v36, %v4352_v3 }
 0x56a   : > { %v4634_v13 = vadd.f32 %v4560_v47, %v4493_v24 }
 0x56b   : > { %v4695_v4 = vpop.f32.mrf.mxu0 }
 0x56d   : > { %v4562_v57 = vpop.f32.mrf.mxu3 }
 0x56e   : > { %v4283_v59 = vpop.f32.mrf.mxu1 }
 0x56f   : > { %v4421_v34 = vpop.f32.mrf.mxu2  ;;  %v4354_v10 = vadd.f32 %v4283_v59, %v8367_v61 }
 0x570   : > { %v4494_v58 = vadd.f32 %v4421_v34, %v4353_v11 }
 0x571   : > { %5662 = vmatmul.msk.bf16.gmra.mxu1 %vm10145_vm15, %v10143_v35  ;;  %v8586_v35 = vadd.f32 %v4685_v12, %v4631_v49 }
 0x572   : > { %v4635_v25 = vadd.f32 %v4562_v57, %v4494_v58  ;;  %5710 = vmatmul.msk.bf16.gmra.mxu3 %vm10149_vm1, %v10148_v63  ;;  %v8591_v57 = vadd.f32 %v4688_v62, %v4632_v28  ;;  %v10153_v63 = vld [vmem:[#allocation92_spill] sm:$0xff]  ;;  %v8602_v28 = vadd.f32 %v4690_v17, %v4633_v54  ;;  %vm10173_vm1 = vmmov %vm10094_vm0 }
 0x573   : > { %v4698_v12 = vpop.f32.mrf.mxu0 }
 0x574   : > { %5686 = vmatmul.msk.bf16.gmra.mxu2 %vm10147_vm5, %v10146_v29  ;;  %vm10171_vm5 = vmmov %vm10094_vm0 }
 0x575   : > { %v4565_v36 = vpop.f32.mrf.mxu3 }
 0x576   : > { %v4285_v22 = vpop.f32.mrf.mxu1  ;;  %5734 = vmatmul.msk.bf16.gmra.mxu0 %vm10151_vm14, %v10150_v38  ;;  %vm10174_vm14 = vmmov %vm10094_vm0 }
 0x577   : > { %v4424_v61 = vpop.f32.mrf.mxu2  ;;  %v4355_v3 = vadd.f32 %v4285_v22, %v8399_v45  ;;  %v10155_v45 = vld [vmem:[#allocation91_spill] sm:$0xff] }
 0x578   : > { %v4495_v27 = vadd.f32 %v4424_v61, %v4354_v10  ;;  %v10157_v10 = vld [vmem:[#allocation98_spill] sm:$0xff] }
 0x57a   : > { %v4636_v11 = vadd.f32 %v4565_v36, %v4495_v27 }
 0x57b   : > { %v4700_v36 = vpop.f32.mrf.mxu0 }
 0x57d   : > { %v4567_v34 = vpop.f32.mrf.mxu3 }
 0x57e   : > { %v4288_v8 = vpop.f32.mrf.mxu1 }
 0x57f   : > { %v4426_v24 = vpop.f32.mrf.mxu2  ;;  %v4356_v47 = vadd.f32 %v4288_v8, %v8410_v33 }
 0x580   : > { %v4496_v59 = vadd.f32 %v4426_v24, %v4355_v3 }
 0x581   : > { %5663 = vmatmul.msk.bf16.gmra.mxu1 %vm10152_vm7, %v10150_v38  ;;  %vm10175_vm7 = vmmov %vm10094_vm0 }
 0x582   : > { %v4637_v58 = vadd.f32 %v4567_v34, %v4496_v59  ;;  %5711 = vmatmul.msk.bf16.gmra.mxu3 %vm10156_vm4, %v10155_v45  ;;  %v8609_v45 = vadd.f32 %v4693_v53, %v4634_v13  ;;  %v8620_v13 = vadd.f32 %v4695_v4, %v4635_v25  ;;  %v10163_v53 = vld [vmem:[#allocation96_spill] sm:$0xff]  ;;  %v8629_v25 = vadd.f32 %v4698_v12, %v4636_v11  ;;  %v10169_v11 = vld [vmem:[#allocation65_spill] sm:$0xff]  ;;  %vm10177_vm4 = vmmov %vm10094_vm0 }
 0x583   : > { %vm10170_vm15 = vnez %v10169_v11 }
 0x584   : > { %5687 = vmatmul.msk.bf16.gmra.mxu2 %vm10154_vm10, %v10153_v63  ;;  %vm10176_vm10 = vmmov %vm10094_vm0 }
 0x585   : > { %v4570_v3 = vpop.f32.mrf.mxu3 }
 0x586   : > { %v4290_v49 = vpop.f32.mrf.mxu1  ;;  %5735 = vmatmul.msk.bf16.gmra.mxu0 %vm10158_vm3, %v10157_v10  ;;  %vm10178_vm3 = vmmov %vm10094_vm0 }
 0x587   : > { %v4429_v33 = vpop.f32.mrf.mxu2  ;;  %v4357_v22 = vadd.f32 %v4290_v49, %v8426_v0  ;;  %v10160_v0 = vld [vmem:[#allocation39_spill] sm:$0xff] }
 0x588   : > { %v4497_v61 = vadd.f32 %v4429_v33, %v4356_v47 }
 0x58a   : > { %v8600_v38 = vadd.f32 %v4570_v3, %v4497_v61  ;;  %v10164_v61 = vld [vmem:[#allocation22_spill] sm:$0xff] }
 0x58d   : > { %v4572_v59 = vpop.f32.mrf.mxu3 }
 0x58e   : > { %v4293_v62 = vpop.f32.mrf.mxu1 }
 0x58f   : > { %v4431_v27 = vpop.f32.mrf.mxu2  ;;  %v4358_v8 = vadd.f32 %v4293_v62, %v8430_v19 }
 0x590   : > { %v4498_v24 = vadd.f32 %v4431_v27, %v4357_v22  ;;  %v3313_v22 = vpack.c.bf16 %v10163_v53, %v10163_v53 }
 0x591   : > { %5664 = vmatmul.msk.bf16.gmra.mxu1 %vm10159_vm9, %v10157_v10  ;;  %v4703_v10 = vpop.f32.mrf.mxu0  ;;  %vm10179_vm9 = vmmov %vm10094_vm0 }
 0x592   : > { %v8607_v34 = vadd.f32 %v4572_v59, %v4498_v24  ;;  %5712 = vmatmul.msk.bf16.gmra.mxu3 %vm10161_vm13, %v8384_v51  ;;  %v3314_v51 = vpack.c.bf16 %v10164_v61, %v10164_v61  ;;  %v5863_v61 = vld [vmem:[#allocation2 + $0x112] sm:$0xff]  ;;  %vm10180_vm13 = vmmov %vm10094_vm0 }
 0x594   : > { %5688 = vmatmul.msk.bf16.gmra.mxu2 %vm10094_vm0, %v10160_v0 }
 0x595   : > { %v4575_v49 = vpop.f32.mrf.mxu3 }
 0x596   : > { %v4295_v54 = vpop.f32.mrf.mxu1  ;;  %5736 = vmatmul.msk.bf16.gmra.mxu0 %vm10162_vm2, %v8106_v52  ;;  %vm10182_vm2 = vmmov %vm10094_vm0 }
 0x597   : > { %v4434_v19 = vpop.f32.mrf.mxu2  ;;  %v4359_v17 = vadd.f32 %v4295_v54, %v8442_v7  ;;  %v4241_v7 = vunpack.c.l.b16 %v3313_v22 }
 0x598   : > { %v4499_v47 = vadd.f32 %v4434_v19, %v4358_v8  ;;  %v4242_v8 = vunpack.c.l.b16 %v3314_v51 }
 0x599   : > { %v4705_v4 = vpop.f32.mrf.mxu0 }
 0x59a   : > { %v8618_v33 = vadd.f32 %v4575_v49, %v4499_v47  ;;  %v4243_v19 = vpack.c.b16 %v4242_v8, %v4241_v7  ;;  %v3173_v47 = vld [vmem:[#allocation2 + $0x110] sm:$0xff] }
 0x59b   : > { %v3245_v12 = vsel %vm10170_vm15, %v5863_v61, %v3173_v47  ;;  %v8644_v47 = vadd.f32 %v4703_v10, %v8600_v38  ;;  %vm10191_vm15 = vmmov %vm10094_vm0 }
 0x59d   : > { %v4577_v59 = vpop.f32.mrf.mxu3 }
 0x59e   : > { %v4298_v3 = vpop.f32.mrf.mxu1 }
 0x59f   : > { %v4436_v62 = vpop.f32.mrf.mxu2  ;;  %v4360_v27 = vadd.f32 %v4298_v3, %v8445_v15  ;;  %v3281_v3 = vpack.c.bf16 %v3245_v12, %v3245_v12 }
 0x5a0   : > { %v4500_v24 = vadd.f32 %v4436_v62, %v4359_v17  ;;  %v5864_v62 = vld [vmem:[#allocation2 + $0x118] sm:$0xff] }
 0x5a1   : > { %5665 = vmatmul.msk.bf16.gmra.mxu1 %vm10165_vm11, %v8106_v52  ;;  %vm10184_vm11 = vmmov %vm10094_vm0 }
 0x5a2   : > { %v4641_v54 = vadd.f32 %v4577_v59, %v4500_v24  ;;  %5713 = vmatmul.msk.bf16.gmra.mxu3 %vm10167_vm12, %v8420_v39  ;;  %v3282_v24 = vpack.c.bf16 %v5864_v62, %v5864_v62  ;;  %v8639_v59 = vadd.f32 %v4700_v36, %v4637_v58  ;;  %v4708_v39 = vpop.f32.mrf.mxu0  ;;  %vm10188_vm12 = vmmov %vm10094_vm0 }
 0x5a3   : > { %v8659_v62 = vadd.f32 %v4708_v39, %v8618_v33 }
 0x5a4   : > { %5689 = vmatmul.msk.bf16.gmra.mxu2 %vm10166_vm8, %v8414_v31  ;;  %v4523_v31 = vunpack.c.l.b16 %v3281_v3  ;;  %v4524_v0 = vunpack.c.l.b16 %v3282_v24  ;;  %vm10186_vm8 = vmmov %vm10094_vm0 }
 0x5a5   : > { %v4580_v22 = vpop.f32.mrf.mxu3 }
 0x5a6   : > { %v4300_v15 = vpop.f32.mrf.mxu1  ;;  %5737 = vmatmul.msk.bf16.gmra.mxu0 %vm10168_vm6, %v4243_v19  ;;  %vm10189_vm6 = vmmov %vm10094_vm0 }
 0x5a7   : > { %v4439_v17 = vpop.f32.mrf.mxu2  ;;  %v4361_v49 = vadd.f32 %v4300_v15, %v8455_v21 }
 0x5a8   : > { %v4501_v53 = vadd.f32 %v4439_v17, %v4360_v27  ;;  %v4525_v17 = vpack.c.b16 %v4524_v0, %v4523_v31  ;;  %v8653_v31 = vadd.f32 %v4705_v4, %v8607_v34 }
 0x5aa   : > { %v4642_v51 = vadd.f32 %v4580_v22, %v4501_v53  ;;  %v10172_v53 = vld [vmem:[#allocation99_spill] sm:$0xff] }
 0x5ad   : > { %v4582_v27 = vpop.f32.mrf.mxu3 }
 0x5ae   : > { %v4303_v7 = vpop.f32.mrf.mxu1 }
 0x5af   : > { %v4441_v8 = vpop.f32.mrf.mxu2  ;;  %v4362_v63 = vadd.f32 %v4303_v7, %v8459_v48  ;;  %v4710_v48 = vpop.f32.mrf.mxu0 }
 0x5b0   : > { %v4502_v21 = vadd.f32 %v4441_v8, %v4361_v49  ;;  %v8662_v8 = vadd.f32 %v4710_v48, %v4641_v54 }
 0x5b1   : > { %5666 = vmatmul.msk.bf16.gmra.mxu1 %vm10171_vm5, %v4243_v19  ;;  %vm10193_vm5 = vmmov %vm10094_vm0 }
 0x5b2   : > { %v4643_v15 = vadd.f32 %v4582_v27, %v4502_v21  ;;  %5714 = vmatmul.msk.bf16.gmra.mxu3 %vm10174_vm14, %v4525_v17  ;;  %vm10198_vm14 = vmmov %vm10094_vm0 }
 0x5b4   : > { %5690 = vmatmul.msk.bf16.gmra.mxu2 %vm10173_vm1, %v10172_v53  ;;  %vm10195_vm1 = vmmov %vm10094_vm0 }
 0x5b5   : > { %v4585_v19 = vpop.f32.mrf.mxu3 }
 0x5b6   : > { %v4305_v58 = vpop.f32.mrf.mxu1  ;;  %5738 = vmatmul.msk.bf16.gmra.mxu0 %vm10175_vm7, %v8106_v52  ;;  %vm10203_vm7 = vmmov %vm10094_vm0 }
 0x5b7   : > { %v4444_v36 = vpop.f32.mrf.mxu2  ;;  %v4363_v49 = vadd.f32 %v4305_v58, %v8467_v55  ;;  %v4713_v3 = vpop.f32.mrf.mxu0 }
 0x5b8   : > { %v4503_v22 = vadd.f32 %v4444_v36, %v4362_v63  ;;  %v8667_v39 = vadd.f32 %v4713_v3, %v4642_v51 }
 0x5ba   : > { %v4644_v61 = vadd.f32 %v4585_v19, %v4503_v22 }
 0x5bd   : > { %v4587_v12 = vpop.f32.mrf.mxu3 }
 0x5be   : > { %v4308_v38 = vpop.f32.mrf.mxu1 }
 0x5bf   : > { %v4446_v0 = vpop.f32.mrf.mxu2  ;;  %v4364_v10 = vadd.f32 %v4308_v38, %v8471_v14  ;;  %v4715_v14 = vpop.f32.mrf.mxu0 }
 0x5c0   : > { %v4504_v11 = vadd.f32 %v4446_v0, %v4363_v49  ;;  %v8670_v38 = vadd.f32 %v4715_v14, %v4643_v15 }
 0x5c1   : > { %5747 = vmatmul.msk.bf16.vlgmr.msra.gmra.mxu1 %vm10176_vm10, %v8027_v50  ;;  %vm10204_vm10 = vmmov %vm10094_vm0 }
 0x5c2   : > { %v4645_v52 = vadd.f32 %v4587_v12, %v4504_v11 }
 0x5c5   : > { %v4590_v4 = vpop.f32.mrf.mxu3 }
 0x5c6   : > { %v4310_v55 = vpop.f32.mrf.mxu1 }
 0x5c7   : > { %v4449_v63 = vpop.f32.mrf.mxu2  ;;  %v4365_v24 = vadd.f32 %v4310_v55, %v8479_v16  ;;  %v4718_v36 = vpop.f32.mrf.mxu0 }
 0x5c8   : > { %v4505_v34 = vadd.f32 %v4449_v63, %v4364_v10  ;;  %v8675_v3 = vadd.f32 %v4718_v36, %v4644_v61 }
 0x5ca   : > { %v4646_v7 = vadd.f32 %v4590_v4, %v4505_v34 }
 0x5cd   : > { %v4592_v50 = vpop.f32.mrf.mxu3 }
 0x5ce   : > { %v4313_v21 = vpop.f32.mrf.mxu1 }
 0x5cf   : > { %v4451_v27 = vpop.f32.mrf.mxu2  ;;  %v4366_v17 = vadd.f32 %v4313_v21, %v8483_v46  ;;  %v4720_v10 = vpop.f32.mrf.mxu0 }
 0x5d0   : > { %v4506_v58 = vadd.f32 %v4451_v27, %v4365_v24  ;;  %v8680_v14 = vadd.f32 %v4720_v10, %v4645_v52 }
 0x5d1   : > { %5748 = vmatmul.msk.bf16.gmra.mxu1 %vm10177_vm4, %v8076_v2  ;;  %vm10205_vm4 = vmmov %vm10094_vm0 }
 0x5d2   : > { %v4647_v33 = vadd.f32 %v4592_v50, %v4506_v58 }
 0x5d5   : > { %v4595_v48 = vpop.f32.mrf.mxu3 }
 0x5d6   : > { %v4315_v16 = vpop.f32.mrf.mxu1 }
 0x5d7   : > { %v4454_v49 = vpop.f32.mrf.mxu2  ;;  %v4367_v22 = vadd.f32 %v4315_v16, %v8491_v32  ;;  %v4723_v34 = vpop.f32.mrf.mxu0 }
 0x5d8   : > { %v4507_v54 = vadd.f32 %v4454_v49, %v4366_v17 }
 0x5da   : > { %v4648_v19 = vadd.f32 %v4595_v48, %v4507_v54  ;;  %v10181_v48 = vld [vmem:[#allocation54_spill] sm:$0xff] }
 0x5dd   : > { %v4597_v2 = vpop.f32.mrf.mxu3 }
 0x5de   : > { %v4318_v0 = vpop.f32.mrf.mxu1 }
 0x5df   : > { %v4456_v46 = vpop.f32.mrf.mxu2  ;;  %v4368_v11 = vadd.f32 %v4318_v0, %v8495_v26  ;;  %v4725_v61 = vpop.f32.mrf.mxu0 }
 0x5e0   : > { %v4508_v12 = vadd.f32 %v4456_v46, %v4367_v22  ;;  %v8692_v17 = vadd.f32 %v4725_v61, %v4647_v33  ;;  %v10183_v46 = vld [vmem:[#allocation63_spill] sm:$0xff] }
 0x5e1   : > { %5749 = vmatmul.msk.bf16.gmra.mxu1 %vm10178_vm3, %v8119_v18  ;;  %v8687_v18 = vadd.f32 %v4723_v34, %v4646_v7  ;;  %vm10206_vm3 = vmmov %vm10094_vm0 }
 0x5e2   : > { %v4649_v51 = vadd.f32 %v4597_v2, %v4508_v12  ;;  %v10185_v12 = vld [vmem:[#allocation6_spill] sm:$0xff] }
 0x5e5   : > { %v4600_v24 = vpop.f32.mrf.mxu3 }
 0x5e6   : > { %v4320_v55 = vpop.f32.mrf.mxu1 }
 0x5e7   : > { %v4459_v32 = vpop.f32.mrf.mxu2  ;;  %v8678_v63 = vadd.f32 %v4320_v55, %v8503_v23  ;;  %v4728_v58 = vpop.f32.mrf.mxu0  ;;  %v10187_v55 = vld [vmem:[#allocation107_spill] sm:$0xff] }
 0x5e8   : > { %v4509_v15 = vadd.f32 %v4459_v32, %v4368_v11 }
 0x5ea   : > { %v4650_v4 = vadd.f32 %v4600_v24, %v4509_v15 }
 0x5ee   : > { %v4323_v26 = vpop.f32.mrf.mxu1 }
 0x5ef   : > { %v8683_v21 = vadd.f32 %v4323_v26, %v8510_v5  ;;  %v8699_v5 = vadd.f32 %v4728_v58, %v4648_v19  ;;  %v4730_v7 = vpop.f32.mrf.mxu0 }
 0x5f0   : > { %v8704_v16 = vadd.f32 %v4730_v7, %v4649_v51 }
 0x5f1   : > { %5750 = vmatmul.msk.bf16.gmra.mxu1 %vm10179_vm9, %v8141_v41  ;;  %vm10207_vm9 = vmmov %vm10094_vm0 }
 0x5f6   : > { %v4325_v27 = vpop.f32.mrf.mxu1 }
 0x5f7   : > { %v8690_v23 = vadd.f32 %v4325_v27, %v8518_v20  ;;  %v4733_v49 = vpop.f32.mrf.mxu0 }
 0x5fe   : > { %v4328_v50 = vpop.f32.mrf.mxu1 }
 0x5ff   : > { %v8695_v52 = vadd.f32 %v4328_v50, %v8522_v37  ;;  %v8711_v37 = vadd.f32 %v4733_v49, %v4650_v4  ;;  %v10190_v4 = vld [vmem:[#allocation92_spill] sm:$0xff] }
 0x600   : > { %v10194_v50 = vld [vmem:[#allocation80_spill] sm:$0xff] }
 0x601   : > { %5751 = vmatmul.msk.bf16.gmra.mxu1 %vm10094_vm0, %v8160_v42 }
 0x606   : > { %v4330_v41 = vpop.f32.mrf.mxu1 }
 0x607   : > { %v8702_v36 = vadd.f32 %v4330_v41, %v8530_v56 }
 0x60e   : > { %v4333_v20 = vpop.f32.mrf.mxu1 }
 0x60f   : > { %v8707_v33 = vadd.f32 %v4333_v20, %v8535_v9 }
 0x611   : > { %5752 = vmatmul.msk.bf16.gmra.mxu1 %vm10180_vm13, %v8176_v44  ;;  %vm10208_vm13 = vmmov %vm10094_vm0 }
 0x616   : > { %v4335_v42 = vpop.f32.mrf.mxu1 }
 0x617   : > { %v8714_v22 = vadd.f32 %v4335_v42, %v8544_v60  ;;  %v10200_v42 = vld [vmem:[#allocation32_spill] sm:$0xff] }
 0x61e   : > { %v4338_v54 = vpop.f32.mrf.mxu1 }
 0x61f   : > { %v8717_v56 = vadd.f32 %v4338_v54, %v8549_v43  ;;  %v10201_v54 = vld [vmem:[#allocation24_spill] sm:$0xff] }
 0x621   : > { %5753 = vmatmul.msk.bf16.gmra.mxu1 %vm10182_vm2, %v10181_v48  ;;  %v10202_v48 = vpack.c.b16 %v10200_v42, %v10201_v54  ;;  %vm10209_vm2 = vmmov %vm10094_vm0 }
 0x626   : > { %v4340_v19 = vpop.f32.mrf.mxu1 }
 0x627   : > { %v8722_v9 = vadd.f32 %v4340_v19, %v8558_v40 }
 0x62e   : > { %v4343_v0 = vpop.f32.mrf.mxu1 }
 0x62f   : > { %v8725_v44 = vadd.f32 %v4343_v0, %v8563_v30  ;;  %v4461_v0 = vpop.f32.mrf.mxu2 }
 0x631   : > { %5754 = vmatmul.msk.bf16.gmra.mxu1 %vm10184_vm11, %v10183_v46  ;;  %vm10210_vm11 = vmmov %vm10094_vm0 }
 0x636   : > { %v4345_v60 = vpop.f32.mrf.mxu1 }
 0x637   : > { %v8730_v10 = vadd.f32 %v4345_v60, %v8572_v6 }
 0x63e   : > { %v4824_v43 = vpop.f32.mrf.mxu1 }
 0x63f   : > { %v8733_v11 = vadd.f32 %v4824_v43, %v8577_v1  ;;  %v8804_v43 = vpop.f32.mrf.mxu0 }
 0x641   : > { %5755 = vmatmul.msk.bf16.gmra.mxu1 %vm10186_vm8, %v10185_v12  ;;  %vm10211_vm8 = vmmov %vm10094_vm0 }
 0x646   : > { %v4826_v40 = vpop.f32.mrf.mxu1 }
 0x647   : > { %v8738_v2 = vadd.f32 %v4826_v40, %v8586_v35  ;;  %v4464_v40 = vpop.f32.mrf.mxu2 }
 0x64e   : > { %v4829_v30 = vpop.f32.mrf.mxu1 }
 0x64f   : > { %v8741_v51 = vadd.f32 %v4829_v30, %v8591_v57 }
 0x651   : > { %5756 = vmatmul.msk.bf16.gmra.mxu1 %vm10188_vm12, %v10187_v55  ;;  %vm10212_vm12 = vmmov %vm10094_vm0 }
 0x656   : > { %v4831_v6 = vpop.f32.mrf.mxu1 }
 0x657   : > { %v8746_v32 = vadd.f32 %v4831_v6, %v8602_v28  ;;  %v4466_v6 = vpop.f32.mrf.mxu2 }
 0x65e   : > { %v4834_v1 = vpop.f32.mrf.mxu1 }
 0x65f   : > { %v8749_v15 = vadd.f32 %v4834_v1, %v8609_v45 }
 0x661   : > { %5757 = vmatmul.msk.bf16.gmra.mxu1 %vm10189_vm6, %v10146_v29  ;;  %v10192_v29 = vld [vmem:[#allocation39_spill] sm:$0xff]  ;;  %vm10213_vm6 = vmmov %vm10094_vm0 }
 0x666   : > { %v4836_v35 = vpop.f32.mrf.mxu1 }
 0x667   : > { %v8754_v24 = vadd.f32 %v4836_v35, %v8620_v13 }
 0x66e   : > { %v4839_v57 = vpop.f32.mrf.mxu1 }
 0x66f   : > { %v8757_v34 = vadd.f32 %v4839_v57, %v8629_v25 }
 0x671   : > { %5758 = vmatmul.msk.bf16.gmra.mxu1 %vm10191_vm15, %v10190_v4  ;;  %v4469_v4 = vpop.f32.mrf.mxu2  ;;  %v4947_v42 = vsel %vm10209_vm2, %v8757_v34, 0.0  ;;  %vm10214_vm15 = vmmov %vm10094_vm0 }
 0x672   : > { %vm10224_vm2 = vmmov %vm10094_vm0 }
 0x676   : > { %v4841_v28 = vpop.f32.mrf.mxu1 }
 0x677   : > { %v8762_v26 = vadd.f32 %v4841_v28, %v8639_v59  ;;  %v4936_v28 = vsel %vm10205_vm4, %v8733_v11, 0.0  ;;  %vm10220_vm4 = vmmov %vm10094_vm0 }
 0x679   : > { %v4471_v54 = vpop.f32.mrf.mxu2 }
 0x67e   : > { %v4844_v45 = vpop.f32.mrf.mxu1 }
 0x67f   : > { %v8765_v61 = vadd.f32 %v4844_v45, %v8644_v47 }
 0x681   : > { %5759 = vmatmul.msk.bf16.gmra.mxu1 %vm10193_vm5, %v10192_v29  ;;  %vm10215_vm5 = vmmov %vm10094_vm0 }
 0x686   : > { %v4846_v13 = vpop.f32.mrf.mxu1 }
 0x687   : > { %v8770_v27 = vadd.f32 %v4846_v13, %v8653_v31  ;;  %v4941_v13 = vsel %vm10207_vm9, %v8746_v32, 0.0  ;;  %vm10222_vm9 = vmmov %vm10094_vm0 }
 0x68e   : > { %v4849_v25 = vpop.f32.mrf.mxu1 }
 0x68f   : > { %v8773_v58 = vadd.f32 %v4849_v25, %v8659_v62  ;;  %v4943_v25 = vsel %vm10094_vm0, %v8749_v15, 0.0 }
 0x691   : > { %5760 = vmatmul.msk.bf16.gmra.mxu1 %vm10195_vm1, %v10194_v50  ;;  %vm10216_vm1 = vmmov %vm10094_vm0 }
 0x696   : > { %v4851_v59 = vpop.f32.mrf.mxu1 }
 0x697   : > { %v8778_v41 = vadd.f32 %v4851_v59, %v8662_v8 }
 0x699   : > { %10196 = vst [vmem:[#allocation81_spill] sm:$0xff] %v8778_v41 }
 0x69e   : > { %v4854_v47 = vpop.f32.mrf.mxu1 }
 0x69f   : > { %v8781_v7 = vadd.f32 %v4854_v47, %v8667_v39  ;;  %v4945_v47 = vsel %vm10208_vm13, %v8754_v24, 0.0  ;;  %vm10223_vm13 = vmmov %vm10094_vm0 }
 0x6a1   : > { %10197 = vst [vmem:[#allocation46_spill] sm:$0xff] %v8781_v7  ;;  %5761 = vmatmul.msk.bf16.gmra.mxu1 %vm10198_vm14, %v10172_v53  ;;  %vm10217_vm14 = vmmov %vm10094_vm0 }
 0x6a6   : > { %v4856_v31 = vpop.f32.mrf.mxu1 }
 0x6a7   : > { %v8786_v20 = vadd.f32 %v4856_v31, %v8670_v38 }
 0x6ae   : > { %v4859_v62 = vpop.f32.mrf.mxu1 }
 0x6af   : > { %v8789_v49 = vadd.f32 %v4859_v62, %v8675_v3  ;;  %v4602_v3 = vpop.f32.mrf.mxu3 }
 0x6b1   : > { %10199 = vst [vmem:[#allocation83_spill] sm:$0xff] %v8789_v49  ;;  %5762 = vmatmul.msk.bf16.gmra.mxu1 %vm10203_vm7, %v10202_v48  ;;  %vm10218_vm7 = vmmov %vm10094_vm0 }
 0x6b6   : > { %v4861_v8 = vpop.f32.mrf.mxu1 }
 0x6b7   : > { %v8796_v39 = vadd.f32 %v4861_v8, %v8680_v14  ;;  %v4605_v30 = vpop.f32.mrf.mxu3 }
 0x6be   : > { %v4864_v19 = vpop.f32.mrf.mxu1 }
 0x6bf   : > { %v8799_v53 = vadd.f32 %v4864_v19, %v8687_v18  ;;  %v8812_v18 = vpop.f32.mrf.mxu0  ;;  %v4607_v35 = vpop.f32.mrf.mxu3  ;;  %v4949_v19 = vsel %vm10210_vm11, %v8762_v26, 0.0  ;;  %vm10225_vm11 = vmmov %vm10094_vm0 }
 0x6c6   : > { %v4866_v38 = vpop.f32.mrf.mxu1 }
 0x6c7   : > { %v8802_v46 = vadd.f32 %v4866_v38, %v8692_v17  ;;  %v8817_v57 = vpop.f32.mrf.mxu0  ;;  %v4610_v50 = vpop.f32.mrf.mxu3 }
 0x6ce   : > { %v4869_v60 = vpop.f32.mrf.mxu1 }
 0x6cf   : > { %v8807_v12 = vadd.f32 %v4869_v60, %v8699_v5  ;;  %v4937_v5 = vsel %vm10204_vm10, %v8738_v2, 0.0  ;;  %v8831_v62 = vpop.f32.mrf.mxu0  ;;  %v4951_v60 = vsel %vm10211_vm8, %v8765_v61, 0.0  ;;  %vm10219_vm10 = vmmov %vm10094_vm0 }
 0x6d0   : > { %v4938_v45 = vadd.f32 %v4937_v5, %v4936_v28  ;;  %v4612_v5 = vpop.f32.mrf.mxu3  ;;  %vm10226_vm8 = vmmov %vm10094_vm0 }
 0x6d6   : > { %v4871_v14 = vpop.f32.mrf.mxu1 }
 0x6d7   : > { %v8810_v55 = vadd.f32 %v4871_v14, %v8704_v16  ;;  %v4939_v16 = vsel %vm10206_vm3, %v8741_v51, 0.0  ;;  %vm10221_vm3 = vmmov %vm10094_vm0 }
 0x6de   : > { %v4874_v1 = vpop.f32.mrf.mxu1 }
 0x6df   : > { %v8815_v17 = vadd.f32 %v4874_v1, %v8711_v37  ;;  %v4940_v37 = vadd.f32 %v4939_v16, %v4938_v45  ;;  %v4953_v1 = vsel %vm10212_vm12, %v8770_v27, 0.0  ;;  %v4955_v16 = vsel %vm10213_vm6, %v8773_v58, 0.0  ;;  %vm10227_vm12 = vmmov %vm10094_vm0 }
 0x6e0   : > { %vm10228_vm6 = vmmov %vm10094_vm0 }
 0x6e1   : > { %v4942_v59 = vadd.f32 %v4941_v13, %v4940_v37  ;;  %v4745_v37 = vpop.f32.mrf.mxu0 }
 0x6e3   : > { %v4944_v31 = vadd.f32 %v4943_v25, %v4942_v59  ;;  %v4957_v25 = vsel %vm10214_vm15, %v8778_v41, 0.0  ;;  %v4474_v59 = vpop.f32.mrf.mxu2  ;;  %v4511_v41 = vadd.f32 %v4464_v40, %v8683_v21  ;;  %vm10229_vm15 = vmmov %vm10094_vm0 }
 0x6e5   : > { %v4946_v48 = vadd.f32 %v4945_v47, %v4944_v31  ;;  %v4959_v31 = vsel %vm10215_vm5, %v8781_v7, 0.0  ;;  %vm10230_vm5 = vmmov %vm10094_vm0 }
 0x6e6   : > { %v4876_v29 = vpop.f32.mrf.mxu1 }
 0x6e7   : > { %v4948_v38 = vadd.f32 %v4947_v42, %v4946_v48  ;;  %v4961_v48 = vsel %vm10216_vm1, %v8786_v20, 0.0  ;;  %vm10231_vm1 = vmmov %vm10094_vm0 }
 0x6e9   : > { %v4950_v14 = vadd.f32 %v4949_v19, %v4948_v38  ;;  %v4510_v38 = vadd.f32 %v4461_v0, %v8678_v63  ;;  %v4513_v63 = vadd.f32 %v4469_v4, %v8695_v52  ;;  %v4515_v52 = vadd.f32 %v4474_v59, %v8707_v33 }
 0x6eb   : > { %v4952_v28 = vadd.f32 %v4951_v60, %v4950_v14  ;;  %v4963_v60 = vsel %vm10217_vm14, %v8789_v49, 0.0  ;;  %v4615_v14 = vpop.f32.mrf.mxu3  ;;  %v4651_v7 = vadd.f32 %v4602_v3, %v4510_v38  ;;  %v4476_v0 = vpop.f32.mrf.mxu2  ;;  %v4652_v49 = vadd.f32 %v4605_v30, %v4511_v41  ;;  %vm10232_vm14 = vmmov %vm10094_vm0 }
 0x6ec   : > { %v4971_v3 = vsel %vm10221_vm3, %v8807_v12, 0.0  ;;  %v4973_v41 = vsel %vm10222_vm9, %v8810_v55, 0.0  ;;  %vm10237_vm3 = vmmov %vm10094_vm0 }
 0x6ed   : > { %v4954_v45 = vadd.f32 %v4953_v1, %v4952_v28  ;;  %v4785_v4 = vadd.f32 %v8812_v18, %v4652_v49  ;;  %vm10238_vm9 = vmmov %vm10094_vm0 }
 0x6ee   : > { %v4879_v8 = vpop.f32.mrf.mxu1 }
 0x6ef   : > { %v4956_v47 = vadd.f32 %v4955_v16, %v4954_v45  ;;  %v4965_v16 = vsel %vm10218_vm7, %v8796_v39, 0.0  ;;  %vm10233_vm7 = vmmov %vm10094_vm0 }
 0x6f1   : > { %v4958_v42 = vadd.f32 %v4957_v25, %v4956_v47  ;;  %v4512_v25 = vadd.f32 %v4466_v6, %v8690_v23  ;;  %v4748_v47 = vpop.f32.mrf.mxu0  ;;  %v4784_v23 = vadd.f32 %v8804_v43, %v4651_v7  ;;  %v4654_v6 = vadd.f32 %v4610_v50, %v4513_v63 }
 0x6f2   : > { %v4656_v50 = vadd.f32 %v4615_v14, %v4515_v52 }
 0x6f3   : > { %v4960_v19 = vadd.f32 %v4959_v31, %v4958_v42  ;;  %v4967_v31 = vsel %vm10219_vm10, %v8799_v53, 0.0  ;;  %v4653_v40 = vadd.f32 %v4607_v35, %v4512_v25  ;;  %v8868_v30 = vadd.f32 %v4876_v29, %v4784_v23  ;;  %v4617_v35 = vpop.f32.mrf.mxu3  ;;  %v4479_v18 = vpop.f32.mrf.mxu2  ;;  %vm10235_vm10 = vmmov %vm10094_vm0 }
 0x6f4   : > { %v4787_v49 = vadd.f32 %v8831_v62, %v4654_v6 }
 0x6f5   : > { %v4962_v1 = vadd.f32 %v4961_v48, %v4960_v19  ;;  %v4969_v48 = vsel %vm10220_vm4, %v8802_v46, 0.0  ;;  %v4514_v19 = vadd.f32 %v4471_v54, %v8702_v36  ;;  %v4975_v54 = vsel %vm10094_vm0, %v8815_v17, 0.0  ;;  %vm10236_vm4 = vmmov %vm10094_vm0 }
 0x6f6   : > { %v4881_v13 = vpop.f32.mrf.mxu1  ;;  %v4786_v7 = vadd.f32 %v8817_v57, %v4653_v40  ;;  %v4977_v59 = vsel %vm10223_vm13, %v8868_v30, 0.0  ;;  %vm10239_vm13 = vmmov %vm10094_vm0 }
 0x6f7   : > { %v4964_v45 = vadd.f32 %v4963_v60, %v4962_v1  ;;  %v4655_v36 = vadd.f32 %v4612_v5, %v4514_v19  ;;  %v4516_v5 = vadd.f32 %v4476_v0, %v8714_v22 }
 0x6f8   : > { %v8878_v29 = vadd.f32 %v4881_v13, %v4786_v7  ;;  %v4789_v13 = vadd.f32 %v4748_v47, %v4656_v50 }
 0x6f9   : > { %v4966_v42 = vadd.f32 %v4965_v16, %v4964_v45  ;;  %v8873_v16 = vadd.f32 %v4879_v8, %v4785_v4  ;;  %v4750_v33 = vpop.f32.mrf.mxu0  ;;  %v4788_v57 = vadd.f32 %v4745_v37, %v4655_v36  ;;  %v4657_v62 = vadd.f32 %v4617_v35, %v4516_v5 }
 0x6fa   : > { %v4981_v63 = vsel %vm10225_vm11, %v8878_v29, 0.0  ;;  %vm10242_vm11 = vmmov %vm10094_vm0 }
 0x6fb   : > { %v4968_v21 = vadd.f32 %v4967_v31, %v4966_v42  ;;  %v4979_v8 = vsel %vm10224_vm2, %v8873_v16, 0.0  ;;  %v4620_v0 = vpop.f32.mrf.mxu3  ;;  %v4790_v6 = vadd.f32 %v4750_v33, %v4657_v62  ;;  %vm10240_vm2 = vmmov %vm10094_vm0 }
 0x6fd   : > { %v4970_v38 = vadd.f32 %v4969_v48, %v4968_v21 }
 0x6fe   : > { %v4884_v28 = vpop.f32.mrf.mxu1 }
 0x6ff   : > { %v4972_v1 = vadd.f32 %v4971_v3, %v4970_v38  ;;  %v8884_v25 = vadd.f32 %v4884_v28, %v4787_v49  ;;  %v4517_v3 = vadd.f32 %v4479_v18, %v8717_v56  ;;  %v4481_v38 = vpop.f32.mrf.mxu2 }
 0x701   : > { %v4974_v43 = vadd.f32 %v4973_v41, %v4972_v1  ;;  %v4983_v21 = vsel %vm10226_vm8, %v8884_v25, 0.0  ;;  %v4753_v19 = vpop.f32.mrf.mxu0  ;;  %v4658_v4 = vadd.f32 %v4620_v0, %v4517_v3  ;;  %vm10244_vm8 = vmmov %vm10094_vm0 }
 0x703   : > { %v4976_v45 = vadd.f32 %v4975_v54, %v4974_v43  ;;  %v4622_v36 = vpop.f32.mrf.mxu3  ;;  %v4518_v54 = vadd.f32 %v4481_v38, %v8722_v9  ;;  %v4791_v7 = vadd.f32 %v4753_v19, %v4658_v4 }
 0x705   : > { %v4978_v31 = vadd.f32 %v4977_v59, %v4976_v45  ;;  %v4659_v49 = vadd.f32 %v4622_v36, %v4518_v54  ;;  %v10234_v54 = vld [vmem:[#allocation71_spill] sm:$0xff] }
 0x706   : > { %v4886_v60 = vpop.f32.mrf.mxu1 }
 0x707   : > { %v8888_v42 = vadd.f32 %v4886_v60, %v4788_v57  ;;  %v4980_v48 = vadd.f32 %v4979_v8, %v4978_v31  ;;  %v4484_v56 = vpop.f32.mrf.mxu2 }
 0x708   : > { %v4519_v45 = vadd.f32 %v4484_v56, %v8725_v44 }
 0x709   : > { %v4982_v40 = vadd.f32 %v4981_v63, %v4980_v48  ;;  %v4985_v28 = vsel %vm10227_vm12, %v8888_v42, 0.0  ;;  %v4755_v59 = vpop.f32.mrf.mxu0  ;;  %vm10245_vm12 = vmmov %vm10094_vm0 }
 0x70a   : > { %v4792_v5 = vadd.f32 %v4755_v59, %v4659_v49 }
 0x70b   : > { %v4984_v37 = vadd.f32 %v4983_v21, %v4982_v40  ;;  %v4625_v8 = vpop.f32.mrf.mxu3 }
 0x70d   : > { %v4986_v47 = vadd.f32 %v4985_v28, %v4984_v37 }
 0x70e   : > { %v4889_v14 = vpop.f32.mrf.mxu1 }
 0x70f   : > { %v4930_v22 = vadd.f32 %v4889_v14, %v4789_v13  ;;  %v4660_v14 = vadd.f32 %v4625_v8, %v4519_v45  ;;  %v4486_v9 = vpop.f32.mrf.mxu2 }
 0x710   : > { %v4520_v62 = vadd.f32 %v4486_v9, %v8730_v10 }
 0x711   : > { %v4987_v23 = vsel %vm10228_vm6, %v4930_v22, 0.0  ;;  %v4758_v13 = vpop.f32.mrf.mxu0  ;;  %vm10247_vm6 = vmmov %vm10094_vm0 }
 0x712   : > { %v4988_v41 = vadd.f32 %v4987_v23, %v4986_v47  ;;  %v4793_v21 = vadd.f32 %v4758_v13, %v4660_v14 }
 0x713   : > { %v4627_v28 = vpop.f32.mrf.mxu3 }
 0x714   : > { %v4661_v37 = vadd.f32 %v4627_v28, %v4520_v62 }
 0x716   : > { %v4891_v60 = vpop.f32.mrf.mxu1 }
 0x717   : > { %v4931_v52 = vadd.f32 %v4891_v60, %v4790_v6 }
 0x719   : > { %v4989_v35 = vsel %vm10229_vm15, %v4931_v52, 0.0  ;;  %v4760_v3 = vpop.f32.mrf.mxu0  ;;  %vm10248_vm15 = vmmov %vm10094_vm0 }
 0x71a   : > { %v4990_v1 = vadd.f32 %v4989_v35, %v4988_v41  ;;  %v4794_v23 = vadd.f32 %v4760_v3, %v4661_v37 }
 0x71e   : > { %v4894_v43 = vpop.f32.mrf.mxu1 }
 0x71f   : > { %v4932_v50 = vadd.f32 %v4894_v43, %v4791_v7 }
 0x721   : > { %v4991_v33 = vsel %vm10230_vm5, %v4932_v50, 0.0  ;;  %vm10249_vm5 = vmmov %vm10094_vm0 }
 0x722   : > { %v4992_v18 = vadd.f32 %v4991_v33, %v4990_v1 }
 0x726   : > { %v4896_v57 = vpop.f32.mrf.mxu1 }
 0x727   : > { %v4933_v31 = vadd.f32 %v4896_v57, %v4792_v5 }
 0x729   : > { %v4993_v63 = vsel %vm10231_vm1, %v4933_v31, 0.0  ;;  %vm10250_vm1 = vmmov %vm10094_vm0 }
 0x72a   : > { %v4994_v48 = vadd.f32 %v4993_v63, %v4992_v18 }
 0x72e   : > { %v4899_v0 = vpop.f32.mrf.mxu1 }
 0x72f   : > { %v4934_v40 = vadd.f32 %v4899_v0, %v4793_v21 }
 0x731   : > { %v4995_v19 = vsel %vm10232_vm14, %v4934_v40, 0.0  ;;  %vm10251_vm14 = vmmov %vm10094_vm0 }
 0x732   : > { %v4996_v44 = vadd.f32 %v4995_v19, %v4994_v48 }
 0x736   : > { %v4901_v6 = vpop.f32.mrf.mxu1 }
 0x737   : > { %v4935_v38 = vadd.f32 %v4901_v6, %v4794_v23 }
 0x739   : > { %v4997_v47 = vsel %vm10233_vm7, %v4935_v38, 0.0  ;;  %vm10252_vm7 = vmmov %vm10094_vm0 }
 0x73a   : > { %v4998_v60 = vadd.f32 %v4997_v47, %v4996_v44 }
 0x73c   : > { %v4999_v41 = vrot.slane %v4998_v60, 4 }
 0x73e   : > { %v5000_v4 = vadd.f32 %v4999_v41, %v4998_v60 }
 0x740   : > { %v5001_v35 = vrot.slane %v5000_v4, 2 }
 0x742   : > { %v5002_v1 = vadd.f32 %v5001_v35, %v5000_v4  ;;  %v10243_v4 = vld [vmem:[#allocation46_spill] sm:$0xff] }
 0x744   : > { %v5003_v10 = vrot.slane %v5002_v1, 1 }
 0x746   : > { %v5004_v36 = vadd.f32 %v5003_v10, %v5002_v1 }
 0x748   : > { %v8905_v7 = vmul.f32 %v5004_v36, %v10234_v54 }
 0x74a   : > { %v8908_v43 = vsub.f32 %v4930_v22, %v8905_v7  ;;  %v8911_v59 = vsub.f32 %v4931_v52, %v8905_v7  ;;  %v8914_v56 = vsub.f32 %v4932_v50, %v8905_v7  ;;  %v8917_v49 = vsub.f32 %v4933_v31, %v8905_v7 }
 0x74b   : > { %v8920_v33 = vsub.f32 %v4934_v40, %v8905_v7  ;;  %v8923_v18 = vsub.f32 %v4935_v38, %v8905_v7  ;;  %v8927_v45 = vsub.f32 %v8733_v11, %v8905_v7  ;;  %v8931_v22 = vsub.f32 %v8738_v2, %v8905_v7  ;;  %v10241_v38 = vld [vmem:[#allocation81_spill] sm:$0xff] }
 0x74c   : > { %v8935_v52 = vsub.f32 %v8741_v51, %v8905_v7  ;;  %v8939_v50 = vsub.f32 %v8746_v32, %v8905_v7  ;;  %v8947_v11 = vsub.f32 %v8749_v15, %v8905_v7  ;;  %v8953_v51 = vsub.f32 %v8754_v24, %v8905_v7 }
 0x74d   : > { %v5038_v5 = vmul.f32 %v8927_v45, %v8927_v45  ;;  %v5039_v8 = vmul.f32 %v8931_v22, %v8931_v22  ;;  %v8961_v63 = vsub.f32 %v8757_v34, %v8905_v7  ;;  %v8968_v24 = vsub.f32 %v8762_v26, %v8905_v7 }
 0x74e   : > { %v5040_v2 = vmul.f32 %v8935_v52, %v8935_v52  ;;  %v5041_v32 = vmul.f32 %v8939_v50, %v8939_v50  ;;  %v5042_v15 = vmul.f32 %v8947_v11, %v8947_v11  ;;  %v5043_v48 = vmul.f32 %v8953_v51, %v8953_v51 }
 0x74f   : > { %v5070_v57 = vsel %vm10235_vm10, %v5038_v5, 0.0  ;;  %v5071_v31 = vsel %vm10236_vm4, %v5039_v8, 0.0  ;;  %v8975_v34 = vsub.f32 %v8765_v61, %v8905_v7  ;;  %v5044_v0 = vmul.f32 %v8961_v63, %v8961_v63  ;;  %vm10253_vm10 = vmmov %vm10094_vm0 }
 0x750   : > { %v5072_v14 = vadd.f32 %v5071_v31, %v5070_v57  ;;  %v5073_v13 = vsel %vm10237_vm3, %v5040_v2, 0.0  ;;  %v5075_v62 = vsel %vm10238_vm9, %v5041_v32, 0.0  ;;  %v5077_v40 = vsel %vm10094_vm0, %v5042_v15, 0.0  ;;  %v10246_v32 = vld [vmem:[#allocation83_spill] sm:$0xff]  ;;  %vm10254_vm4 = vmmov %vm10094_vm0 }
 0x751   : > { %v8982_v26 = vsub.f32 %v8770_v27, %v8905_v7  ;;  %v5045_v37 = vmul.f32 %v8968_v24, %v8968_v24  ;;  %v5079_v19 = vsel %vm10239_vm13, %v5043_v48, 0.0  ;;  %v8989_v61 = vsub.f32 %v8773_v58, %v8905_v7  ;;  %vm10255_vm3 = vmmov %vm10094_vm0 }
 0x752   : > { %v5074_v9 = vadd.f32 %v5073_v13, %v5072_v14  ;;  %v5046_v3 = vmul.f32 %v8975_v34, %v8975_v34  ;;  %v5081_v23 = vsel %vm10240_vm2, %v5044_v0, 0.0  ;;  %v8996_v27 = vsub.f32 %v10241_v38, %v8905_v7  ;;  %vm10256_vm9 = vmmov %vm10094_vm0 }
 0x753   : > { %v5047_v47 = vmul.f32 %v8982_v26, %v8982_v26  ;;  %v5083_v60 = vsel %vm10242_vm11, %v5045_v37, 0.0  ;;  %v9003_v58 = vsub.f32 %v10243_v4, %v8905_v7  ;;  %v5048_v35 = vmul.f32 %v8989_v61, %v8989_v61  ;;  %vm10257_vm13 = vmmov %vm10094_vm0 }
 0x754   : > { %v5076_v21 = vadd.f32 %v5075_v62, %v5074_v9  ;;  %v5085_v1 = vsel %vm10244_vm8, %v5046_v3, 0.0  ;;  %v9010_v36 = vsub.f32 %v8786_v20, %v8905_v7  ;;  %v5049_v5 = vmul.f32 %v8996_v27, %v8996_v27  ;;  %vm10258_vm2 = vmmov %vm10094_vm0 }
 0x755   : > { %v5087_v8 = vsel %vm10245_vm12, %v5047_v47, 0.0  ;;  %v9017_v57 = vsub.f32 %v10246_v32, %v8905_v7  ;;  %v5050_v31 = vmul.f32 %v9003_v58, %v9003_v58  ;;  %v5089_v14 = vsel %vm10247_vm6, %v5048_v35, 0.0  ;;  %vm10259_vm11 = vmmov %vm10094_vm0 }
 0x756   : > { %v5078_v28 = vadd.f32 %v5077_v40, %v5076_v21  ;;  %v9024_v20 = vsub.f32 %v8796_v39, %v8905_v7  ;;  %v5051_v13 = vmul.f32 %v9010_v36, %v9010_v36  ;;  %v5091_v9 = vsel %vm10248_vm15, %v5049_v5, 0.0  ;;  %vm10260_vm8 = vmmov %vm10094_vm0 }
 0x757   : > { %v9031_v62 = vsub.f32 %v8799_v53, %v8905_v7  ;;  %v5052_v21 = vmul.f32 %v9017_v57, %v9017_v57  ;;  %v5093_v0 = vsel %vm10249_vm5, %v5050_v31, 0.0  ;;  %v9038_v39 = vsub.f32 %v8802_v46, %v8905_v7  ;;  %vm10261_vm12 = vmmov %vm10094_vm0 }
 0x758   : > { %v5080_v44 = vadd.f32 %v5079_v19, %v5078_v28  ;;  %v5053_v28 = vmul.f32 %v9024_v20, %v9024_v20  ;;  %v5095_v37 = vsel %vm10250_vm1, %v5051_v13, 0.0  ;;  %v9045_v53 = vsub.f32 %v8807_v12, %v8905_v7  ;;  %vm10262_vm6 = vmmov %vm10094_vm0 }
 0x759   : > { %v5097_v3 = vsel %vm10251_vm14, %v5052_v21, 0.0  ;;  %v9052_v46 = vsub.f32 %v8810_v55, %v8905_v7  ;;  %v9059_v12 = vsub.f32 %v8815_v17, %v8905_v7  ;;  %v9066_v55 = vsub.f32 %v8868_v30, %v8905_v7  ;;  %vm10263_vm15 = vmmov %vm10094_vm0 }
 0x75a   : > { %v5082_v6 = vadd.f32 %v5081_v23, %v5080_v44  ;;  %v5054_v44 = vmul.f32 %v9031_v62, %v9031_v62  ;;  %v5099_v38 = vsel %vm10252_vm7, %v5053_v28, 0.0  ;;  %v9073_v17 = vsub.f32 %v8873_v16, %v8905_v7  ;;  %vm10264_vm5 = vmmov %vm10094_vm0 }
 0x75b   : > { %v5057_v35 = vmul.f32 %v9052_v46, %v9052_v46  ;;  %v5058_v5 = vmul.f32 %v9059_v12, %v9059_v12  ;;  %v9080_v30 = vsub.f32 %v8878_v29, %v8905_v7  ;;  %v5059_v32 = vmul.f32 %v9066_v55, %v9066_v55  ;;  %vm10265_vm1 = vmmov %vm10094_vm0 }
 0x75c   : > { %v5084_v41 = vadd.f32 %v5083_v60, %v5082_v6  ;;  %v5055_v6 = vmul.f32 %v9038_v39, %v9038_v39  ;;  %v5056_v60 = vmul.f32 %v9045_v53, %v9045_v53  ;;  %v9087_v16 = vsub.f32 %v8884_v25, %v8905_v7  ;;  %vm10266_vm14 = vmmov %vm10094_vm0 }
 0x75d   : > { %v5107_v31 = vsel %vm10256_vm9, %v5057_v35, 0.0  ;;  %v5109_v13 = vsel %vm10094_vm0, %v5058_v5, 0.0  ;;  %v9094_v29 = vsub.f32 %v8888_v42, %v8905_v7  ;;  %v5111_v21 = vsel %vm10257_vm13, %v5059_v32, 0.0  ;;  %vm10267_vm7 = vmmov %vm10094_vm0 }
 0x75e   : > { %v5086_v10 = vadd.f32 %v5085_v1, %v5084_v41  ;;  %v5101_v41 = vsel %vm10253_vm10, %v5054_v44, 0.0  ;;  %v5103_v1 = vsel %vm10254_vm4, %v5055_v6, 0.0  ;;  %v5062_v25 = vmul.f32 %v9087_v16, %v9087_v16  ;;  %vm10269_vm9 = vmmov %vm10094_vm0 }
 0x75f   : > { %v5064_v42 = vmul.f32 %v8908_v43, %v8908_v43  ;;  %vm10276_vm13 = vmmov %vm10094_vm0 }
 0x760   : > { %v5088_v2 = vadd.f32 %v5087_v8, %v5086_v10  ;;  %v5105_v8 = vsel %vm10255_vm3, %v5056_v60, 0.0  ;;  %v5117_v7 = vsel %vm10260_vm8, %v5062_v25, 0.0  ;;  %vm10282_vm8 = vmmov %vm10094_vm0 }
 0x761   : > { %v5121_v60 = vsel %vm10262_vm6, %v5064_v42, 0.0  ;;  %vm10286_vm6 = vmmov %vm10094_vm0 }
 0x762   : > { %v5090_v15 = vadd.f32 %v5089_v14, %v5088_v2 }
 0x764   : > { %v5092_v48 = vadd.f32 %v5091_v9, %v5090_v15  ;;  %v5060_v15 = vmul.f32 %v9073_v17, %v9073_v17 }
 0x766   : > { %v5094_v40 = vadd.f32 %v5093_v0, %v5092_v48  ;;  %v5061_v48 = vmul.f32 %v9080_v30, %v9080_v30 }
 0x768   : > { %v5096_v19 = vadd.f32 %v5095_v37, %v5094_v40  ;;  %v5113_v40 = vsel %vm10258_vm2, %v5060_v15, 0.0  ;;  %v5063_v37 = vmul.f32 %v9094_v29, %v9094_v29  ;;  %vm10278_vm2 = vmmov %vm10094_vm0 }
 0x76a   : > { %v5098_v23 = vadd.f32 %v5097_v3, %v5096_v19  ;;  %v5115_v19 = vsel %vm10259_vm11, %v5061_v48, 0.0  ;;  %v5119_v6 = vsel %vm10261_vm12, %v5063_v37, 0.0  ;;  %vm10280_vm11 = vmmov %vm10094_vm0 }
 0x76b   : > { %vm10284_vm12 = vmmov %vm10094_vm0 }
 0x76c   : > { %v5100_v47 = vadd.f32 %v5099_v38, %v5098_v23  ;;  %v5065_v23 = vmul.f32 %v8911_v59, %v8911_v59 }
 0x76e   : > { %v5102_v4 = vadd.f32 %v5101_v41, %v5100_v47  ;;  %v5066_v47 = vmul.f32 %v8914_v56, %v8914_v56  ;;  %v5123_v35 = vsel %vm10263_vm15, %v5065_v23, 0.0  ;;  %vm10288_vm15 = vmmov %vm10094_vm0 }
 0x770   : > { %v5104_v10 = vadd.f32 %v5103_v1, %v5102_v4  ;;  %v5067_v4 = vmul.f32 %v8917_v49, %v8917_v49  ;;  %v5125_v5 = vsel %vm10264_vm5, %v5066_v47, 0.0  ;;  %vm10290_vm5 = vmmov %vm10094_vm0 }
 0x772   : > { %v5106_v2 = vadd.f32 %v5105_v8, %v5104_v10  ;;  %v5068_v10 = vmul.f32 %v8920_v33, %v8920_v33  ;;  %v5127_v32 = vsel %vm10265_vm1, %v5067_v4, 0.0  ;;  %vm10292_vm1 = vmmov %vm10094_vm0 }
 0x774   : > { %v5108_v14 = vadd.f32 %v5107_v31, %v5106_v2  ;;  %v5069_v2 = vmul.f32 %v8923_v18, %v8923_v18 }
 0x776   : > { %v5110_v9 = vadd.f32 %v5109_v13, %v5108_v14  ;;  %v5129_v14 = vsel %vm10266_vm14, %v5068_v10, 0.0  ;;  %v5131_v13 = vsel %vm10267_vm7, %v5069_v2, 0.0  ;;  %vm10294_vm14 = vmmov %vm10094_vm0 }
 0x777   : > { %vm10296_vm7 = vmmov %vm10094_vm0 }
 0x778   : > { %v5112_v0 = vadd.f32 %v5111_v21, %v5110_v9 }
 0x77a   : > { %v5114_v28 = vadd.f32 %v5113_v40, %v5112_v0 }
 0x77c   : > { %v5116_v44 = vadd.f32 %v5115_v19, %v5114_v28 }
 0x77e   : > { %v5118_v3 = vadd.f32 %v5117_v7, %v5116_v44 }
 0x780   : > { %v5120_v38 = vadd.f32 %v5119_v6, %v5118_v3 }
 0x782   : > { %v5122_v41 = vadd.f32 %v5121_v60, %v5120_v38 }
 0x784   : > { %v5124_v1 = vadd.f32 %v5123_v35, %v5122_v41 }
 0x786   : > { %v5126_v8 = vadd.f32 %v5125_v5, %v5124_v1  ;;  %v10270_v5 = vld [vmem:[#allocation13_spill] sm:$0xff] }
 0x788   : > { %v5128_v31 = vadd.f32 %v5127_v32, %v5126_v8  ;;  %v10272_v32 = vld [vmem:[#allocation18_spill] sm:$0xff] }
 0x78a   : > { %v5130_v15 = vadd.f32 %v5129_v14, %v5128_v31  ;;  %v10273_v31 = vld [vmem:[#allocation20_spill] sm:$0xff] }
 0x78c   : > { %v5132_v9 = vadd.f32 %v5131_v13, %v5130_v15  ;;  %v10275_v13 = vld [vmem:[#allocation28_spill] sm:$0xff] }
 0x78e   : > { %v5133_v48 = vrot.slane %v5132_v9, 4 }
 0x790   : > { %v5134_v21 = vadd.f32 %v5133_v48, %v5132_v9  ;;  %v10277_v48 = vld [vmem:[#allocation35_spill] sm:$0xff] }
 0x792   : > { %v5135_v0 = vrot.slane %v5134_v21, 2 }
 0x794   : > { %v5136_v25 = vadd.f32 %v5135_v0, %v5134_v21  ;;  %v10279_v0 = vld [vmem:[#allocation36_spill] sm:$0xff] }
 0x796   : > { %v5137_v40 = vrot.slane %v5136_v25, 1 }
 0x798   : > { %v5138_v28 = vadd.f32 %v5137_v40, %v5136_v25  ;;  %v10281_v40 = vld [vmem:[#allocation42_spill] sm:$0xff] }
 0x79a   : > { %v5139_v37 = vmul.f32 %v5138_v28, %v10234_v54  ;;  %v10268_v54 = vld [vmem:[#allocation60_spill] sm:$0xff] }
 0x79c   : > { %v5140_v19 = vadd.f32 1e-05, %v5139_v37  ;;  %v10283_v37 = vld [vmem:[#allocation43_spill] sm:$0xff] }
 0x79e   : > { %5856 = vrsqrt.f32 %v5140_v19  ;;  %vm5147_vm4 = vweird.f32 %v5140_v19 }
 0x7a4   : > { %v5857_v44 = vpop.eup %5856 }
 0x7a5   : > { %v5142_v42 = vmul.f32 %v5857_v44, %v5140_v19  ;;  %vm5148_vm10 = vweird.f32 %v5857_v44 }
 0x7a6   : > { %vm5149_vm3 = vmor %vm5147_vm4, %vm5148_vm10 }
 0x7a7   : > { %v5143_v7 = vmul.f32 %v5857_v44, %v5142_v42  ;;  %vm10298_vm10 = vmmov %vm10094_vm0 }
 0x7a8   : > { %vm10300_vm4 = vmmov %vm10094_vm0 }
 0x7a9   : > { %v5144_v3 = vmul.f32 0.5, %v5143_v7  ;;  %v10287_v7 = vld [vmem:[#allocation50_spill] sm:$0xff] }
 0x7ab   : > { %v5145_v23 = vsub.f32 1.5, %v5144_v3 }
 0x7ad   : > { %v5146_v6 = vmul.f32 %v5857_v44, %v5145_v23  ;;  %v10289_v23 = vld [vmem:[#allocation58_spill] sm:$0xff] }
 0x7af   : > { %v9129_v38 = vsel %vm5149_vm3, %v5857_v44, %v5146_v6  ;;  %v10285_v44 = vld [vmem:[#allocation49_spill] sm:$0xff]  ;;  %vm10302_vm3 = vmmov %vm10094_vm0 }
 0x7b0   : > { %v5182_v47 = vmul.f32 %v9129_v38, %v8923_v18  ;;  %v5151_v41 = vmul.f32 %v9129_v38, %v8927_v45  ;;  %v5152_v4 = vmul.f32 %v9129_v38, %v8931_v22  ;;  %v5153_v35 = vmul.f32 %v9129_v38, %v8935_v52  ;;  %v10271_v22 = vld [vmem:[#allocation14_spill] sm:$0xff] }
 0x7b1   : > { %v5154_v18 = vmul.f32 %v9129_v38, %v8939_v50  ;;  %v5155_v1 = vmul.f32 %v9129_v38, %v8947_v11  ;;  %v5156_v10 = vmul.f32 %v9129_v38, %v8953_v51  ;;  %v5157_v45 = vmul.f32 %v9129_v38, %v8961_v63  ;;  %v10274_v51 = vld [vmem:[#allocation27_spill] sm:$0xff] }
 0x7b2   : > { %v5214_v60 = vadd.f32 %v5182_v47, %v10268_v54  ;;  %v5183_v8 = vadd.f32 %v5151_v41, %v10270_v5  ;;  %v5184_v2 = vadd.f32 %v5152_v4, %v10271_v22  ;;  %v5185_v52 = vadd.f32 %v5153_v35, %v10272_v32  ;;  %v10291_v47 = vld [vmem:[#allocation9_spill] sm:$0xff]  ;;  %v10295_v4 = vld [vmem:[#allocation8_spill] sm:$0xff]  ;;  %v10301_v5 = vld [vmem:[#allocation15_spill] sm:$0xff] }
 0x7b3   : > { %v5158_v50 = vmul.f32 %v9129_v38, %v8968_v24  ;;  %v5186_v11 = vadd.f32 %v5154_v18, %v10273_v31  ;;  %v5159_v14 = vmul.f32 %v9129_v38, %v8975_v34  ;;  %v5187_v15 = vadd.f32 %v5155_v1, %v10274_v51  ;;  %v10297_v18 = vld [vmem:[#allocation10_spill] sm:$0xff]  ;;  %v10303_v22 = vld [vmem:[#allocation16_spill] sm:$0xff]  ;;  %v10305_v32 = vld [vmem:[#allocation25_spill] sm:$0xff] }
 0x7b4   : > { %5246 = vst.msk [vmem:[%s9134_s6 + $0xf8] sm:$0xff] %vm10269_vm9, %v5214_v60  ;;  %v5160_v63 = vmul.f32 %v9129_v38, %v8982_v26  ;;  %v5188_v9 = vadd.f32 %v5156_v10, %v10275_v13  ;;  %v5161_v24 = vmul.f32 %v9129_v38, %v8989_v61  ;;  %v5189_v21 = vadd.f32 %v5157_v45, %v10277_v48  ;;  %v10293_v60 = vld [vmem:[#allocation7_spill] sm:$0xff]  ;;  %vm10304_vm9 = vmmov %vm10094_vm0  ;;  %v10310_v51 = vld [vmem:[#allocation34_spill] sm:$0xff] }
 0x7b5   : > { %5215 = vst.msk [vmem:[%s9134_s6] sm:$0xff] %vm10094_vm0, %v5183_v8  ;;  %v5162_v34 = vmul.f32 %v9129_v38, %v8996_v27  ;;  %v5190_v25 = vadd.f32 %v5158_v50, %v10279_v0  ;;  %v5163_v26 = vmul.f32 %v9129_v38, %v9003_v58  ;;  %v5191_v28 = vadd.f32 %v5159_v14, %v10281_v40  ;;  %v10299_v10 = vld [vmem:[#allocation11_spill] sm:$0xff]  ;;  %v10306_v50 = vld [vmem:[#allocation26_spill] sm:$0xff] }
 0x7b6   : > { %5216 = vst.msk [vmem:[%s9134_s6 + $0x8] sm:$0xff] %vm10276_vm13, %v5184_v2  ;;  %v5164_v61 = vmul.f32 %v9129_v38, %v9010_v36  ;;  %v5192_v19 = vadd.f32 %v5160_v63, %v10283_v37  ;;  %v5165_v27 = vmul.f32 %v9129_v38, %v9017_v57  ;;  %v5193_v42 = vadd.f32 %v5161_v24, %v10285_v44  ;;  %vm10307_vm13 = vmmov %vm10094_vm0  ;;  %v10316_v24 = vld [vmem:[#allocation47_spill] sm:$0xff] }
 0x7b7   : > { %5217 = vst.msk [vmem:[%s9134_s6 + $0x10] sm:$0xff] %vm10278_vm2, %v5185_v52  ;;  %v5166_v58 = vmul.f32 %v9129_v38, %v9024_v20  ;;  %v5194_v3 = vadd.f32 %v5162_v34, %v10287_v7  ;;  %v5167_v36 = vmul.f32 %v9129_v38, %v9031_v62  ;;  %v5195_v6 = vadd.f32 %v5163_v26, %v10289_v23  ;;  %vm10309_vm2 = vmmov %vm10094_vm0  ;;  %v10320_v34 = vld [vmem:[#allocation56_spill] sm:$0xff] }
 0x7b8   : > { %5218 = vst.msk [vmem:[%s9134_s6 + $0x18] sm:$0xff] %vm10280_vm11, %v5186_v11  ;;  %v5168_v57 = vmul.f32 %v9129_v38, %v9038_v39  ;;  %v5196_v54 = vadd.f32 %v5164_v61, %v10291_v47  ;;  %v5169_v20 = vmul.f32 %v9129_v38, %v9045_v53  ;;  %v5197_v41 = vadd.f32 %v5165_v27, %v10293_v60  ;;  %v10308_v11 = vld [vmem:[#allocation33_spill] sm:$0xff]  ;;  %vm10311_vm11 = vmmov %vm10094_vm0 }
 0x7b9   : > { %5219 = vst.msk [vmem:[%s9134_s6 + $0x20] sm:$0xff] %vm10282_vm8, %v5187_v15  ;;  %v5170_v62 = vmul.f32 %v9129_v38, %v9052_v46  ;;  %v5198_v35 = vadd.f32 %v5166_v58, %v10295_v4  ;;  %v5171_v39 = vmul.f32 %v9129_v38, %v9059_v12  ;;  %v5199_v1 = vadd.f32 %v5167_v36, %v10297_v18  ;;  %vm10313_vm8 = vmmov %vm10094_vm0 }
 0x7ba   : > { %5220 = vst.msk [vmem:[%s9134_s6 + $0x28] sm:$0xff] %vm10284_vm12, %v5188_v9  ;;  %v5172_v53 = vmul.f32 %v9129_v38, %v9066_v55  ;;  %v5200_v45 = vadd.f32 %v5168_v57, %v10299_v10  ;;  %v5173_v46 = vmul.f32 %v9129_v38, %v9073_v17  ;;  %v5201_v8 = vadd.f32 %v5169_v20, %v10301_v5  ;;  %v10314_v9 = vld [vmem:[#allocation41_spill] sm:$0xff]  ;;  %vm10315_vm12 = vmmov %vm10094_vm0 }
 0x7bb   : > { %5221 = vst.msk [vmem:[%s9134_s6 + $0x30] sm:$0xff] %vm10286_vm6, %v5189_v21  ;;  %v5174_v12 = vmul.f32 %v9129_v38, %v9080_v30  ;;  %v5202_v2 = vadd.f32 %v5170_v62, %v10303_v22  ;;  %v5175_v55 = vmul.f32 %v9129_v38, %v9087_v16  ;;  %v5203_v52 = vadd.f32 %v5171_v39, %v10305_v32  ;;  %vm10317_vm6 = vmmov %vm10094_vm0 }
 0x7bc   : > { %5222 = vst.msk [vmem:[%s9134_s6 + $0x38] sm:$0xff] %vm10288_vm15, %v5190_v25  ;;  %v5176_v17 = vmul.f32 %v9129_v38, %v9094_v29  ;;  %v5204_v31 = vadd.f32 %v5172_v53, %v10306_v50  ;;  %v5177_v30 = vmul.f32 %v9129_v38, %v8908_v43  ;;  %v5205_v14 = vadd.f32 %v5173_v46, %v10308_v11  ;;  %v10312_v43 = vld [vmem:[#allocation40_spill] sm:$0xff]  ;;  %vm10319_vm15 = vmmov %vm10094_vm0  ;;  %v10322_v25 = vld [vmem:[#allocation57_spill] sm:$0xff] }
 0x7bd   : > { %5223 = vst.msk [vmem:[%s9134_s6 + $0x40] sm:$0xff] %vm10290_vm5, %v5191_v28  ;;  %v5178_v16 = vmul.f32 %v9129_v38, %v8911_v59  ;;  %v5206_v29 = vadd.f32 %v5174_v12, %v10310_v51  ;;  %v5179_v15 = vmul.f32 %v9129_v38, %v8914_v56  ;;  %v5207_v63 = vadd.f32 %v5175_v55, %v10312_v43  ;;  %vm10321_vm5 = vmmov %vm10094_vm0 }
 0x7be   : > { %5224 = vst.msk [vmem:[%s9134_s6 + $0x48] sm:$0xff] %vm10292_vm1, %v5192_v19  ;;  %v5180_v13 = vmul.f32 %v9129_v38, %v8917_v49  ;;  %v5208_v59 = vadd.f32 %v5176_v17, %v10314_v9  ;;  %v5181_v56 = vmul.f32 %v9129_v38, %v8920_v33  ;;  %v5209_v48 = vadd.f32 %v5177_v30, %v10316_v24  ;;  %v10318_v49 = vld [vmem:[#allocation48_spill] sm:$0xff]  ;;  %vm10323_vm1 = vmmov %vm10094_vm0  ;;  %v10324_v38 = vld [vmem:[#allocation59_spill] sm:$0xff] }
 0x7bf   : > { %5225 = vst.msk [vmem:[%s9134_s6 + $0x50] sm:$0xff] %vm10294_vm14, %v5193_v42  ;;  %v5210_v21 = vadd.f32 %v5178_v16, %v10318_v49  ;;  %v5211_v0 = vadd.f32 %v5179_v15, %v10320_v34  ;;  %vm10325_vm14 = vmmov %vm10094_vm0 }
 0x7c0   : > { %5226 = vst.msk [vmem:[%s9134_s6 + $0x58] sm:$0xff] %vm10296_vm7, %v5194_v3  ;;  %v5212_v33 = vadd.f32 %v5180_v13, %v10322_v25  ;;  %v5213_v26 = vadd.f32 %v5181_v56, %v10324_v38  ;;  %vm10326_vm7 = vmmov %vm10094_vm0 }
 0x7c1   : > { %5227 = vst.msk [vmem:[%s9134_s6 + $0x60] sm:$0xff] %vm10298_vm10, %v5195_v6  ;;  %vm10327_vm10 = vmmov %vm10094_vm0 }
 0x7c2   : > { %5228 = vst.msk [vmem:[%s9134_s6 + $0x68] sm:$0xff] %vm10300_vm4, %v5196_v54  ;;  %vm10328_vm4 = vmmov %vm10094_vm0 }
 0x7c3   : > { %5229 = vst.msk [vmem:[%s9134_s6 + $0x70] sm:$0xff] %vm10302_vm3, %v5197_v41  ;;  %vm10329_vm3 = vmmov %vm10094_vm0 }
 0x7c4   : > { %5230 = vst.msk [vmem:[%s9134_s6 + $0x78] sm:$0xff] %vm10304_vm9, %v5198_v35 }
 0x7c5   : > { %5231 = vst.msk [vmem:[%s9134_s6 + $0x80] sm:$0xff] %vm10094_vm0, %v5199_v1 }
 0x7c6   : > { %5232 = vst.msk [vmem:[%s9134_s6 + $0x88] sm:$0xff] %vm10307_vm13, %v5200_v45 }
 0x7c7   : > { %5233 = vst.msk [vmem:[%s9134_s6 + $0x90] sm:$0xff] %vm10309_vm2, %v5201_v8 }
 0x7c8   : > { %5234 = vst.msk [vmem:[%s9134_s6 + $0x98] sm:$0xff] %vm10311_vm11, %v5202_v2 }
 0x7c9   : > { %5235 = vst.msk [vmem:[%s9134_s6 + $0xa0] sm:$0xff] %vm10313_vm8, %v5203_v52 }
 0x7ca   : > { %5236 = vst.msk [vmem:[%s9134_s6 + $0xa8] sm:$0xff] %vm10315_vm12, %v5204_v31 }
 0x7cb   : > { %5237 = vst.msk [vmem:[%s9134_s6 + $0xb0] sm:$0xff] %vm10317_vm6, %v5205_v14 }
 0x7cc   : > { %5238 = vst.msk [vmem:[%s9134_s6 + $0xb8] sm:$0xff] %vm10319_vm15, %v5206_v29 }
 0x7cd   : > { %5239 = vst.msk [vmem:[%s9134_s6 + $0xc0] sm:$0xff] %vm10321_vm5, %v5207_v63 }
 0x7ce   : > { %5240 = vst.msk [vmem:[%s9134_s6 + $0xc8] sm:$0xff] %vm10323_vm1, %v5208_v59 }
 0x7cf   : > { %5241 = vst.msk [vmem:[%s9134_s6 + $0xd0] sm:$0xff] %vm10325_vm14, %v5209_v48 }
 0x7d0   : > { %5242 = vst.msk [vmem:[%s9134_s6 + $0xd8] sm:$0xff] %vm10326_vm7, %v5210_v21 }
 0x7d1   : > { %5243 = vst.msk [vmem:[%s9134_s6 + $0xe0] sm:$0xff] %vm10327_vm10, %v5211_v0 }
 0x7d2   : > { %5244 = vst.msk [vmem:[%s9134_s6 + $0xe8] sm:$0xff] %vm10328_vm4, %v5212_v33 }
 0x7d3   : > { %5245 = vst.msk [vmem:[%s9134_s6 + $0xf0] sm:$0xff] %vm10329_vm3, %v5213_v26 }
 0x7d4   : > { %5892 = shalt.err (!%p5889_p3)
}
 0x7d5   : > { %s5930_s24 = smov 128   ;;  %s5931_s30 = smov 8  }
 0x7d6   : > { %5810 = dma.vmem_to_hbm [thread:$0]  (%p5990_p5), %s5261_s10, 4096, %s5263_s11, %s5248_s17, %s5930_s24, %s5930_s24, %s5931_s30  }
 0x7d7 PF: > { %p5816_p4 = scmp.ge.s32.totalorder %s5927_s15, 2  ;;  %s5277_s4 = sand.u32 1, %s5915_s12  }
 0x7d8   : > { %s5278_s5 = scalar_lea.sflag [#allocation4], %s5277_s4 }
 0x7d9   : > { %p5813_p7 = pnand %p5816_p4, %p5994_p6 }
 0x7db   : > { %p5814_p8 = pneg %p5813_p7 }
 0x7dd   : > { %5910 = dma.done.wait (%p5814_p8), %s5278_s5, 4096  }
 0x7de   : > { %5912 = vsyncadd (%p5814_p8), %s5278_s5, 4294963200  ;;  %p13_p9 = scmp.ge.s32.totalorder %s5977_s18, 4   ;;  %s10330_s12 = smov %s5919_s13 }
 0x7df   : > { %s10331_s13 = smov %s5923_s14  ;;  %s10332_s14 = smov %s5988_s21 }
 0x7e0   : > { %s10333_s15 = smov %s5977_s18  ;;  %15 = sbr.rel (!%p13_p9) target bundleno = 3 (0x3), region = 67 }
 0x7e5   :  { %5284 = vsyncpa [#allocation4], 1 }
 0x7e6   :  { %5286 = vsyncpa [#allocation4 + $0x1], 1 }

</bundles_post_ra>
